<compile_context>
chip_gen: v5e
topology: v5e:2x2
jax: 0.10.0
libtpu: 0.0.40
codegen_flags: <defaults>
</compile_context>

<pallas_src>
import jax
import jax.numpy as jnp
from jax.experimental import pallas as pl
from jax.experimental.pallas import tpu as pltpu

# Layer widths of Net3: input -> 128 -> 256 -> 512 -> 256 -> 64 -> 16 -> 4 -> 1
LAYER_SIZES = [128, 256, 512, 256, 64, 16, 4, 1]
_N_LAYERS = len(LAYER_SIZES)
_BIAS_PAD = max(LAYER_SIZES)  # 512 lanes per packed bias row


def _mlp_kernel(x_ref, w1, w2, w3, w4, w5, w6, w7, w8t_ref, b_ref, o_ref):
    w_refs = (w1, w2, w3, w4, w5, w6, w7)
    h = x_ref[...]                                  # (TB, IN) f32
    for li in range(_N_LAYERS - 1):                 # 7 MXU layers + ReLU
        out_dim = LAYER_SIZES[li]
        b = b_ref[li:li + 1, :out_dim]              # static slice of packed biases, (1, out)
        h = jnp.dot(h.astype(jnp.bfloat16), w_refs[li][...],
                    preferred_element_type=jnp.float32) + b
        h = jnp.maximum(h, 0.0)                     # ReLU in f32 on the VPU
    # Final 4 -> 1 layer on VPU/XLU (avoid a 1-lane MXU push + result drain).
    b8 = b_ref[_N_LAYERS - 1:_N_LAYERS, :1]         # (1, 1)
    z = jnp.sum(h * w8t_ref[...], axis=-1, keepdims=True) + b8   # (TB, 1) f32
    o_ref[...] = jax.nn.sigmoid(z)                  # EUP


def net3_forward(x, weights, biases, *, tb=256):
    """x: [B, input_shape] f32. weights[i]: [in_i, out_i] f32. biases[i]: [1, out_i] f32.

    Returns sigmoid(MLP(x)) of shape [B, 1], matching Net3.forward.
    """
    B, in_dim = x.shape

    # Pad batch to a multiple of the tile so every grid step sees a full block.
    num_tiles = pl.cdiv(B, tb)
    Bp = num_tiles * tb
    if Bp != B:
        x = jnp.pad(x, ((0, Bp - B), (0, 0)))

    # bf16 weights for the 7 MXU layers; last (4,1) weight pre-transposed to (1,4) f32
    # for the VPU tail.
    w_bf16 = [w.astype(jnp.bfloat16) for w in weights[:-1]]
    w_last_t = weights[-1].reshape(1, -1).astype(jnp.float32)

    # Pack the 8 biases into one lane-padded (8, 512) f32 array (single VMEM input).
    bias_pack = jnp.zeros((_N_LAYERS, _BIAS_PAD), jnp.float32)
    for i, b in enumerate(biases):
        bias_pack = bias_pack.at[i, :b.shape[-1]].set(b.reshape(-1))

    const = lambda i: (0, 0)   # weights/biases: same block every step -> stay resident
    in_specs = [pl.BlockSpec((tb, in_dim), lambda i: (i, 0))]            # x tiles
    in_specs += [pl.BlockSpec(w.shape, const) for w in w_bf16]           # w1..w7
    in_specs += [pl.BlockSpec(w_last_t.shape, const),                    # w8 (transposed)
                 pl.BlockSpec(bias_pack.shape, const)]                   # packed biases

    out = pl.pallas_call(
        _mlp_kernel,
        out_shape=jax.ShapeDtypeStruct((Bp, 1), jnp.float32),
        grid=(num_tiles,),
        in_specs=in_specs,
        out_specs=pl.BlockSpec((tb, 1), lambda i: (i, 0)),
        compiler_params=pltpu.CompilerParams(
            dimension_semantics=("parallel",)),      # v7x megacore; no-op on v5e/v6e
    )(x, *w_bf16, w_last_t, bias_pack)

    return out[:B]


def init_params(input_shape, key):
    """Deterministic PyTorch-style (uniform fan-in) init for the 8 Linear layers."""
    sizes = [input_shape] + LAYER_SIZES
    weights, biases = [], []
    for i in range(_N_LAYERS):
        fan_in, fan_out = sizes[i], sizes[i + 1]
        key, kw, kb = jax.random.split(key, 3)
        bound = 1.0 / jnp.sqrt(jnp.float32(fan_in))
        w = jax.random.uniform(kw, (fan_in, fan_out), jnp.float32, -bound, bound)
        b = jax.random.uniform(kb, (1, fan_out), jnp.float32, -bound, bound)
        weights.append(w)
        biases.append(b)
    return weights, biases


def reference_forward(x, weights, biases):
    """Pure-f32 JAX reference matching the PyTorch module exactly."""
    h = x
    for i in range(len(weights)):
        h = h @ weights[i] + biases[i]
        h = jnp.maximum(h, 0.0) if i < len(weights) - 1 else jax.nn.sigmoid(h)
    return h


if __name__ == "__main__":
    key = jax.random.PRNGKey(0)
    B, INPUT_SHAPE = 520, 32            # non-multiple of TB -> exercises padding path

    key, kx = jax.random.split(key)
    x = jax.random.normal(kx, (B, INPUT_SHAPE), jnp.float32)
    weights, biases = init_params(INPUT_SHAPE, key)

    out = net3_forward(x, weights, biases, tb=256)
    out = jax.block_until_ready(out)

    ref = reference_forward(x, weights, biases)
    assert out.shape == (B, 1), out.shape
    # bf16 MXU operands (f32 accumulate) -> loosened tolerance vs the f32 reference.
    assert jnp.allclose(out, ref, atol=2e-2, rtol=2e-2), (
        float(jnp.max(jnp.abs(out - ref))))
    print("KERNEL_OK")
</pallas_src>

<mosaic_0001>
module attributes {stable_mosaic.version = 11 : i64} {
  func.func @_mlp_kernel(%arg0: i32, %arg1: memref<256x32xf32, #tpu.memory_space<vmem>>, %arg2: memref<32x128xbf16, #tpu.memory_space<vmem>>, %arg3: memref<128x256xbf16, #tpu.memory_space<vmem>>, %arg4: memref<256x512xbf16, #tpu.memory_space<vmem>>, %arg5: memref<512x256xbf16, #tpu.memory_space<vmem>>, %arg6: memref<256x64xbf16, #tpu.memory_space<vmem>>, %arg7: memref<64x16xbf16, #tpu.memory_space<vmem>>, %arg8: memref<16x4xbf16, #tpu.memory_space<vmem>>, %arg9: memref<1x4xf32, #tpu.memory_space<vmem>>, %arg10: memref<8x512xf32, #tpu.memory_space<vmem>>, %arg11: memref<256x1xf32, #tpu.memory_space<vmem>>) attributes {dimension_semantics = [#tpu.dimension_semantics<parallel>], iteration_bounds = array<i64: 3>, scalar_prefetch = 0 : i64, scratch_operands = 0 : i64, tpu.core_type = #tpu.core_type<tc>, window_params = [{transform_indices = @transform_0, window_bounds = array<i64: 256, 32>}, {pipeline_mode = #tpu.pipeline_mode<synchronous>, transform_indices = @transform_1, window_bounds = array<i64: 32, 128>}, {pipeline_mode = #tpu.pipeline_mode<synchronous>, transform_indices = @transform_2, window_bounds = array<i64: 128, 256>}, {pipeline_mode = #tpu.pipeline_mode<synchronous>, transform_indices = @transform_3, window_bounds = array<i64: 256, 512>}, {pipeline_mode = #tpu.pipeline_mode<synchronous>, transform_indices = @transform_4, window_bounds = array<i64: 512, 256>}, {pipeline_mode = #tpu.pipeline_mode<synchronous>, transform_indices = @transform_5, window_bounds = array<i64: 256, 64>}, {pipeline_mode = #tpu.pipeline_mode<synchronous>, transform_indices = @transform_6, window_bounds = array<i64: 64, 16>}, {pipeline_mode = #tpu.pipeline_mode<synchronous>, transform_indices = @transform_7, window_bounds = array<i64: 16, 4>}, {pipeline_mode = #tpu.pipeline_mode<synchronous>, transform_indices = @transform_8, window_bounds = array<i64: 1, 4>}, {pipeline_mode = #tpu.pipeline_mode<synchronous>, transform_indices = @transform_9, window_bounds = array<i64: 8, 512>}, {transform_indices = @transform_10, window_bounds = array<i64: 256, 1>}]} {
    %c0 = arith.constant 0 : index
    %c0_0 = arith.constant 0 : index
    %0 = vector.load %arg1[%c0, %c0_0] : memref<256x32xf32, #tpu.memory_space<vmem>>, vector<256x32xf32>
    %c0_1 = arith.constant 0 : index
    %c0_2 = arith.constant 0 : index
    %1 = vector.load %arg10[%c0_1, %c0_2] : memref<8x512xf32, #tpu.memory_space<vmem>>, vector<1x128xf32>
    %2 = arith.truncf %0 : vector<256x32xf32> to vector<256x32xbf16>
    %c0_3 = arith.constant 0 : index
    %c0_4 = arith.constant 0 : index
    %3 = vector.load %arg2[%c0_3, %c0_4] : memref<32x128xbf16, #tpu.memory_space<vmem>>, vector<32x128xbf16>
    %cst = arith.constant dense<0.000000e+00> : vector<256x128xf32>
    %4 = tpu.matmul %2, %3, %cst {dimension_numbers = #tpu.dot_dimension_numbers<[1], [0], [0], [1], [0, 0, 1, 1], [], []>} : vector<256x32xbf16>, vector<32x128xbf16>, vector<256x128xf32> -> vector<256x128xf32>
    %5 = vector.broadcast %1 : vector<1x128xf32> to vector<256x128xf32>
    %6 = arith.addf %4, %5 : vector<256x128xf32>
    %cst_5 = arith.constant 0.000000e+00 : f32
    %7 = vector.broadcast %cst_5 : f32 to vector<256x128xf32>
    %8 = arith.maximumf %6, %7 : vector<256x128xf32>
    %c1 = arith.constant 1 : index
    %c0_6 = arith.constant 0 : index
    %9 = vector.load %arg10[%c1, %c0_6] : memref<8x512xf32, #tpu.memory_space<vmem>>, vector<1x256xf32>
    %10 = arith.truncf %8 : vector<256x128xf32> to vector<256x128xbf16>
    %c0_7 = arith.constant 0 : index
    %c0_8 = arith.constant 0 : index
    %11 = vector.load %arg3[%c0_7, %c0_8] : memref<128x256xbf16, #tpu.memory_space<vmem>>, vector<128x256xbf16>
    %cst_9 = arith.constant dense<0.000000e+00> : vector<256x256xf32>
    %12 = tpu.matmul %10, %11, %cst_9 {dimension_numbers = #tpu.dot_dimension_numbers<[1], [0], [0], [1], [0, 0, 1, 1], [], []>} : vector<256x128xbf16>, vector<128x256xbf16>, vector<256x256xf32> -> vector<256x256xf32>
    %13 = vector.broadcast %9 : vector<1x256xf32> to vector<256x256xf32>
    %14 = arith.addf %12, %13 : vector<256x256xf32>
    %cst_10 = arith.constant 0.000000e+00 : f32
    %15 = vector.broadcast %cst_10 : f32 to vector<256x256xf32>
    %16 = arith.maximumf %14, %15 : vector<256x256xf32>
    %c2 = arith.constant 2 : index
    %c0_11 = arith.constant 0 : index
    %17 = vector.load %arg10[%c2, %c0_11] : memref<8x512xf32, #tpu.memory_space<vmem>>, vector<1x512xf32>
    %18 = arith.truncf %16 : vector<256x256xf32> to vector<256x256xbf16>
    %c0_12 = arith.constant 0 : index
    %c0_13 = arith.constant 0 : index
    %19 = vector.load %arg4[%c0_12, %c0_13] : memref<256x512xbf16, #tpu.memory_space<vmem>>, vector<256x512xbf16>
    %cst_14 = arith.constant dense<0.000000e+00> : vector<256x512xf32>
    %20 = tpu.matmul %18, %19, %cst_14 {dimension_numbers = #tpu.dot_dimension_numbers<[1], [0], [0], [1], [0, 0, 1, 1], [], []>} : vector<256x256xbf16>, vector<256x512xbf16>, vector<256x512xf32> -> vector<256x512xf32>
    %21 = vector.broadcast %17 : vector<1x512xf32> to vector<256x512xf32>
    %22 = arith.addf %20, %21 : vector<256x512xf32>
    %cst_15 = arith.constant 0.000000e+00 : f32
    %23 = vector.broadcast %cst_15 : f32 to vector<256x512xf32>
    %24 = arith.maximumf %22, %23 : vector<256x512xf32>
    %c3 = arith.constant 3 : index
    %c0_16 = arith.constant 0 : index
    %25 = vector.load %arg10[%c3, %c0_16] : memref<8x512xf32, #tpu.memory_space<vmem>>, vector<1x256xf32>
    %26 = arith.truncf %24 : vector<256x512xf32> to vector<256x512xbf16>
    %c0_17 = arith.constant 0 : index
    %c0_18 = arith.constant 0 : index
    %27 = vector.load %arg5[%c0_17, %c0_18] : memref<512x256xbf16, #tpu.memory_space<vmem>>, vector<512x256xbf16>
    %cst_19 = arith.constant dense<0.000000e+00> : vector<256x256xf32>
    %28 = tpu.matmul %26, %27, %cst_19 {dimension_numbers = #tpu.dot_dimension_numbers<[1], [0], [0], [1], [0, 0, 1, 1], [], []>} : vector<256x512xbf16>, vector<512x256xbf16>, vector<256x256xf32> -> vector<256x256xf32>
    %29 = vector.broadcast %25 : vector<1x256xf32> to vector<256x256xf32>
    %30 = arith.addf %28, %29 : vector<256x256xf32>
    %cst_20 = arith.constant 0.000000e+00 : f32
    %31 = vector.broadcast %cst_20 : f32 to vector<256x256xf32>
    %32 = arith.maximumf %30, %31 : vector<256x256xf32>
    %c4 = arith.constant 4 : index
    %c0_21 = arith.constant 0 : index
    %33 = vector.load %arg10[%c4, %c0_21] : memref<8x512xf32, #tpu.memory_space<vmem>>, vector<1x64xf32>
    %34 = arith.truncf %32 : vector<256x256xf32> to vector<256x256xbf16>
    %c0_22 = arith.constant 0 : index
    %c0_23 = arith.constant 0 : index
    %35 = vector.load %arg6[%c0_22, %c0_23] : memref<256x64xbf16, #tpu.memory_space<vmem>>, vector<256x64xbf16>
    %cst_24 = arith.constant dense<0.000000e+00> : vector<256x64xf32>
    %36 = tpu.matmul %34, %35, %cst_24 {dimension_numbers = #tpu.dot_dimension_numbers<[1], [0], [0], [1], [0, 0, 1, 1], [], []>} : vector<256x256xbf16>, vector<256x64xbf16>, vector<256x64xf32> -> vector<256x64xf32>
    %37 = vector.broadcast %33 : vector<1x64xf32> to vector<256x64xf32>
    %38 = arith.addf %36, %37 : vector<256x64xf32>
    %cst_25 = arith.constant 0.000000e+00 : f32
    %39 = vector.broadcast %cst_25 : f32 to vector<256x64xf32>
    %40 = arith.maximumf %38, %39 : vector<256x64xf32>
    %c5 = arith.constant 5 : index
    %c0_26 = arith.constant 0 : index
    %41 = vector.load %arg10[%c5, %c0_26] : memref<8x512xf32, #tpu.memory_space<vmem>>, vector<1x16xf32>
    %42 = arith.truncf %40 : vector<256x64xf32> to vector<256x64xbf16>
    %c0_27 = arith.constant 0 : index
    %c0_28 = arith.constant 0 : index
    %43 = vector.load %arg7[%c0_27, %c0_28] : memref<64x16xbf16, #tpu.memory_space<vmem>>, vector<64x16xbf16>
    %cst_29 = arith.constant dense<0.000000e+00> : vector<256x16xf32>
    %44 = tpu.matmul %42, %43, %cst_29 {dimension_numbers = #tpu.dot_dimension_numbers<[1], [0], [0], [1], [0, 0, 1, 1], [], []>} : vector<256x64xbf16>, vector<64x16xbf16>, vector<256x16xf32> -> vector<256x16xf32>
    %45 = vector.broadcast %41 : vector<1x16xf32> to vector<256x16xf32>
    %46 = arith.addf %44, %45 : vector<256x16xf32>
    %cst_30 = arith.constant 0.000000e+00 : f32
    %47 = vector.broadcast %cst_30 : f32 to vector<256x16xf32>
    %48 = arith.maximumf %46, %47 : vector<256x16xf32>
    %c6 = arith.constant 6 : index
    %c0_31 = arith.constant 0 : index
    %49 = vector.load %arg10[%c6, %c0_31] : memref<8x512xf32, #tpu.memory_space<vmem>>, vector<1x4xf32>
    %50 = arith.truncf %48 : vector<256x16xf32> to vector<256x16xbf16>
    %c0_32 = arith.constant 0 : index
    %c0_33 = arith.constant 0 : index
    %51 = vector.load %arg8[%c0_32, %c0_33] : memref<16x4xbf16, #tpu.memory_space<vmem>>, vector<16x4xbf16>
    %cst_34 = arith.constant dense<0.000000e+00> : vector<256x4xf32>
    %52 = tpu.matmul %50, %51, %cst_34 {dimension_numbers = #tpu.dot_dimension_numbers<[1], [0], [0], [1], [0, 0, 1, 1], [], []>} : vector<256x16xbf16>, vector<16x4xbf16>, vector<256x4xf32> -> vector<256x4xf32>
    %53 = vector.broadcast %49 : vector<1x4xf32> to vector<256x4xf32>
    %54 = arith.addf %52, %53 : vector<256x4xf32>
    %cst_35 = arith.constant 0.000000e+00 : f32
    %55 = vector.broadcast %cst_35 : f32 to vector<256x4xf32>
    %56 = arith.maximumf %54, %55 : vector<256x4xf32>
    %c7 = arith.constant 7 : index
    %c0_36 = arith.constant 0 : index
    %57 = vector.load %arg10[%c7, %c0_36] : memref<8x512xf32, #tpu.memory_space<vmem>>, vector<1x1xf32>
    %c0_37 = arith.constant 0 : index
    %c0_38 = arith.constant 0 : index
    %58 = vector.load %arg9[%c0_37, %c0_38] : memref<1x4xf32, #tpu.memory_space<vmem>>, vector<1x4xf32>
    %59 = vector.broadcast %58 : vector<1x4xf32> to vector<256x4xf32>
    %60 = arith.mulf %56, %59 : vector<256x4xf32>
    %cst_39 = arith.constant dense<0.000000e+00> : vector<256xf32>
    %61 = vector.multi_reduction <add>, %60, %cst_39 [1] : vector<256x4xf32> to vector<256xf32>
    %62 = vector.shape_cast %61 : vector<256xf32> to vector<256x1xf32>
    %63 = vector.broadcast %57 : vector<1x1xf32> to vector<256x1xf32>
    %64 = arith.addf %62, %63 : vector<256x1xf32>
    %65 = arith.negf %64 : vector<256x1xf32>
    %66 = math.exp %65 : vector<256x1xf32>
    %cst_40 = arith.constant 1.000000e+00 : f32
    %67 = vector.broadcast %cst_40 : f32 to vector<256x1xf32>
    %68 = arith.addf %67, %66 : vector<256x1xf32>
    %69 = arith.divf %67, %68 : vector<256x1xf32>
    %c0_41 = arith.constant 0 : index
    %c0_42 = arith.constant 0 : index
    %70 = vector.load %arg11[%c0_41, %c0_42] : memref<256x1xf32, #tpu.memory_space<vmem>>, vector<256x1xf32>
    tpu.vector_store %arg11[%c0_41, %c0_42], %69 {strides = array<i32>} : memref<256x1xf32, #tpu.memory_space<vmem>>, vector<256x1xf32>,
    return
  }
  func.func @transform_0(%arg0: i32) -> (i32, i32) {
    %c0_i32 = arith.constant 0 : i32
    %c0_i32_0 = arith.constant 0 : i32
    return %arg0, %c0_i32 : i32, i32
  }
  func.func @transform_1(%arg0: i32) -> (i32, i32) {
    %c0_i32 = arith.constant 0 : i32
    %c0_i32_0 = arith.constant 0 : i32
    %c0_i32_1 = arith.constant 0 : i32
    return %c0_i32, %c0_i32_0 : i32, i32
  }
  func.func @transform_2(%arg0: i32) -> (i32, i32) {
    %c0_i32 = arith.constant 0 : i32
    %c0_i32_0 = arith.constant 0 : i32
    %c0_i32_1 = arith.constant 0 : i32
    return %c0_i32, %c0_i32_0 : i32, i32
  }
  func.func @transform_3(%arg0: i32) -> (i32, i32) {
    %c0_i32 = arith.constant 0 : i32
    %c0_i32_0 = arith.constant 0 : i32
    %c0_i32_1 = arith.constant 0 : i32
    return %c0_i32, %c0_i32_0 : i32, i32
  }
  func.func @transform_4(%arg0: i32) -> (i32, i32) {
    %c0_i32 = arith.constant 0 : i32
    %c0_i32_0 = arith.constant 0 : i32
    %c0_i32_1 = arith.constant 0 : i32
    return %c0_i32, %c0_i32_0 : i32, i32
  }
  func.func @transform_5(%arg0: i32) -> (i32, i32) {
    %c0_i32 = arith.constant 0 : i32
    %c0_i32_0 = arith.constant 0 : i32
    %c0_i32_1 = arith.constant 0 : i32
    return %c0_i32, %c0_i32_0 : i32, i32
  }
  func.func @transform_6(%arg0: i32) -> (i32, i32) {
    %c0_i32 = arith.constant 0 : i32
    %c0_i32_0 = arith.constant 0 : i32
    %c0_i32_1 = arith.constant 0 : i32
    return %c0_i32, %c0_i32_0 : i32, i32
  }
  func.func @transform_7(%arg0: i32) -> (i32, i32) {
    %c0_i32 = arith.constant 0 : i32
    %c0_i32_0 = arith.constant 0 : i32
    %c0_i32_1 = arith.constant 0 : i32
    return %c0_i32, %c0_i32_0 : i32, i32
  }
  func.func @transform_8(%arg0: i32) -> (i32, i32) {
    %c0_i32 = arith.constant 0 : i32
    %c0_i32_0 = arith.constant 0 : i32
    %c0_i32_1 = arith.constant 0 : i32
    return %c0_i32, %c0_i32_0 : i32, i32
  }
  func.func @transform_9(%arg0: i32) -> (i32, i32) {
    %c0_i32 = arith.constant 0 : i32
    %c0_i32_0 = arith.constant 0 : i32
    %c0_i32_1 = arith.constant 0 : i32
    return %c0_i32, %c0_i32_0 : i32, i32
  }
  func.func @transform_10(%arg0: i32) -> (i32, i32) {
    %c0_i32 = arith.constant 0 : i32
    %c0_i32_0 = arith.constant 0 : i32
    return %arg0, %c0_i32 : i32, i32
  }
}

</mosaic_0001>

<bundles_post_ra>
// kernel: tpu_custom_call.1
= control target key start
LH: loop header
LB: loop body
LE: loop exit
PB: predicated region body
PF: predicated region fallthrough
CT: control target
= control target key end

     0   :  { %15 = vsyncpa [#allocation3], 0  ;;  %s6338_s13 = smov 0   ;;  %s9055_s0 = inlined_call_operand.vmem [shape: f32[768,32], index: 0, kind: input, shape index: {}]   ;;  %s9056_s1 = inlined_call_operand.vmem [shape: bf16[32,128], index: 1, kind: input, shape index: {}]   ;;  %s9057_s2 = inlined_call_operand.vmem [shape: bf16[128,256], index: 2, kind: input, shape index: {}]   ;;  %s9058_s3 = inlined_call_operand.vmem [shape: bf16[256,512], index: 3, kind: input, shape index: {}]   ;;  %s9059_s4 = inlined_call_operand.hbm [shape: bf16[512,256], index: 4, kind: input, shape index: {}]   ;;  %s9060_s5 = inlined_call_operand.vmem [shape: bf16[256,64], index: 5, kind: input, shape index: {}]   ;;  %s9061_s6 = inlined_call_operand.vmem [shape: bf16[64,16], index: 6, kind: input, shape index: {}]   ;;  %s9062_s7 = inlined_call_operand.vmem [shape: bf16[16,4], index: 7, kind: input, shape index: {}]   ;;  %s9063_s8 = inlined_call_operand.vmem [shape: f32[1,4], index: 8, kind: input, shape index: {}]   ;;  %s9064_s9 = inlined_call_operand.vmem [shape: f32[8,512], index: 9, kind: input, shape index: {}]   ;;  %s9065_s10 = inlined_call_operand.vmem [shape: f32[768,1], index: 10, kind: output, shape index: {}]  }
   0x1 LB: > { %s287_s16 = sshll.u32 %s9059_s4, 4  ;;  %s5135_s17 = sadd.s32 4294967295, %s6278_s13   ;;  %s6278_s13 = sphi %s6338_s13, %s21_s13   ;;  %s288_s16 = int_to_ptr.hbm [resolvable:$true] %s287_s16 }
   0x2   : > { %p5137_p0 = scmp.ge.s32.totalorder %s6278_s13, 1  ;;  %p267_p1 = scmp.lt.s32.totalorder %s6278_s13, 4 }
   0x3   : > { %p6092_p2 = scmp.eq.s32.totalorder %s5135_s17, 0  ;;  %s6280_s18 = smov [#allocation2]  }
   0x4   : > { %p268_p3 = pnand %p5137_p0, %p267_p1  ;;  %s289_s19 = sshll.u32 %s6280_s18, 4  ;;  %s290_s19 = int_to_ptr.vmem [resolvable:$true] %s289_s19 }
   0x5   : > { %s6281_s20 = smov 128   ;;  %s6282_s21 = smov 8  }
   0x6   : > { %p6088_p4 = pneg %p268_p3  ;;  %329 = sbr.rel (%p268_p3) target bundleno = 2327 (0x917), region = 60 }
   0x8   : > { %p6089_p5 = pnand %p6092_p2, %p6088_p4 }
   0xa   : > { %6091 = dma.hbm_to_vmem [thread:$0]  (!%p6089_p5), %s288_s16, 8192, %s290_s19, [#allocation3], %s6281_s20, %s6281_s20, %s6282_s21  }
   0xb   : > { %6273 = dma.done.wait (%p6092_p2), [#allocation3], 8192  }
   0xc   : > { %6275 = vsyncadd (%p6092_p2), [#allocation3], 4294959104  ;;  %s5142_s22 = sshll.u32 %s5135_s17, 5  ;;  %v5900_v0 = vld [vmem:[%s9056_s1 + $0x8] sm:$0xff]  ;;  %v5899_v1 = vld [vmem:[%s9056_s1] sm:$0xff]  ;;  %vm446_vm0 = vcmask 261120  }
   0xd   : > { %p369_p6 = scmp.lt.s32.totalorder %s5142_s22, 95  ;;  %501 = vmatpush.bf16.msra.mxu0 %v5900_v0  ;;  %6066 = vmatpush.bf16.msra.mxu3 %v5900_v0  ;;  %v5229_v17 = vld [vmem:[%s9057_s2 + $0x70] sm:$0xf]  ;;  %v5916_v18 = vld [vmem:[%s9057_s2 + $0x74] sm:$0xf0]  ;;  %vm3895_vm1 = vcmask 523264  }
   0xe   : > { %v5915_v19 = vld [vmem:[%s9057_s2 + $0x74] sm:$0xf]  ;;  %v5230_v20 = vor.u32 %v5916_v18, %v5229_v17  ;;  %v5231_v21 = vld [vmem:[%s9057_s2 + $0x78] sm:$0xf0]  ;;  %v5221_v26 = vld [vmem:[%s9057_s2 + $0x60] sm:$0xf] }
   0xf   : > { %s9322_s22 = smov (!%p369_p6, %s5142_s22), 95  ;;  %v6392_v22 = vor.u32 %v5915_v19, %v5231_v21  ;;  %v5914_v27 = vld [vmem:[%s9057_s2 + $0x64] sm:$0xf0]  ;;  %v5913_v28 = vld [vmem:[%s9057_s2 + $0x64] sm:$0xf]  ;;  %vm4090_vm2 = vcmask 130048  }
  0x10   : > { %s5143_s23 = sshll.u32 %s9322_s22, 3  ;;  %735 = vmatpush.bf16.msra.mxu1 %v5230_v20  ;;  %v5222_v29 = vor.u32 %v5914_v27, %v5221_v26  ;;  %v5223_v30 = vld [vmem:[%s9057_s2 + $0x68] sm:$0xf0]  ;;  %v5213_v32 = vld [vmem:[%s9057_s2 + $0x50] sm:$0xf]  ;;  %vm4297_vm3 = vcmask 31744  }
  0x11   : > { %s6357_s26 = scalar_lea.vmem %s9055_s0, %s5143_s23  ;;  %502 = vmatpush.bf16.msra.mxu0 %v5899_v1  ;;  %6067 = vmatpush.bf16.msra.mxu3 %v5899_v1  ;;  %v6410_v31 = vor.u32 %v5913_v28, %v5223_v30  ;;  %v5912_v33 = vld [vmem:[%s9057_s2 + $0x54] sm:$0xf0]  ;;  %v5911_v34 = vld [vmem:[%s9057_s2 + $0x54] sm:$0xf]  ;;  %v5215_v36 = vld [vmem:[%s9057_s2 + $0x58] sm:$0xf0]  ;;  %s8911_s28 = scalar_lea.vmem %s9065_s10, %s5143_s23 }
  0x12   : > { %v381_v2 = vld [vmem:[%s6357_s26] sm:$0xff]  ;;  %v382_v3 = vld [vmem:[%s6357_s26 + $0x8] sm:$0xff]  ;;  %v383_v5 = vld [vmem:[%s6357_s26 + $0x10] sm:$0xff]  ;;  %824 = vmatpush.bf16.msra.mxu2 %v6392_v22  ;;  %v5214_v35 = vor.u32 %v5912_v33, %v5213_v32  ;;  %v6425_v37 = vor.u32 %v5911_v34, %v5215_v36  ;;  %vm5034_vm6 = vcmask 7168  }
  0x13   : > { %v414_v4 = vpack.c.bf16 %v382_v3, %v381_v2  ;;  %v384_v6 = vld [vmem:[%s6357_s26 + $0x18] sm:$0xff]  ;;  %v385_v8 = vld [vmem:[%s6357_s26 + $0x20] sm:$0xff]  ;;  %v386_v9 = vld [vmem:[%s6357_s26 + $0x28] sm:$0xff] }
  0x14   : > { %v415_v7 = vpack.c.bf16 %v384_v6, %v383_v5  ;;  %v416_v10 = vpack.c.bf16 %v386_v9, %v385_v8  ;;  %v387_v11 = vld [vmem:[%s6357_s26 + $0x30] sm:$0xff]  ;;  %v388_v12 = vld [vmem:[%s6357_s26 + $0x38] sm:$0xff]  ;;  %v389_v14 = vld [vmem:[%s6357_s26 + $0x40] sm:$0xff]  ;;  %736 = vmatpush.bf16.msra.mxu1 %v5222_v29 }
  0x15   : > { %5154 = vmatmul.msk.bf16.vlgmr.msra.gmra.mxu0 %vm446_vm0, %v414_v4  ;;  %v417_v13 = vpack.c.bf16 %v388_v12, %v387_v11  ;;  %v390_v15 = vld [vmem:[%s6357_s26 + $0x48] sm:$0xff]  ;;  %6068 = vmatpush.bf16.msrb.mxu3 %v5230_v20  ;;  %v391_v23 = vld [vmem:[%s6357_s26 + $0x50] sm:$0xff]  ;;  %v392_v24 = vld [vmem:[%s6357_s26 + $0x58] sm:$0xff] }
  0x16   : > { %v418_v16 = vpack.c.bf16 %v390_v15, %v389_v14  ;;  %v419_v25 = vpack.c.bf16 %v392_v24, %v391_v23  ;;  %825 = vmatpush.bf16.msra.mxu2 %v6410_v31  ;;  %v5205_v38 = vld [vmem:[%s9057_s2 + $0x40] sm:$0xf]  ;;  %v5910_v39 = vld [vmem:[%s9057_s2 + $0x44] sm:$0xf0]  ;;  %v5909_v40 = vld [vmem:[%s9057_s2 + $0x44] sm:$0xf] }
  0x17   : > { %v5207_v41 = vld [vmem:[%s9057_s2 + $0x48] sm:$0xf0]  ;;  %v5206_v42 = vor.u32 %v5910_v39, %v5205_v38  ;;  %v393_v44 = vld [vmem:[%s6357_s26 + $0x60] sm:$0xff]  ;;  %v5197_v46 = vld [vmem:[%s9057_s2 + $0x30] sm:$0xf] }
  0x18   : > { %737 = vmatpush.bf16.msra.mxu1 %v5214_v35  ;;  %v6440_v43 = vor.u32 %v5909_v40, %v5207_v41  ;;  %v394_v45 = vld [vmem:[%s6357_s26 + $0x68] sm:$0xff]  ;;  %v5908_v47 = vld [vmem:[%s9057_s2 + $0x34] sm:$0xf0]  ;;  %v5907_v48 = vld [vmem:[%s9057_s2 + $0x34] sm:$0xf] }
  0x19   : > { %6069 = vmatpush.bf16.msrb.mxu3 %v5222_v29  ;;  %v5198_v49 = vor.u32 %v5908_v47, %v5197_v46  ;;  %v5199_v50 = vld [vmem:[%s9057_s2 + $0x38] sm:$0xf0]  ;;  %v420_v51 = vpack.c.bf16 %v394_v45, %v393_v44  ;;  %v5189_v53 = vld [vmem:[%s9057_s2 + $0x20] sm:$0xf]  ;;  %v5906_v54 = vld [vmem:[%s9057_s2 + $0x24] sm:$0xf0] }
  0x1a   : > { %826 = vmatpush.bf16.msra.mxu2 %v6425_v37  ;;  %v6457_v52 = vor.u32 %v5907_v48, %v5199_v50  ;;  %v5905_v55 = vld [vmem:[%s9057_s2 + $0x24] sm:$0xf]  ;;  %v5190_v56 = vor.u32 %v5906_v54, %v5189_v53  ;;  %v5191_v57 = vld [vmem:[%s9057_s2 + $0x28] sm:$0xf0]  ;;  %v5181_v59 = vld [vmem:[%s9057_s2 + $0x10] sm:$0xf] }
  0x1b   : > { %v6473_v58 = vor.u32 %v5905_v55, %v5191_v57  ;;  %v5904_v60 = vld [vmem:[%s9057_s2 + $0x14] sm:$0xf0]  ;;  %v5903_v61 = vld [vmem:[%s9057_s2 + $0x14] sm:$0xf]  ;;  %v5183_v63 = vld [vmem:[%s9057_s2 + $0x18] sm:$0xf0] }
  0x1c   : > { %738 = vmatpush.bf16.msra.mxu1 %v5206_v42  ;;  %v5182_v62 = vor.u32 %v5904_v60, %v5181_v59  ;;  %v6488_v0 = vor.u32 %v5903_v61, %v5183_v63  ;;  %v5173_v1 = vld [vmem:[%s9057_s2] sm:$0xf]  ;;  %v5902_v2 = vld [vmem:[%s9057_s2 + $0x4] sm:$0xf0]  ;;  %v5901_v3 = vld [vmem:[%s9057_s2 + $0x4] sm:$0xf] }
  0x1d   : > { %6070 = vmatpush.bf16.msrb.mxu3 %v5214_v35  ;;  %v5174_v4 = vor.u32 %v5902_v2, %v5173_v1  ;;  %v5175_v5 = vld [vmem:[%s9057_s2 + $0x8] sm:$0xf0]  ;;  %v396_v8 = vld [vmem:[%s6357_s26 + $0x78] sm:$0xff]  ;;  %v6515_v14 = vld [vmem:[%s9064_s9] ss:$0 sm:$0xff] }
  0x1e   : > { %827 = vmatpush.bf16.msra.mxu2 %v6440_v43  ;;  %v6503_v6 = vor.u32 %v5901_v3, %v5175_v5  ;;  %v398_v11 = vld [vmem:[%s6357_s26 + $0x88] sm:$0xff]  ;;  %v399_v20 = vld [vmem:[%s6357_s26 + $0x90] sm:$0xff]  ;;  %v400_v21 = vld [vmem:[%s6357_s26 + $0x98] sm:$0xff] }
  0x1f   : > { %v423_v24 = vpack.c.bf16 %v400_v21, %v399_v20  ;;  %v401_v32 = vld [vmem:[%s6357_s26 + $0xa0] sm:$0xff]  ;;  %v402_v33 = vld [vmem:[%s6357_s26 + $0xa8] sm:$0xff]  ;;  %v407_v38 = vld [vmem:[%s6357_s26 + $0xd0] sm:$0xff] }
  0x20   : > { %739 = vmatpush.bf16.msra.mxu1 %v5198_v49  ;;  %v424_v35 = vpack.c.bf16 %v402_v33, %v401_v32  ;;  %v408_v39 = vld [vmem:[%s6357_s26 + $0xd8] sm:$0xff]  ;;  %v403_v47 = vld [vmem:[%s6357_s26 + $0xb0] sm:$0xff]  ;;  %v410_v53 = vld [vmem:[%s6357_s26 + $0xe8] sm:$0xff] }
  0x21   : > { %6071 = vmatpush.bf16.msrb.mxu3 %v5206_v42  ;;  %v427_v40 = vpack.c.bf16 %v408_v39, %v407_v38  ;;  %v404_v48 = vld [vmem:[%s6357_s26 + $0xb8] sm:$0xff]  ;;  %v405_v59 = vld [vmem:[%s6357_s26 + $0xc0] sm:$0xff]  ;;  %v5967_v32 = vld [vmem:[%s9058_s3 + $0x18c] sm:$0xf0] }
  0x22   : > { %828 = vmatpush.bf16.msra.mxu2 %v6457_v52  ;;  %v425_v50 = vpack.c.bf16 %v404_v48, %v403_v47  ;;  %v412_v63 = vld [vmem:[%s6357_s26 + $0xf8] sm:$0xff] }
  0x23   : > { %5167 = vmatmul.msk.bf16.vlgmr.msra.gmra.mxu3 %vm446_vm0, %v427_v40  ;;  %v5398_v40 = vld [vmem:[%s9058_s3 + $0x140] sm:$0xf] }
  0x24   : > { %740 = vmatpush.bf16.msra.mxu1 %v5190_v56 }
  0x25   : > { %5155 = vmatmul.msk.bf16.gmra.mxu0 %vm446_vm0, %v415_v7  ;;  %6072 = vmatpush.bf16.msrb.mxu3 %v5198_v49  ;;  %v395_v7 = vld [vmem:[%s6357_s26 + $0x70] sm:$0xff] }
  0x26   : > { %829 = vmatpush.bf16.msra.mxu2 %v6473_v58  ;;  %v421_v9 = vpack.c.bf16 %v396_v8, %v395_v7 }
  0x28   : > { %741 = vmatpush.bf16.msra.mxu1 %v5182_v62 }
  0x29   : > { %6073 = vmatpush.bf16.msrb.mxu3 %v5190_v56 }
  0x2a   : > { %830 = vmatpush.bf16.msra.mxu2 %v6488_v0 }
  0x2c   : > { %742 = vmatpush.bf16.msra.mxu1 %v5174_v4 }
  0x2d   : > { %6074 = vmatpush.bf16.msrb.mxu3 %v5182_v62 }
  0x2e   : > { %831 = vmatpush.bf16.msra.mxu2 %v6503_v6 }
  0x31   : > { %6075 = vmatpush.bf16.msrb.mxu3 %v5174_v4 }
  0x35   : > { %5156 = vmatmul.msk.bf16.gmra.mxu0 %vm446_vm0, %v416_v10  ;;  %v397_v10 = vld [vmem:[%s6357_s26 + $0x80] sm:$0xff]  ;;  %6076 = vmatpush.bf16.msra.mxu3 %v6392_v22 }
  0x36   : > { %v422_v12 = vpack.c.bf16 %v398_v11, %v397_v10 }
  0x39   : > { %6077 = vmatpush.bf16.msra.mxu3 %v6410_v31 }
  0x3d   : > { %6078 = vmatpush.bf16.msra.mxu3 %v6425_v37 }
  0x41   : > { %6079 = vmatpush.bf16.msra.mxu3 %v6440_v43  ;;  %v406_v43 = vld [vmem:[%s6357_s26 + $0xc8] sm:$0xff] }
  0x42   : > { %v426_v61 = vpack.c.bf16 %v406_v43, %v405_v59 }
  0x45   : > { %5157 = vmatmul.msk.bf16.gmra.mxu0 %vm446_vm0, %v417_v13  ;;  %6080 = vmatpush.bf16.msra.mxu3 %v6457_v52  ;;  %v411_v52 = vld [vmem:[%s6357_s26 + $0xf0] sm:$0xff] }
  0x46   : > { %v429_v1 = vpack.c.bf16 %v412_v63, %v411_v52  ;;  %v5352_v52 = vld [vmem:[%s9058_s3 + $0xf0] sm:$0xf0]  ;;  %v5977_v63 = vld [vmem:[%s9058_s3 + $0x1e4] sm:$0xf] }
  0x49   : > { %6081 = vmatpush.bf16.msra.mxu3 %v6473_v58 }
  0x4d   : > { %6082 = vmatpush.bf16.msra.mxu3 %v6488_v0 }
  0x51   : > { %6083 = vmatpush.bf16.msra.mxu3 %v6503_v6 }
  0x55   : > { %5158 = vmatmul.msk.bf16.gmra.mxu0 %vm446_vm0, %v418_v16 }
  0x65   : > { %5159 = vmatmul.msk.bf16.gmra.mxu0 %vm446_vm0, %v419_v25 }
  0x75   : > { %5160 = vmatmul.msk.bf16.gmra.mxu0 %vm446_vm0, %v420_v51  ;;  %v409_v51 = vld [vmem:[%s6357_s26 + $0xe0] sm:$0xff] }
  0x76   : > { %v428_v31 = vpack.c.bf16 %v410_v53, %v409_v51  ;;  %v5366_v51 = vld [vmem:[%s9058_s3 + $0x100] sm:$0xf]  ;;  %v5951_v53 = vld [vmem:[%s9058_s3 + $0x10c] sm:$0xf0] }
  0x78   : > { %5168 = vmatmul.msk.bf16.gmra.mxu3 %vm446_vm0, %v428_v31  ;;  %v5367_v31 = vor.u32 %v5951_v53, %v5366_v51  ;;  %v5957_v51 = vld [vmem:[%s9058_s3 + $0x144] sm:$0xf] }
  0x85   : > { %5161 = vmatmul.msk.bf16.gmra.mxu0 %vm446_vm0, %v421_v9 }
  0x88   : > { %5169 = vmatmul.msk.bf16.gmra.mxu3 %vm446_vm0, %v429_v1 }
  0x92   : > { %v504_v13 = vpop.f32.mrf.mxu0 }
  0x93   : > { %v505_v15 = vadd.f32 %v504_v13, %v6515_v14  ;;  %v5478_v13 = vld [vmem:[%s9058_s3 + $0x1e0] sm:$0xf] }
  0x95   : > { %5162 = vmatmul.msk.bf16.gmra.mxu0 %vm446_vm0, %v422_v12  ;;  %v584_v18 = vmax.f32 %v505_v15, 0.0  ;;  %v5979_v15 = vld [vmem:[%s9058_s3 + $0x1ec] sm:$0xf0] }
  0x9a   : > { %v506_v16 = vpop.f32.mrf.mxu0 }
  0x9b   : > { %v507_v17 = vadd.f32 %v506_v16, %v6515_v14 }
  0x9d   : > { %v585_v19 = vmax.f32 %v507_v17, 0.0  ;;  %v5479_v17 = vor.u32 %v5979_v15, %v5478_v13  ;;  %v5937_v13 = vld [vmem:[%s9058_s3 + $0xa4] sm:$0xf]  ;;  %v5320_v15 = vld [vmem:[%s9058_s3 + $0xb0] sm:$0xf0] }
  0x9f   : > { %v618_v23 = vpack.c.bf16 %v585_v19, %v584_v18  ;;  %1493 = vmatpush.bf16.msrb.mxu0 %v5479_v17  ;;  %v5462_v18 = vld [vmem:[%s9058_s3 + $0x1c0] sm:$0xf]  ;;  %v5975_v19 = vld [vmem:[%s9058_s3 + $0x1cc] sm:$0xf0]  ;;  %v5969_v17 = vld [vmem:[%s9058_s3 + $0x1a4] sm:$0xf] }
  0xa0   : > { %v5463_v20 = vor.u32 %v5975_v19, %v5462_v18  ;;  %v5448_v18 = vld [vmem:[%s9058_s3 + $0x1b0] sm:$0xf0] }
  0xa1   : > { %743 = vmatmul.bf16.vlgmr.msra.gmra.mxu1 %v618_v23  ;;  %832 = vmatmul.bf16.vlgmr.msra.gmra.mxu2 %v618_v23  ;;  %v5446_v23 = vld [vmem:[%s9058_s3 + $0x1a0] sm:$0xf] }
  0xa2   : > { %v509_v25 = vpop.f32.mrf.mxu0 }
  0xa3   : > { %v510_v26 = vadd.f32 %v509_v25, %v6515_v14  ;;  %1494 = vmatpush.bf16.msrb.mxu0 %v5463_v20  ;;  %v5451_v20 = vor.u32 %v5969_v17, %v5448_v18 }
  0xa5   : > { %5163 = vmatmul.msk.bf16.gmra.mxu0 %vm446_vm0, %v423_v24  ;;  %v586_v29 = vmax.f32 %v510_v26, 0.0  ;;  %v5971_v24 = vld [vmem:[%s9058_s3 + $0x1ac] sm:$0xf0] }
  0xa6   : > { %v5447_v26 = vor.u32 %v5971_v24, %v5446_v23 }
  0xa8   : > { %1495 = vmatpush.bf16.msrb.mxu0 %v5447_v26  ;;  %v5304_v26 = vld [vmem:[%s9058_s3 + $0x90] sm:$0xf0] }
  0xaa   : > { %v511_v27 = vpop.f32.mrf.mxu0 }
  0xab   : > { %v512_v28 = vadd.f32 %v511_v27, %v6515_v14 }
  0xad   : > { %v587_v30 = vmax.f32 %v512_v28, 0.0 }
  0xaf   : > { %v619_v34 = vpack.c.bf16 %v587_v30, %v586_v29  ;;  %v5430_v30 = vld [vmem:[%s9058_s3 + $0x180] sm:$0xf] }
  0xb0   : > { %v5431_v33 = vor.u32 %v5967_v32, %v5430_v30  ;;  %v5432_v30 = vld [vmem:[%s9058_s3 + $0x190] sm:$0xf0] }
  0xb1   : > { %748 = vmatmul.bf16.gmra.mxu1 %v619_v34  ;;  %837 = vmatmul.bf16.gmra.mxu2 %v619_v34 }
  0xb2   : > { %v514_v36 = vpop.f32.mrf.mxu0  ;;  %1496 = vmatpush.bf16.msrb.mxu0 %v5431_v33 }
  0xb3   : > { %v515_v41 = vadd.f32 %v514_v36, %v6515_v14  ;;  %v5963_v36 = vld [vmem:[%s9058_s3 + $0x16c] sm:$0xf0] }
  0xb5   : > { %5164 = vmatmul.msk.bf16.gmra.mxu0 %vm446_vm0, %v424_v35  ;;  %v588_v45 = vmax.f32 %v515_v41, 0.0  ;;  %v5414_v35 = vld [vmem:[%s9058_s3 + $0x160] sm:$0xf]  ;;  %v5959_v41 = vld [vmem:[%s9058_s3 + $0x14c] sm:$0xf0] }
  0xb6   : > { %v5415_v39 = vor.u32 %v5963_v36, %v5414_v35 }
  0xb8   : > { %1497 = vmatpush.bf16.msrb.mxu0 %v5415_v39 }
  0xba   : > { %v516_v42 = vpop.f32.mrf.mxu0 }
  0xbb   : > { %v517_v44 = vadd.f32 %v516_v42, %v6515_v14  ;;  %v5399_v42 = vor.u32 %v5959_v41, %v5398_v40  ;;  %v5929_v41 = vld [vmem:[%s9058_s3 + $0x64] sm:$0xf] }
  0xbd   : > { %v589_v46 = vmax.f32 %v517_v44, 0.0  ;;  %1498 = vmatpush.bf16.msrb.mxu0 %v5399_v42  ;;  %v5288_v42 = vld [vmem:[%s9058_s3 + $0x70] sm:$0xf0] }
  0xbf   : > { %v620_v49 = vpack.c.bf16 %v589_v46, %v588_v45  ;;  %v5382_v45 = vld [vmem:[%s9058_s3 + $0x120] sm:$0xf]  ;;  %v5955_v46 = vld [vmem:[%s9058_s3 + $0x12c] sm:$0xf0] }
  0xc0   : > { %v5383_v48 = vor.u32 %v5955_v46, %v5382_v45  ;;  %v5961_v45 = vld [vmem:[%s9058_s3 + $0x164] sm:$0xf]  ;;  %v5416_v46 = vld [vmem:[%s9058_s3 + $0x170] sm:$0xf0] }
  0xc1   : > { %753 = vmatmul.bf16.gmra.mxu1 %v620_v49  ;;  %842 = vmatmul.bf16.gmra.mxu2 %v620_v49 }
  0xc2   : > { %v519_v22 = vpop.f32.mrf.mxu0  ;;  %1499 = vmatpush.bf16.msrb.mxu0 %v5383_v48  ;;  %v5419_v48 = vor.u32 %v5961_v45, %v5416_v46 }
  0xc3   : > { %v520_v37 = vadd.f32 %v519_v22, %v6515_v14 }
  0xc5   : > { %5165 = vmatmul.msk.bf16.gmra.mxu0 %vm446_vm0, %v425_v50  ;;  %v590_v56 = vmax.f32 %v520_v37, 0.0 }
  0xc6   : > { %1500 = vmatpush.bf16.msrb.mxu0 %v5367_v31 }
  0xca   : > { %v521_v54 = vpop.f32.mrf.mxu0 }
  0xcb   : > { %v522_v55 = vadd.f32 %v521_v54, %v6515_v14 }
  0xcd   : > { %v591_v57 = vmax.f32 %v522_v55, 0.0 }
  0xcf   : > { %v621_v60 = vpack.c.bf16 %v591_v57, %v590_v56 }
  0xd1   : > { %758 = vmatmul.bf16.gmra.mxu1 %v621_v60  ;;  %847 = vmatmul.bf16.gmra.mxu2 %v621_v60 }
  0xd2   : > { %v524_v62 = vpop.f32.mrf.mxu0 }
  0xd3   : > { %v525_v58 = vadd.f32 %v524_v62, %v6515_v14  ;;  %v5945_v62 = vld [vmem:[%s9058_s3 + $0xe4] sm:$0xf] }
  0xd4   : > { %v5355_v1 = vor.u32 %v5945_v62, %v5352_v52 }
  0xd5   : > { %5166 = vmatmul.msk.bf16.gmra.mxu0 %vm446_vm0, %v426_v61  ;;  %v592_v4 = vmax.f32 %v525_v58, 0.0  ;;  %v5480_v58 = vld [vmem:[%s9058_s3 + $0x1f0] sm:$0xf0] }
  0xd6   : > { %1582 = vmatpush.bf16.msrb.mxu1 %v5355_v1 }
  0xda   : > { %v526_v2 = vpop.f32.mrf.mxu0 }
  0xdb   : > { %v527_v3 = vadd.f32 %v526_v2, %v6515_v14  ;;  %v5483_v2 = vor.u32 %v5977_v63, %v5480_v58 }
  0xdd   : > { %v593_v0 = vmax.f32 %v527_v3, 0.0  ;;  %1671 = vmatpush.bf16.msrb.mxu2 %v5483_v2  ;;  %v5917_v2 = vld [vmem:[%s9058_s3 + $0x4] sm:$0xf] }
  0xdf   : > { %v622_v5 = vpack.c.bf16 %v593_v0, %v592_v4  ;;  %v5941_v4 = vld [vmem:[%s9058_s3 + $0xc4] sm:$0xf]  ;;  %v5336_v0 = vld [vmem:[%s9058_s3 + $0xd0] sm:$0xf0] }
  0xe1   : > { %763 = vmatmul.bf16.gmra.mxu1 %v622_v5  ;;  %852 = vmatmul.bf16.gmra.mxu2 %v622_v5  ;;  %v5973_v5 = vld [vmem:[%s9058_s3 + $0x1c4] sm:$0xf] }
  0xe2   : > { %v529_v7 = vpop.f32.mrf.mxu0 }
  0xe3   : > { %v530_v8 = vadd.f32 %v529_v7, %v6515_v14 }
  0xe5   : > { %v594_v10 = vmax.f32 %v530_v8, 0.0  ;;  %v5339_v8 = vor.u32 %v5941_v4, %v5336_v0  ;;  %v5949_v4 = vld [vmem:[%s9058_s3 + $0x104] sm:$0xf] }
  0xe7   : > { %1583 = vmatpush.bf16.msrb.mxu1 %v5339_v8 }
  0xea   : > { %v531_v9 = vpop.f32.mrf.mxu0 }
  0xeb   : > { %v532_v6 = vadd.f32 %v531_v9, %v6515_v14  ;;  %v5464_v9 = vld [vmem:[%s9058_s3 + $0x1d0] sm:$0xf0] }
  0xed   : > { %v595_v11 = vmax.f32 %v532_v6, 0.0  ;;  %v5467_v6 = vor.u32 %v5973_v5, %v5464_v9 }
  0xef   : > { %v623_v12 = vpack.c.bf16 %v595_v11, %v594_v10  ;;  %v6641_v10 = vld [vmem:[%s9064_s9 + $0x1] ss:$8 sm:$0x3]  ;;  %1672 = vmatpush.bf16.msrb.mxu2 %v5467_v6 }
  0xf1   : > { %768 = vmatmul.bf16.gmra.mxu1 %v623_v12  ;;  %857 = vmatmul.bf16.gmra.mxu2 %v623_v12  ;;  %v6646_v12 = vperm.slane %v6641_v10, 1 }
  0xf2   : > { %v534_v16 = vpop.f32.mrf.mxu0 }
  0xf3   : > { %v535_v21 = vadd.f32 %v534_v16, %v6515_v14  ;;  %v5323_v16 = vor.u32 %v5937_v13, %v5320_v15  ;;  %1673 = vmatpush.bf16.msrb.mxu2 %v5451_v20 }
  0xf5   : > { %v596_v28 = vmax.f32 %v535_v21, 0.0  ;;  %1584 = vmatpush.bf16.msrb.mxu1 %v5323_v16 }
  0xfa   : > { %v536_v25 = vpop.f32.mrf.mxu0 }
  0xfb   : > { %v537_v27 = vadd.f32 %v536_v25, %v6515_v14  ;;  %v5933_v25 = vld [vmem:[%s9058_s3 + $0x84] sm:$0xf] }
  0xfd   : > { %v597_v29 = vmax.f32 %v537_v27, 0.0  ;;  %v5965_v27 = vld [vmem:[%s9058_s3 + $0x184] sm:$0xf] }
  0xfe   : > { %v5435_v35 = vor.u32 %v5965_v27, %v5432_v30 }
  0xff   : > { %v624_v34 = vpack.c.bf16 %v597_v29, %v596_v28  ;;  %v5307_v29 = vor.u32 %v5933_v25, %v5304_v26 }
 0x100   : > { %1674 = vmatpush.bf16.msrb.mxu2 %v5435_v35 }
 0x101   : > { %773 = vmatmul.bf16.gmra.mxu1 %v624_v34  ;;  %862 = vmatmul.bf16.gmra.mxu2 %v624_v34 }
 0x102   : > { %v539_v38 = vpop.f32.mrf.mxu0  ;;  %1585 = vmatpush.bf16.msrb.mxu1 %v5307_v29 }
 0x103   : > { %v540_v44 = vadd.f32 %v539_v38, %v6515_v14 }
 0x104   : > { %1675 = vmatpush.bf16.msrb.mxu2 %v5419_v48 }
 0x105   : > { %v598_v50 = vmax.f32 %v540_v44, 0.0  ;;  %v5291_v44 = vor.u32 %v5929_v41, %v5288_v42  ;;  %v569_v41 = vpop.f32.mrf.mxu3 }
 0x107   : > { %1586 = vmatpush.bf16.msrb.mxu1 %v5291_v44  ;;  %v6752_v44 = vperm.slane %v6641_v10, 0 }
 0x10a   : > { %v541_v47 = vpop.f32.mrf.mxu0 }
 0x10b   : > { %v542_v49 = vadd.f32 %v541_v47, %v6515_v14 }
 0x10d   : > { %v599_v22 = vmax.f32 %v542_v49, 0.0 }
 0x10f   : > { %v625_v37 = vpack.c.bf16 %v599_v22, %v598_v50  ;;  %v5925_v50 = vld [vmem:[%s9058_s3 + $0x44] sm:$0xf]  ;;  %v5272_v22 = vld [vmem:[%s9058_s3 + $0x50] sm:$0xf0] }
 0x110   : > { %v5275_v31 = vor.u32 %v5925_v50, %v5272_v22 }
 0x111   : > { %778 = vmatmul.bf16.gmra.mxu1 %v625_v37  ;;  %867 = vmatmul.bf16.gmra.mxu2 %v625_v37  ;;  %v5400_v37 = vld [vmem:[%s9058_s3 + $0x150] sm:$0xf0] }
 0x112   : > { %v544_v54 = vpop.f32.mrf.mxu0  ;;  %1587 = vmatpush.bf16.msrb.mxu1 %v5275_v31 }
 0x113   : > { %v545_v55 = vadd.f32 %v544_v54, %v6515_v14  ;;  %v5403_v54 = vor.u32 %v5957_v51, %v5400_v37  ;;  %v571_v37 = vpop.f32.mrf.mxu3 }
 0x115   : > { %v600_v59 = vmax.f32 %v545_v55, 0.0  ;;  %1676 = vmatpush.bf16.msrb.mxu2 %v5403_v54 }
 0x11a   : > { %v546_v56 = vpop.f32.mrf.mxu0 }
 0x11b   : > { %v547_v57 = vadd.f32 %v546_v56, %v6515_v14  ;;  %v5921_v56 = vld [vmem:[%s9058_s3 + $0x24] sm:$0xf] }
 0x11d   : > { %v601_v43 = vmax.f32 %v547_v57, 0.0  ;;  %v5256_v57 = vld [vmem:[%s9058_s3 + $0x30] sm:$0xf0] }
 0x11e   : > { %v6612_v60 = vpop.f32.mrf.mxu1 }
 0x11f   : > { %v626_v61 = vpack.c.bf16 %v601_v43, %v600_v59  ;;  %v5259_v59 = vor.u32 %v5921_v56, %v5256_v57  ;;  %v5953_v43 = vld [vmem:[%s9058_s3 + $0x124] sm:$0xf]  ;;  %v745_v48 = vadd.f32 %v6612_v60, %v6752_v44 }
 0x121   : > { %783 = vmatmul.bf16.gmra.mxu1 %v626_v61  ;;  %872 = vmatmul.bf16.gmra.mxu2 %v626_v61  ;;  %v5384_v61 = vld [vmem:[%s9058_s3 + $0x130] sm:$0xf0]  ;;  %v913_v10 = vmax.f32 %v745_v48, 0.0 }
 0x122   : > { %v549_v3 = vpop.f32.mrf.mxu0  ;;  %v5387_v52 = vor.u32 %v5953_v43, %v5384_v61  ;;  %1588 = vmatpush.bf16.msrb.mxu1 %v5259_v59 }
 0x123   : > { %v550_v19 = vadd.f32 %v549_v3, %v6515_v14  ;;  %v5240_v3 = vld [vmem:[%s9058_s3 + $0x10] sm:$0xf0] }
 0x124   : > { %v833_v7 = vpop.f32.mrf.mxu2  ;;  %1677 = vmatpush.bf16.msrb.mxu2 %v5387_v52  ;;  %v5243_v5 = vor.u32 %v5917_v2, %v5240_v3  ;;  %v570_v2 = vadd.f32 %v569_v41, %v6515_v14  ;;  %v572_v3 = vadd.f32 %v571_v37, %v6515_v14 }
 0x125   : > { %v834_v23 = vadd.f32 %v833_v7, %v6646_v12  ;;  %v602_v32 = vmax.f32 %v550_v19, 0.0  ;;  %v5368_v7 = vld [vmem:[%s9058_s3 + $0x110] sm:$0xf0] }
 0x126   : > { %v6643_v11 = vpop.f32.mrf.mxu1  ;;  %v5371_v13 = vor.u32 %v5949_v4, %v5368_v7  ;;  %1589 = vmatpush.bf16.msrb.mxu1 %v5243_v5  ;;  %v610_v5 = vmax.f32 %v570_v2, 0.0  ;;  %v611_v7 = vmax.f32 %v572_v3, 0.0  ;;  %v5334_v2 = vld [vmem:[%s9058_s3 + $0xc0] sm:$0xf] }
 0x127   : > { %v914_v38 = vmax.f32 %v834_v23, 0.0  ;;  %v747_v46 = vadd.f32 %v6643_v11, %v6752_v44 }
 0x128   : > { %1678 = vmatpush.bf16.msrb.mxu2 %v5371_v13 }
 0x129   : > { %v915_v22 = vmax.f32 %v747_v46, 0.0 }
 0x12a   : > { %v551_v21 = vpop.f32.mrf.mxu0 }
 0x12b   : > { %v552_v24 = vadd.f32 %v551_v21, %v6515_v14  ;;  %v6766_v11 = vpack.c.bf16 %v915_v22, %v913_v10 }
 0x12c   : > { %v835_v28 = vpop.f32.mrf.mxu2 }
 0x12d   : > { %v603_v33 = vmax.f32 %v552_v24, 0.0  ;;  %v836_v34 = vadd.f32 %v835_v28, %v6646_v12 }
 0x12e   : > { %v6676_v36 = vpop.f32.mrf.mxu1 }
 0x12f   : > { %v916_v39 = vmax.f32 %v836_v34, 0.0  ;;  %v627_v40 = vpack.c.bf16 %v603_v33, %v602_v32  ;;  %v750_v4 = vadd.f32 %v6676_v36, %v6752_v44 }
 0x131   : > { %v6690_v47 = vpack.c.bf16 %v916_v39, %v914_v38  ;;  %788 = vmatmul.bf16.gmra.mxu1 %v627_v40  ;;  %877 = vmatmul.bf16.gmra.mxu2 %v627_v40 }
 0x132   : > { %v554_v49 = vpop.f32.mrf.mxu0 }
 0x133   : > { %1501 = vmatmul.bf16.vlgmr.msrb.gmra.mxu0 %v6690_v47  ;;  %v555_v62 = vadd.f32 %v554_v49, %v6515_v14 }
 0x134   : > { %v838_v53 = vpop.f32.mrf.mxu2 }
 0x135   : > { %v839_v1 = vadd.f32 %v838_v53, %v6646_v12  ;;  %v604_v8 = vmax.f32 %v555_v62, 0.0 }
 0x136   : > { %v6705_v55 = vpop.f32.mrf.mxu1 }
 0x137   : > { %v918_v16 = vmax.f32 %v839_v1, 0.0  ;;  %v574_v1 = vpop.f32.mrf.mxu3 }
 0x13a   : > { %v556_v63 = vpop.f32.mrf.mxu0 }
 0x13b   : > { %v557_v58 = vadd.f32 %v556_v63, %v6515_v14 }
 0x13c   : > { %v840_v0 = vpop.f32.mrf.mxu2 }
 0x13d   : > { %v605_v9 = vmax.f32 %v557_v58, 0.0  ;;  %v841_v6 = vadd.f32 %v840_v0, %v6646_v12  ;;  %v752_v58 = vadd.f32 %v6705_v55, %v6752_v44 }
 0x13e   : > { %v6735_v15 = vpop.f32.mrf.mxu1 }
 0x13f   : > { %v920_v17 = vmax.f32 %v841_v6, 0.0  ;;  %v628_v18 = vpack.c.bf16 %v605_v9, %v604_v8  ;;  %v919_v0 = vmax.f32 %v752_v58, 0.0  ;;  %v917_v6 = vmax.f32 %v750_v4, 0.0 }
 0x141   : > { %v6737_v19 = vpack.c.bf16 %v920_v17, %v918_v16  ;;  %793 = vmatmul.bf16.gmra.mxu1 %v628_v18  ;;  %882 = vmatmul.bf16.gmra.mxu2 %v628_v18  ;;  %v6788_v17 = vpack.c.bf16 %v919_v0, %v917_v6 }
 0x142   : > { %v559_v20 = vpop.f32.mrf.mxu0 }
 0x143   : > { %1506 = vmatmul.bf16.gmra.mxu0 %v6737_v19  ;;  %v560_v24 = vadd.f32 %v559_v20, %v6515_v14  ;;  %v6790_v20 = vpack.c.bf16 %v611_v7, %v610_v5 }
 0x144   : > { %v843_v21 = vpop.f32.mrf.mxu2 }
 0x145   : > { %v844_v26 = vadd.f32 %v843_v21, %v6646_v12  ;;  %v606_v29 = vmax.f32 %v560_v24, 0.0  ;;  %v576_v21 = vpop.f32.mrf.mxu3 }
 0x146   : > { %v6740_v23 = vpop.f32.mrf.mxu1 }
 0x147   : > { %v922_v34 = vmax.f32 %v844_v26, 0.0  ;;  %v757_v26 = vadd.f32 %v6740_v23, %v6752_v44 }
 0x14a   : > { %v561_v25 = vpop.f32.mrf.mxu0 }
 0x14b   : > { %v562_v27 = vadd.f32 %v561_v25, %v6515_v14 }
 0x14c   : > { %v845_v28 = vpop.f32.mrf.mxu2 }
 0x14d   : > { %v607_v30 = vmax.f32 %v562_v27, 0.0  ;;  %v846_v32 = vadd.f32 %v845_v28, %v6646_v12  ;;  %v575_v27 = vadd.f32 %v574_v1, %v6515_v14  ;;  %v577_v28 = vadd.f32 %v576_v21, %v6515_v14 }
 0x14e   : > { %v6746_v33 = vpop.f32.mrf.mxu1 }
 0x14f   : > { %v924_v35 = vmax.f32 %v846_v32, 0.0  ;;  %v629_v38 = vpack.c.bf16 %v607_v30, %v606_v29  ;;  %v755_v29 = vadd.f32 %v6735_v15, %v6752_v44  ;;  %v579_v30 = vpop.f32.mrf.mxu3  ;;  %v923_v32 = vmax.f32 %v757_v26, 0.0  ;;  %v5350_v15 = vld [vmem:[%s9058_s3 + $0xe0] sm:$0xf] }
 0x151   : > { %v6748_v39 = vpack.c.bf16 %v924_v35, %v922_v34  ;;  %798 = vmatmul.bf16.gmra.mxu1 %v629_v38  ;;  %887 = vmatmul.bf16.gmra.mxu2 %v629_v38  ;;  %v612_v34 = vmax.f32 %v575_v27, 0.0  ;;  %v613_v35 = vmax.f32 %v577_v28, 0.0  ;;  %v921_v41 = vmax.f32 %v755_v29, 0.0 }
 0x152   : > { %v564_v40 = vpop.f32.mrf.mxu0 }
 0x153   : > { %1511 = vmatmul.bf16.gmra.mxu0 %v6748_v39  ;;  %v565_v49 = vadd.f32 %v564_v40, %v6515_v14  ;;  %v6810_v23 = vpack.c.bf16 %v923_v32, %v921_v41  ;;  %v5935_v32 = vld [vmem:[%s9058_s3 + $0x8c] sm:$0xf0] }
 0x154   : > { %v848_v42 = vpop.f32.mrf.mxu2 }
 0x155   : > { %v849_v51 = vadd.f32 %v848_v42, %v6646_v12  ;;  %v608_v54 = vmax.f32 %v565_v49, 0.0 }
 0x156   : > { %v6754_v45 = vpop.f32.mrf.mxu1 }
 0x157   : > { %v926_v60 = vmax.f32 %v849_v51, 0.0  ;;  %v5947_v51 = vld [vmem:[%s9058_s3 + $0xec] sm:$0xf0]  ;;  %v762_v10 = vadd.f32 %v6754_v45, %v6752_v44 }
 0x158   : > { %v5943_v45 = vld [vmem:[%s9058_s3 + $0xcc] sm:$0xf0] }
 0x159   : > { %v5335_v4 = vor.u32 %v5943_v45, %v5334_v2 }
 0x15a   : > { %v566_v50 = vpop.f32.mrf.mxu0 }
 0x15b   : > { %v567_v53 = vadd.f32 %v566_v50, %v6515_v14  ;;  %v6812_v50 = vpack.c.bf16 %v613_v35, %v612_v34 }
 0x15c   : > { %v850_v31 = vpop.f32.mrf.mxu2 }
 0x15d   : > { %v609_v56 = vmax.f32 %v567_v53, 0.0  ;;  %v851_v57 = vadd.f32 %v850_v31, %v6646_v12  ;;  %v5351_v53 = vor.u32 %v5947_v51, %v5350_v15  ;;  %v581_v31 = vpop.f32.mrf.mxu3  ;;  %v5931_v15 = vld [vmem:[%s9058_s3 + $0x6c] sm:$0xf0] }
 0x15e   : > { %v6764_v59 = vpop.f32.mrf.mxu1 }
 0x15f   : > { %v928_v43 = vmax.f32 %v851_v57, 0.0  ;;  %v6768_v61 = vpack.c.bf16 %v609_v56, %v608_v54  ;;  %v580_v56 = vadd.f32 %v579_v30, %v6515_v14  ;;  %v582_v57 = vadd.f32 %v581_v31, %v6515_v14  ;;  %v5302_v30 = vld [vmem:[%s9058_s3 + $0x80] sm:$0xf] }
 0x160   : > { %v765_v27 = vadd.f32 %v6764_v59, %v6752_v44  ;;  %v5303_v35 = vor.u32 %v5935_v32, %v5302_v30 }
 0x161   : > { %v6770_v62 = vpack.c.bf16 %v928_v43, %v926_v60  ;;  %803 = vmatmul.bf16.vlgmr.msrb.gmra.mxu3 %v6768_v61  ;;  %1590 = vmatmul.bf16.vlgmr.msrb.gmra.mxu1 %v6766_v11  ;;  %v760_v60 = vadd.f32 %v6746_v33, %v6752_v44  ;;  %v927_v43 = vmax.f32 %v762_v10, 0.0  ;;  %v615_v1 = vmax.f32 %v582_v57, 0.0  ;;  %v5270_v57 = vld [vmem:[%s9058_s3 + $0x40] sm:$0xf] }
 0x162   : > { %1679 = vmatmul.bf16.vlgmr.msrb.gmra.mxu2 %v6690_v47  ;;  %1404 = vmatpush.bf16.msrb.mxu3 %v5351_v53 }
 0x163   : > { %1516 = vmatmul.bf16.gmra.mxu0 %v6770_v62  ;;  %v925_v0 = vmax.f32 %v760_v60, 0.0  ;;  %v5927_v60 = vld [vmem:[%s9058_s3 + $0x4c] sm:$0xf0] }
 0x164   : > { %v853_v52 = vpop.f32.mrf.mxu2 }
 0x165   : > { %v854_v8 = vadd.f32 %v853_v52, %v6646_v12  ;;  %v614_v52 = vmax.f32 %v580_v56, 0.0  ;;  %v6844_v33 = vpack.c.bf16 %v927_v43, %v925_v0  ;;  %v5923_v0 = vld [vmem:[%s9058_s3 + $0x2c] sm:$0xf0] }
 0x166   : > { %v6776_v63 = vpop.f32.mrf.mxu1  ;;  %1405 = vmatpush.bf16.msrb.mxu3 %v5335_v4  ;;  %v5254_v4 = vld [vmem:[%s9058_s3 + $0x20] sm:$0xf] }
 0x167   : > { %v930_v55 = vmax.f32 %v854_v8, 0.0  ;;  %v767_v26 = vadd.f32 %v6776_v63, %v6752_v44 }
 0x169   : > { %v931_v28 = vmax.f32 %v767_v26, 0.0  ;;  %v5919_v26 = vld [vmem:[%s9058_s3 + $0xc] sm:$0xf0] }
 0x16c   : > { %v855_v9 = vpop.f32.mrf.mxu2 }
 0x16d   : > { %v856_v13 = vadd.f32 %v855_v9, %v6646_v12  ;;  %v6846_v9 = vpack.c.bf16 %v615_v1, %v614_v52  ;;  %v5271_v52 = vor.u32 %v5927_v60, %v5270_v57 }
 0x16e   : > { %v6786_v16 = vpop.f32.mrf.mxu1 }
 0x16f   : > { %v932_v18 = vmax.f32 %v856_v13, 0.0  ;;  %v5318_v13 = vld [vmem:[%s9058_s3 + $0xa0] sm:$0xf] }
 0x171   : > { %v6792_v24 = vpack.c.bf16 %v932_v18, %v930_v55  ;;  %808 = vmatmul.bf16.gmra.mxu3 %v6790_v20  ;;  %1595 = vmatmul.bf16.gmra.mxu1 %v6788_v17  ;;  %v5939_v55 = vld [vmem:[%s9058_s3 + $0xac] sm:$0xf0] }
 0x172   : > { %1684 = vmatmul.bf16.gmra.mxu2 %v6737_v19  ;;  %v5319_v18 = vor.u32 %v5939_v55, %v5318_v13 }
 0x173   : > { %1521 = vmatmul.bf16.gmra.mxu0 %v6792_v24 }
 0x174   : > { %v858_v36 = vpop.f32.mrf.mxu2  ;;  %1406 = vmatpush.bf16.msrb.mxu3 %v5319_v18 }
 0x175   : > { %v859_v38 = vadd.f32 %v858_v36, %v6646_v12 }
 0x176   : > { %v6798_v25 = vpop.f32.mrf.mxu1 }
 0x177   : > { %v934_v48 = vmax.f32 %v859_v38, 0.0  ;;  %v929_v38 = vmax.f32 %v765_v27, 0.0 }
 0x178   : > { %1407 = vmatpush.bf16.msrb.mxu3 %v5303_v35 }
 0x179   : > { %v6876_v59 = vpack.c.bf16 %v931_v28, %v929_v38 }
 0x17c   : > { %v860_v40 = vpop.f32.mrf.mxu2 }
 0x17d   : > { %v861_v42 = vadd.f32 %v860_v40, %v6646_v12 }
 0x17e   : > { %v6808_v46 = vpop.f32.mrf.mxu1 }
 0x17f   : > { %v936_v49 = vmax.f32 %v861_v42, 0.0  ;;  %v775_v13 = vadd.f32 %v6808_v46, %v6752_v44 }
 0x181   : > { %v6814_v22 = vpack.c.bf16 %v936_v49, %v934_v48  ;;  %813 = vmatmul.bf16.gmra.mxu3 %v6812_v50  ;;  %1600 = vmatmul.bf16.gmra.mxu1 %v6810_v23  ;;  %v5286_v49 = vld [vmem:[%s9058_s3 + $0x60] sm:$0xf] }
 0x182   : > { %1689 = vmatmul.bf16.gmra.mxu2 %v6748_v39  ;;  %v5287_v51 = vor.u32 %v5931_v15, %v5286_v49 }
 0x183   : > { %1526 = vmatmul.bf16.gmra.mxu0 %v6814_v22 }
 0x184   : > { %v863_v37 = vpop.f32.mrf.mxu2  ;;  %1408 = vmatpush.bf16.msrb.mxu3 %v5287_v51  ;;  %v5486_v51 = vld [vmem:[%s9058_s3 + $0x1e8] sm:$0xf] }
 0x185   : > { %v864_v58 = vadd.f32 %v863_v37, %v6646_v12  ;;  %v770_v37 = vadd.f32 %v6786_v16, %v6752_v44 }
 0x186   : > { %v6828_v54 = vpop.f32.mrf.mxu1 }
 0x187   : > { %v938_v7 = vmax.f32 %v864_v58, 0.0  ;;  %v933_v1 = vmax.f32 %v770_v37, 0.0 }
 0x188   : > { %1409 = vmatpush.bf16.msrb.mxu3 %v5271_v52 }
 0x18c   : > { %v865_v3 = vpop.f32.mrf.mxu2 }
 0x18d   : > { %v866_v14 = vadd.f32 %v865_v3, %v6646_v12 }
 0x18e   : > { %v6842_v5 = vpop.f32.mrf.mxu1 }
 0x18f   : > { %v940_v8 = vmax.f32 %v866_v14, 0.0  ;;  %v5255_v14 = vor.u32 %v5923_v0, %v5254_v4 }
 0x191   : > { %v6848_v6 = vpack.c.bf16 %v940_v8, %v938_v7  ;;  %818 = vmatmul.bf16.gmra.mxu3 %v6846_v9  ;;  %1605 = vmatmul.bf16.gmra.mxu1 %v6844_v33 }
 0x192   : > { %1694 = vmatmul.bf16.gmra.mxu2 %v6770_v62  ;;  %1410 = vmatpush.bf16.msrb.mxu3 %v5255_v14 }
 0x193   : > { %1531 = vmatmul.bf16.gmra.mxu0 %v6848_v6 }
 0x194   : > { %v868_v21 = vpop.f32.mrf.mxu2 }
 0x195   : > { %v869_v29 = vadd.f32 %v868_v21, %v6646_v12  ;;  %v5238_v21 = vld [vmem:[%s9058_s3] sm:$0xf] }
 0x196   : > { %v6860_v36 = vpop.f32.mrf.mxu1  ;;  %v5239_v28 = vor.u32 %v5919_v26, %v5238_v21  ;;  %v6991_v21 = vld [vmem:[%s9064_s9 + $0x2] ss:$8 sm:$0xf] }
 0x197   : > { %v942_v41 = vmax.f32 %v869_v29, 0.0  ;;  %v937_v29 = vmax.f32 %v775_v13, 0.0  ;;  %v782_v15 = vadd.f32 %v6860_v36, %v6752_v44 }
 0x198   : > { %1411 = vmatpush.bf16.msrb.mxu3 %v5239_v28 }
 0x19c   : > { %v870_v34 = vpop.f32.mrf.mxu2 }
 0x19d   : > { %v871_v40 = vadd.f32 %v870_v34, %v6646_v12 }
 0x19e   : > { %v6874_v63 = vpop.f32.mrf.mxu1 }
 0x19f   : > { %v944_v42 = vmax.f32 %v871_v40, 0.0  ;;  %v5358_v40 = vld [vmem:[%s9058_s3 + $0xe8] sm:$0xf] }
 0x1a1   : > { %v6878_v48 = vpack.c.bf16 %v944_v42, %v942_v41  ;;  %892 = vmatmul.bf16.vlgmr.msra.gmra.mxu3 %v6768_v61  ;;  %1610 = vmatmul.bf16.gmra.mxu1 %v6876_v59  ;;  %v772_v61 = vadd.f32 %v6798_v25, %v6752_v44  ;;  %v5948_v41 = vld [vmem:[%s9058_s3 + $0xf4] sm:$0xf0] }
 0x1a2   : > { %1699 = vmatmul.bf16.gmra.mxu2 %v6792_v24  ;;  %v5359_v42 = vor.u32 %v5948_v41, %v5358_v40 }
 0x1a3   : > { %1536 = vmatmul.bf16.gmra.mxu0 %v6878_v48  ;;  %v935_v10 = vmax.f32 %v772_v61, 0.0  ;;  %v780_v61 = vadd.f32 %v6842_v5, %v6752_v44 }
 0x1a4   : > { %v873_v53 = vpop.f32.mrf.mxu2  ;;  %1760 = vmatpush.bf16.msra.mxu3 %v5359_v42 }
 0x1a5   : > { %v874_v56 = vadd.f32 %v873_v53, %v6646_v12  ;;  %v6906_v16 = vpack.c.bf16 %v935_v10, %v933_v1  ;;  %v5980_v53 = vld [vmem:[%s9058_s3 + $0x1f4] sm:$0xf0]  ;;  %v943_v10 = vmax.f32 %v782_v15, 0.0  ;;  %v941_v36 = vmax.f32 %v780_v61, 0.0  ;;  %v5470_v61 = vld [vmem:[%s9058_s3 + $0x1c8] sm:$0xf] }
 0x1a6   : > { %v6890_v31 = vpop.f32.mrf.mxu1  ;;  %v5487_v37 = vor.u32 %v5980_v53, %v5486_v51 }
 0x1a7   : > { %v946_v2 = vmax.f32 %v874_v56, 0.0  ;;  %v6970_v1 = vpack.c.bf16 %v943_v10, %v941_v36  ;;  %v787_v14 = vadd.f32 %v6890_v31, %v6752_v44 }
 0x1a8   : > { %1849 = vmatpush.bf16.msra.mxu0 %v5487_v37  ;;  %v5976_v37 = vld [vmem:[%s9058_s3 + $0x1d4] sm:$0xf0] }
 0x1ac   : > { %v875_v43 = vpop.f32.mrf.mxu2 }
 0x1ad   : > { %v876_v58 = vadd.f32 %v875_v43, %v6646_v12 }
 0x1ae   : > { %v6904_v25 = vpop.f32.mrf.mxu1 }
 0x1af   : > { %v948_v45 = vmax.f32 %v876_v58, 0.0  ;;  %v790_v10 = vadd.f32 %v6904_v25, %v6752_v44 }
 0x1b0   : > { %v6942_v38 = vpop.f32.mrf.mxu0 }
 0x1b1   : > { %v6908_v3 = vpack.c.bf16 %v948_v45, %v946_v2  ;;  %897 = vmatmul.bf16.gmra.mxu3 %v6790_v20  ;;  %1615 = vmatmul.bf16.gmra.mxu1 %v6906_v16  ;;  %v777_v20 = vadd.f32 %v6828_v54, %v6752_v44 }
 0x1b2   : > { %1704 = vmatmul.bf16.gmra.mxu2 %v6814_v22 }
 0x1b3   : > { %1541 = vmatmul.bf16.gmra.mxu0 %v6908_v3  ;;  %v939_v55 = vmax.f32 %v777_v20, 0.0  ;;  %v947_v20 = vmax.f32 %v787_v14, 0.0 }
 0x1b4   : > { %v878_v7 = vpop.f32.mrf.mxu2 }
 0x1b5   : > { %v879_v18 = vadd.f32 %v878_v7, %v6646_v12  ;;  %v6936_v46 = vpack.c.bf16 %v939_v55, %v937_v29  ;;  %v785_v7 = vadd.f32 %v6874_v63, %v6752_v44  ;;  %v6998_v63 = vperm.slane %v6991_v21, 1 }
 0x1b6   : > { %v6920_v8 = vpop.f32.mrf.mxu1 }
 0x1b7   : > { %v950_v32 = vmax.f32 %v879_v18, 0.0  ;;  %v945_v55 = vmax.f32 %v785_v7, 0.0  ;;  %v792_v53 = vadd.f32 %v6920_v8, %v6752_v44  ;;  %v949_v8 = vmax.f32 %v790_v10, 0.0 }
 0x1b8   : > { %v6965_v57 = vpop.f32.mrf.mxu0 }
 0x1b9   : > { %v951_v36 = vmax.f32 %v792_v53, 0.0 }
 0x1bb   : > { %v7030_v7 = vpack.c.bf16 %v951_v36, %v949_v8 }
 0x1bc   : > { %v880_v27 = vpop.f32.mrf.mxu2 }
 0x1bd   : > { %v881_v30 = vadd.f32 %v880_v27, %v6646_v12  ;;  %v6993_v27 = vpack.c.bf16 %v947_v20, %v945_v55 }
 0x1be   : > { %v6934_v54 = vpop.f32.mrf.mxu1 }
 0x1bf   : > { %v952_v34 = vmax.f32 %v881_v30, 0.0 }
 0x1c0   : > { %v6978_v4 = vpop.f32.mrf.mxu0 }
 0x1c1   : > { %v6938_v35 = vpack.c.bf16 %v952_v34, %v950_v32  ;;  %902 = vmatmul.bf16.gmra.mxu3 %v6812_v50  ;;  %1620 = vmatmul.bf16.gmra.mxu1 %v6936_v46  ;;  %v5342_v32 = vld [vmem:[%s9058_s3 + $0xc8] sm:$0xf]  ;;  %v5944_v34 = vld [vmem:[%s9058_s3 + $0xd4] sm:$0xf0] }
 0x1c2   : > { %1709 = vmatmul.bf16.gmra.mxu2 %v6848_v6  ;;  %v5343_v40 = vor.u32 %v5944_v34, %v5342_v32  ;;  %v795_v34 = vadd.f32 %v6934_v54, %v6752_v44  ;;  %v5326_v54 = vld [vmem:[%s9058_s3 + $0xa8] sm:$0xf] }
 0x1c3   : > { %1546 = vmatmul.bf16.gmra.mxu0 %v6938_v35 }
 0x1c4   : > { %v883_v49 = vpop.f32.mrf.mxu2  ;;  %1761 = vmatpush.bf16.msra.mxu3 %v5343_v40 }
 0x1c5   : > { %v884_v56 = vadd.f32 %v883_v49, %v6646_v12 }
 0x1c6   : > { %v6952_v50 = vpop.f32.mrf.mxu1 }
 0x1c7   : > { %v954_v58 = vmax.f32 %v884_v56, 0.0  ;;  %v5471_v56 = vor.u32 %v5976_v37, %v5470_v61  ;;  %v797_v32 = vadd.f32 %v6952_v50, %v6752_v44  ;;  %v5940_v50 = vld [vmem:[%s9058_s3 + $0xb4] sm:$0xf0] }
 0x1c8   : > { %v6995_v29 = vpop.f32.mrf.mxu0 }
 0x1c9   : > { %1850 = vmatpush.bf16.msra.mxu0 %v5471_v56  ;;  %v955_v40 = vmax.f32 %v797_v32, 0.0 }
 0x1cc   : > { %v885_v60 = vpop.f32.mrf.mxu2 }
 0x1cd   : > { %v886_v43 = vadd.f32 %v885_v60, %v6646_v12 }
 0x1ce   : > { %v6968_v52 = vpop.f32.mrf.mxu1 }
 0x1cf   : > { %v956_v2 = vmax.f32 %v886_v43, 0.0  ;;  %v800_v32 = vadd.f32 %v6968_v52, %v6752_v44 }
 0x1d0   : > { %v7025_v60 = vpop.f32.mrf.mxu0 }
 0x1d1   : > { %v6972_v45 = vpack.c.bf16 %v956_v2, %v954_v58  ;;  %907 = vmatmul.bf16.gmra.mxu3 %v6846_v9  ;;  %1625 = vmatmul.bf16.gmra.mxu1 %v6970_v1 }
 0x1d2   : > { %1714 = vmatmul.bf16.gmra.mxu2 %v6878_v48 }
 0x1d3   : > { %9136 = vst [vmem:[#allocation5_spill] sm:$0xff] %v6972_v45  ;;  %1551 = vmatmul.bf16.gmra.mxu0 %v6972_v45 }
 0x1d4   : > { %v888_v5 = vpop.f32.mrf.mxu2 }
 0x1d5   : > { %v889_v9 = vadd.f32 %v888_v5, %v6646_v12 }
 0x1d6   : > { %v6980_v0 = vpop.f32.mrf.mxu1 }
 0x1d7   : > { %v958_v28 = vmax.f32 %v889_v9, 0.0 }
 0x1dc   : > { %v890_v13 = vpop.f32.mrf.mxu2 }
 0x1dd   : > { %v891_v18 = vadd.f32 %v890_v13, %v6646_v12  ;;  %v7037_v13 = vpop.f32.mrf.mxu0 }
 0x1de   : > { %v1591_v26 = vpop.f32.mrf.mxu1 }
 0x1df   : > { %v960_v31 = vmax.f32 %v891_v18, 0.0  ;;  %v1592_v41 = vadd.f32 %v1591_v26, %v6998_v63 }
 0x1e1   : > { %v7000_v30 = vpack.c.bf16 %v960_v31, %v958_v28  ;;  %1412 = vmatmul.bf16.vlgmr.msrb.gmra.mxu3 %v6766_v11  ;;  %1630 = vmatmul.bf16.gmra.mxu1 %v6993_v27 }
 0x1e2   : > { %1719 = vmatmul.bf16.gmra.mxu2 %v6908_v3 }
 0x1e3   : > { %9137 = vst [vmem:[#allocation6_spill] sm:$0xff] %v7000_v30  ;;  %1556 = vmatmul.bf16.gmra.mxu0 %v7000_v30 }
 0x1e4   : > { %v7013_v42 = vpop.f32.mrf.mxu3 }
 0x1e5   : > { %v1680_v49 = vpop.f32.mrf.mxu2  ;;  %v7049_v53 = vpop.f32.mrf.mxu0 }
 0x1e6   : > { %v1681_v15 = vadd.f32 %v1680_v49, %v1592_v41  ;;  %v1593_v51 = vpop.f32.mrf.mxu1 }
 0x1e7   : > { %v1594_v43 = vadd.f32 %v1593_v51, %v6998_v63 }
 0x1e8   : > { %v2117_v20 = vmax.f32 %v1681_v15, 0.0  ;;  %v953_v15 = vmax.f32 %v795_v34, 0.0 }
 0x1ea   : > { %v7051_v10 = vpack.c.bf16 %v955_v40, %v953_v15 }
 0x1ec   : > { %v7028_v58 = vpop.f32.mrf.mxu3 }
 0x1ed   : > { %v1682_v2 = vpop.f32.mrf.mxu2 }
 0x1ee   : > { %v1683_v5 = vadd.f32 %v1682_v2, %v1594_v43  ;;  %v1596_v14 = vpop.f32.mrf.mxu1  ;;  %v5327_v43 = vor.u32 %v5940_v50, %v5326_v54 }
 0x1ef   : > { %v1597_v55 = vadd.f32 %v1596_v14, %v6998_v63 }
 0x1f0   : > { %v2121_v9 = vmax.f32 %v1683_v5, 0.0  ;;  %1762 = vmatpush.bf16.msra.mxu3 %v5327_v43 }
 0x1f1   : > { %1417 = vmatmul.bf16.gmra.mxu3 %v6788_v17  ;;  %1635 = vmatmul.bf16.gmra.mxu1 %v7030_v7 }
 0x1f2   : > { %v7034_v25 = vpack.c.bf16 %v2121_v9, %v2117_v20  ;;  %1724 = vmatmul.bf16.gmra.mxu2 %v6938_v35 }
 0x1f4   : > { %9138 = vst [vmem:[#allocation7_spill] sm:$0xff] %v7034_v25  ;;  %v7040_v18 = vpop.f32.mrf.mxu3 }
 0x1f5   : > { %v1685_v26 = vpop.f32.mrf.mxu2 }
 0x1f6   : > { %v1686_v28 = vadd.f32 %v1685_v26, %v1597_v55  ;;  %v1598_v31 = vpop.f32.mrf.mxu1  ;;  %v802_v55 = vadd.f32 %v6980_v0, %v6752_v44  ;;  %v7069_v26 = vpop.f32.mrf.mxu0  ;;  %v957_v0 = vmax.f32 %v800_v32, 0.0 }
 0x1f7   : > { %v1599_v41 = vadd.f32 %v1598_v31, %v6998_v63  ;;  %v5972_v31 = vld [vmem:[%s9058_s3 + $0x1b4] sm:$0xf0] }
 0x1f8   : > { %v2125_v56 = vmax.f32 %v1686_v28, 0.0  ;;  %v5454_v28 = vld [vmem:[%s9058_s3 + $0x1a8] sm:$0xf]  ;;  %v959_v40 = vmax.f32 %v802_v55, 0.0 }
 0x1f9   : > { %v5455_v34 = vor.u32 %v5972_v31, %v5454_v28  ;;  %v805_v28 = vadd.f32 %v7013_v42, %v6752_v44  ;;  %v5360_v42 = vld [vmem:[%s9058_s3 + $0xf8] sm:$0xf0] }
 0x1fb   : > { %1851 = vmatpush.bf16.msra.mxu0 %v5455_v34 }
 0x1fc   : > { %v7047_v49 = vpop.f32.mrf.mxu3 }
 0x1fd   : > { %v1687_v51 = vpop.f32.mrf.mxu2 }
 0x1fe   : > { %v1688_v61 = vadd.f32 %v1687_v51, %v1599_v41  ;;  %v1601_v37 = vpop.f32.mrf.mxu1  ;;  %v7086_v52 = vpop.f32.mrf.mxu0 }
 0x1ff   : > { %v1602_v2 = vadd.f32 %v1601_v37, %v6998_v63 }
 0x200   : > { %v2129_v36 = vmax.f32 %v1688_v61, 0.0 }
 0x201   : > { %1422 = vmatmul.bf16.gmra.mxu3 %v6810_v23  ;;  %1640 = vmatmul.bf16.gmra.mxu1 %v7051_v10 }
 0x202   : > { %1729 = vmatmul.bf16.gmra.mxu2 %v6972_v45  ;;  %v7062_v8 = vpack.c.bf16 %v2129_v36, %v2125_v56  ;;  %v7082_v56 = vpack.c.bf16 %v959_v40, %v957_v0 }
 0x204   : > { %9139 = vst [vmem:[#allocation8_spill] sm:$0xff] %v7062_v8  ;;  %v7065_v5 = vpop.f32.mrf.mxu3 }
 0x205   : > { %v1690_v14 = vpop.f32.mrf.mxu2 }
 0x206   : > { %v1691_v20 = vadd.f32 %v1690_v14, %v1602_v2  ;;  %v1603_v9 = vpop.f32.mrf.mxu1  ;;  %v7098_v32 = vpop.f32.mrf.mxu0 }
 0x207   : > { %v1604_v41 = vadd.f32 %v1603_v9, %v6998_v63 }
 0x208   : > { %v2133_v36 = vmax.f32 %v1691_v20, 0.0  ;;  %v807_v20 = vadd.f32 %v7028_v58, %v6752_v44  ;;  %v5946_v58 = vld [vmem:[%s9058_s3 + $0xec] sm:$0xf] }
 0x20a   : > { %v963_v31 = vmax.f32 %v807_v20, 0.0 }
 0x20c   : > { %v7080_v15 = vpop.f32.mrf.mxu3 }
 0x20d   : > { %v1692_v51 = vpop.f32.mrf.mxu2 }
 0x20e   : > { %v1693_v61 = vadd.f32 %v1692_v51, %v1604_v41  ;;  %v1606_v37 = vpop.f32.mrf.mxu1  ;;  %v961_v41 = vmax.f32 %v805_v28, 0.0 }
 0x20f   : > { %v1607_v43 = vadd.f32 %v1606_v37, %v6998_v63 }
 0x210   : > { %v2137_v54 = vmax.f32 %v1693_v61, 0.0  ;;  %v7103_v37 = vpack.c.bf16 %v963_v31, %v961_v41  ;;  %v5344_v41 = vld [vmem:[%s9058_s3 + $0xd8] sm:$0xf0] }
 0x211   : > { %1427 = vmatmul.bf16.gmra.mxu3 %v6844_v33  ;;  %1645 = vmatmul.bf16.gmra.mxu1 %v7082_v56 }
 0x212   : > { %1734 = vmatmul.bf16.gmra.mxu2 %v7000_v30  ;;  %v7089_v50 = vpack.c.bf16 %v2137_v54, %v2133_v36  ;;  %v5930_v30 = vld [vmem:[%s9058_s3 + $0x6c] sm:$0xf] }
 0x214   : > { %9140 = vst [vmem:[#allocation9_spill] sm:$0xff] %v7089_v50  ;;  %v7092_v2 = vpop.f32.mrf.mxu3  ;;  %v7128_v50 = vpop.f32.mrf.mxu0 }
 0x215   : > { %v1695_v14 = vpop.f32.mrf.mxu2 }
 0x216   : > { %v1696_v9 = vadd.f32 %v1695_v14, %v1607_v43  ;;  %v1608_v55 = vpop.f32.mrf.mxu1  ;;  %v5310_v43 = vld [vmem:[%s9058_s3 + $0x88] sm:$0xf]  ;;  %v5936_v14 = vld [vmem:[%s9058_s3 + $0x94] sm:$0xf0] }
 0x217   : > { %v1609_v34 = vadd.f32 %v1608_v55, %v6998_v63  ;;  %v5311_v55 = vor.u32 %v5936_v14, %v5310_v43  ;;  %v810_v43 = vadd.f32 %v7040_v18, %v6752_v44  ;;  %v5934_v18 = vld [vmem:[%s9058_s3 + $0x8c] sm:$0xf] }
 0x218   : > { %v2141_v36 = vmax.f32 %v1696_v9, 0.0  ;;  %v5363_v9 = vor.u32 %v5946_v58, %v5360_v42  ;;  %v5968_v42 = vld [vmem:[%s9058_s3 + $0x194] sm:$0xf0] }
 0x219   : > { %1763 = vmatpush.bf16.msra.mxu3 %v5311_v55 }
 0x21a   : > { %1938 = vmatpush.bf16.msra.mxu1 %v5363_v9  ;;  %v5938_v9 = vld [vmem:[%s9058_s3 + $0xac] sm:$0xf] }
 0x21c   : > { %v7101_v40 = vpop.f32.mrf.mxu3 }
 0x21d   : > { %v1697_v0 = vpop.f32.mrf.mxu2 }
 0x21e   : > { %v1698_v51 = vadd.f32 %v1697_v0, %v1609_v34  ;;  %v1611_v61 = vpop.f32.mrf.mxu1  ;;  %v5942_v34 = vld [vmem:[%s9058_s3 + $0xcc] sm:$0xf] }
 0x21f   : > { %v1612_v28 = vadd.f32 %v1611_v61, %v6998_v63  ;;  %v5438_v61 = vld [vmem:[%s9058_s3 + $0x188] sm:$0xf] }
 0x220   : > { %v2145_v54 = vmax.f32 %v1698_v51, 0.0  ;;  %v5347_v51 = vor.u32 %v5942_v34, %v5344_v41  ;;  %v5439_v14 = vor.u32 %v5968_v42, %v5438_v61  ;;  %v965_v61 = vmax.f32 %v810_v43, 0.0  ;;  %v5296_v43 = vld [vmem:[%s9058_s3 + $0x78] sm:$0xf0] }
 0x221   : > { %1432 = vmatmul.bf16.gmra.mxu3 %v6876_v59  ;;  %1650 = vmatmul.bf16.gmra.mxu1 %v7103_v37 }
 0x222   : > { %v7119_v20 = vpack.c.bf16 %v2145_v54, %v2141_v36  ;;  %v812_v54 = vadd.f32 %v7047_v49, %v6752_v44  ;;  %1939 = vmatpush.bf16.msra.mxu1 %v5347_v51  ;;  %v5328_v49 = vld [vmem:[%s9058_s3 + $0xb8] sm:$0xf0]  ;;  %1852 = vmatpush.bf16.msra.mxu0 %v5439_v14 }
 0x223   : > { %v5331_v55 = vor.u32 %v5938_v9, %v5328_v49  ;;  %v5312_v51 = vld [vmem:[%s9058_s3 + $0x98] sm:$0xf0] }
 0x224   : > { %9141 = vst [vmem:[#allocation10_spill] sm:$0xff] %v7119_v20  ;;  %v893_v31 = vpop.f32.mrf.mxu3 }
 0x225   : > { %v1700_v0 = vpop.f32.mrf.mxu2  ;;  %v894_v34 = vadd.f32 %v893_v31, %v6646_v12 }
 0x226   : > { %v1701_v58 = vadd.f32 %v1700_v0, %v1612_v28  ;;  %v1613_v36 = vpop.f32.mrf.mxu1  ;;  %v967_v28 = vmax.f32 %v812_v54, 0.0  ;;  %1940 = vmatpush.bf16.msra.mxu1 %v5331_v55  ;;  %v5315_v54 = vor.u32 %v5934_v18, %v5312_v51  ;;  %v7157_v55 = vpop.f32.mrf.mxu0 }
 0x227   : > { %v1614_v41 = vadd.f32 %v1613_v36, %v6998_v63  ;;  %v962_v36 = vmax.f32 %v894_v34, 0.0  ;;  %v5488_v34 = vld [vmem:[%s9058_s3 + $0x1f8] sm:$0xf0] }
 0x228   : > { %v7155_v14 = vpack.c.bf16 %v967_v28, %v965_v61  ;;  %v2149_v8 = vmax.f32 %v1701_v58, 0.0  ;;  %v5299_v28 = vor.u32 %v5930_v30, %v5296_v43  ;;  %v5978_v58 = vld [vmem:[%s9058_s3 + $0x1ec] sm:$0xf]  ;;  %v5280_v61 = vld [vmem:[%s9058_s3 + $0x58] sm:$0xf0] }
 0x229   : > { %v5926_v30 = vld [vmem:[%s9058_s3 + $0x4c] sm:$0xf] }
 0x22a   : > { %1941 = vmatpush.bf16.msra.mxu1 %v5315_v54  ;;  %v5974_v54 = vld [vmem:[%s9058_s3 + $0x1cc] sm:$0xf] }
 0x22b   : > { %v5922_v43 = vld [vmem:[%s9058_s3 + $0x2c] sm:$0xf] }
 0x22c   : > { %v895_v0 = vpop.f32.mrf.mxu3 }
 0x22d   : > { %v896_v42 = vadd.f32 %v895_v0, %v6646_v12  ;;  %v1702_v9 = vpop.f32.mrf.mxu2 }
 0x22e   : > { %v1703_v49 = vadd.f32 %v1702_v9, %v1614_v41  ;;  %v1616_v31 = vpop.f32.mrf.mxu1  ;;  %1942 = vmatpush.bf16.msra.mxu1 %v5299_v28  ;;  %v5264_v28 = vld [vmem:[%s9058_s3 + $0x38] sm:$0xf0] }
 0x22f   : > { %v964_v20 = vmax.f32 %v896_v42, 0.0  ;;  %v1617_v18 = vadd.f32 %v1616_v31, %v6998_v63  ;;  %v817_v31 = vadd.f32 %v7080_v15, %v6752_v44  ;;  %v5970_v15 = vld [vmem:[%s9058_s3 + $0x1ac] sm:$0xf] }
 0x230   : > { %v2153_v25 = vmax.f32 %v1703_v49, 0.0  ;;  %v5472_v49 = vld [vmem:[%s9058_s3 + $0x1d8] sm:$0xf0] }
 0x231   : > { %v7165_v0 = vpack.c.bf16 %v964_v20, %v962_v36  ;;  %1437 = vmatmul.bf16.gmra.mxu3 %v6906_v16  ;;  %1655 = vmatmul.bf16.gmra.mxu1 %v7155_v14  ;;  %v5491_v20 = vor.u32 %v5978_v58, %v5488_v34  ;;  %v5475_v36 = vor.u32 %v5974_v54, %v5472_v49  ;;  %v5248_v49 = vld [vmem:[%s9058_s3 + $0x18] sm:$0xf0] }
 0x232   : > { %v7175_v41 = vpack.c.bf16 %v2153_v25, %v2149_v8  ;;  %v5283_v25 = vor.u32 %v5926_v30, %v5280_v61  ;;  %v815_v58 = vadd.f32 %v7065_v5, %v6752_v44  ;;  %v5267_v34 = vor.u32 %v5922_v43, %v5264_v28  ;;  %v5918_v5 = vld [vmem:[%s9058_s3 + $0xc] sm:$0xf] }
 0x233   : > { %9142 = vst [vmem:[#allocation11_spill] sm:$0xff] %v7165_v0  ;;  %1561 = vmatmul.bf16.gmra.mxu0 %v7165_v0  ;;  %1739 = vmatmul.bf16.gmra.mxu2 %v7165_v0  ;;  %v971_v30 = vmax.f32 %v817_v31, 0.0  ;;  %v5251_v31 = vor.u32 %v5918_v5, %v5248_v49 }
 0x234   : > { %9143 = vst [vmem:[#allocation12_spill] sm:$0xff] %v7175_v41  ;;  %v898_v51 = vpop.f32.mrf.mxu3  ;;  %2027 = vmatpush.bf16.msra.mxu2 %v5491_v20  ;;  %1943 = vmatpush.bf16.msra.mxu1 %v5283_v25  ;;  %v7202_v20 = vpop.f32.mrf.mxu0 }
 0x235   : > { %v1705_v42 = vpop.f32.mrf.mxu2  ;;  %v899_v61 = vadd.f32 %v898_v51, %v6646_v12 }
 0x236   : > { %v1706_v8 = vadd.f32 %v1705_v42, %v1617_v18  ;;  %v1618_v9 = vpop.f32.mrf.mxu1  ;;  %v5456_v18 = vld [vmem:[%s9058_s3 + $0x1b8] sm:$0xf0] }
 0x237   : > { %v5459_v42 = vor.u32 %v5970_v15, %v5456_v18  ;;  %v1619_v25 = vadd.f32 %v1618_v9, %v6998_v63  ;;  %v5966_v9 = vld [vmem:[%s9058_s3 + $0x18c] sm:$0xf]  ;;  %v966_v41 = vmax.f32 %v899_v61, 0.0 }
 0x238   : > { %2028 = vmatpush.bf16.msra.mxu2 %v5475_v36  ;;  %1944 = vmatpush.bf16.msra.mxu1 %v5267_v34  ;;  %v969_v36 = vmax.f32 %v815_v58, 0.0  ;;  %v5440_v34 = vld [vmem:[%s9058_s3 + $0x198] sm:$0xf0]  ;;  %v2157_v45 = vmax.f32 %v1706_v8, 0.0  ;;  %v5422_v8 = vld [vmem:[%s9058_s3 + $0x168] sm:$0xf] }
 0x239   : > { %v5443_v58 = vor.u32 %v5966_v9, %v5440_v34 }
 0x23a   : > { %v7225_v18 = vpack.c.bf16 %v971_v30, %v969_v36  ;;  %v5932_v30 = vld [vmem:[%s9058_s3 + $0x74] sm:$0xf0]  ;;  %v5424_v36 = vld [vmem:[%s9058_s3 + $0x178] sm:$0xf0] }
 0x23c   : > { %v900_v54 = vpop.f32.mrf.mxu3  ;;  %2029 = vmatpush.bf16.msra.mxu2 %v5459_v42  ;;  %1945 = vmatpush.bf16.msra.mxu1 %v5251_v31 }
 0x23d   : > { %v901_v43 = vadd.f32 %v900_v54, %v6646_v12  ;;  %v1707_v28 = vpop.f32.mrf.mxu2 }
 0x23e   : > { %v1708_v51 = vadd.f32 %v1707_v28, %v1619_v25  ;;  %v1621_v15 = vpop.f32.mrf.mxu1  ;;  %v5294_v25 = vld [vmem:[%s9058_s3 + $0x68] sm:$0xf] }
 0x23f   : > { %v968_v0 = vmax.f32 %v901_v43, 0.0  ;;  %v5295_v61 = vor.u32 %v5932_v30, %v5294_v25  ;;  %v7253_v43 = vpop.f32.mrf.mxu0  ;;  %v1622_v28 = vadd.f32 %v1621_v15, %v6998_v63  ;;  %v5958_v15 = vld [vmem:[%s9058_s3 + $0x14c] sm:$0xf]  ;;  %v822_v25 = vadd.f32 %v7101_v40, %v6752_v44 }
 0x240   : > { %v2161_v54 = vmax.f32 %v1708_v51, 0.0  ;;  %2030 = vmatpush.bf16.msra.mxu2 %v5443_v58  ;;  %v5406_v58 = vld [vmem:[%s9058_s3 + $0x148] sm:$0xf]  ;;  %v5954_v40 = vld [vmem:[%s9058_s3 + $0x12c] sm:$0xf] }
 0x241   : > { %v7227_v42 = vpack.c.bf16 %v968_v0, %v966_v41  ;;  %1442 = vmatmul.bf16.gmra.mxu3 %v6936_v46  ;;  %1660 = vmatmul.bf16.gmra.mxu1 %v7225_v18  ;;  %v5964_v0 = vld [vmem:[%s9058_s3 + $0x174] sm:$0xf0]  ;;  %v5962_v41 = vld [vmem:[%s9058_s3 + $0x16c] sm:$0xf] }
 0x242   : > { %v7246_v5 = vpack.c.bf16 %v2161_v54, %v2157_v45  ;;  %v5423_v49 = vor.u32 %v5964_v0, %v5422_v8  ;;  %1764 = vmatpush.bf16.msra.mxu3 %v5295_v61  ;;  %v5427_v51 = vor.u32 %v5962_v41, %v5424_v36  ;;  %v5960_v54 = vld [vmem:[%s9058_s3 + $0x154] sm:$0xf0]  ;;  %v5408_v61 = vld [vmem:[%s9058_s3 + $0x158] sm:$0xf0]  ;;  %v820_v0 = vadd.f32 %v7092_v2, %v6752_v44  ;;  %v5390_v41 = vld [vmem:[%s9058_s3 + $0x128] sm:$0xf] }
 0x243   : > { %1566 = vmatmul.bf16.gmra.mxu0 %v7227_v42  ;;  %1744 = vmatmul.bf16.gmra.mxu2 %v7227_v42  ;;  %v5407_v30 = vor.u32 %v5960_v54, %v5406_v58  ;;  %v5411_v8 = vor.u32 %v5958_v15, %v5408_v61  ;;  %v975_v36 = vmax.f32 %v822_v25, 0.0  ;;  %v5392_v44 = vld [vmem:[%s9058_s3 + $0x138] sm:$0xf0] }
 0x244   : > { %9144 = vst [vmem:[#allocation13_spill] sm:$0xff] %v7246_v5  ;;  %v903_v31 = vpop.f32.mrf.mxu3  ;;  %1853 = vmatpush.bf16.msra.mxu0 %v5423_v49  ;;  %2031 = vmatpush.bf16.msra.mxu2 %v5427_v51  ;;  %v5956_v49 = vld [vmem:[%s9058_s3 + $0x134] sm:$0xf0]  ;;  %v5395_v58 = vor.u32 %v5954_v40, %v5392_v44  ;;  %v973_v54 = vmax.f32 %v820_v0, 0.0  ;;  %v5950_v0 = vld [vmem:[%s9058_s3 + $0x10c] sm:$0xf] }
 0x245   : > { %v1710_v9 = vpop.f32.mrf.mxu2  ;;  %v5391_v51 = vor.u32 %v5956_v49, %v5390_v41  ;;  %v5376_v44 = vld [vmem:[%s9058_s3 + $0x118] sm:$0xf0] }
 0x246   : > { %v1711_v45 = vadd.f32 %v1710_v9, %v1622_v28  ;;  %v1623_v34 = vpop.f32.mrf.mxu1  ;;  %v904_v28 = vadd.f32 %v903_v31, %v6646_v12  ;;  %v5374_v31 = vld [vmem:[%s9058_s3 + $0x108] sm:$0xf]  ;;  %v7298_v41 = vpack.c.bf16 %v975_v36, %v973_v54 }
 0x247   : > { %v1624_v2 = vadd.f32 %v1623_v34, %v6998_v63  ;;  %v7287_v61 = vpop.f32.mrf.mxu0  ;;  %v5952_v34 = vld [vmem:[%s9058_s3 + $0x114] sm:$0xf0] }
 0x248   : > { %1854 = vmatpush.bf16.msra.mxu0 %v5407_v30  ;;  %2032 = vmatpush.bf16.msra.mxu2 %v5411_v8  ;;  %v970_v49 = vmax.f32 %v904_v28, 0.0 }
 0x24c   : > { %v905_v9 = vpop.f32.mrf.mxu3  ;;  %1855 = vmatpush.bf16.msra.mxu0 %v5391_v51  ;;  %2033 = vmatpush.bf16.msra.mxu2 %v5395_v58  ;;  %v5375_v51 = vor.u32 %v5952_v34, %v5374_v31  ;;  %v5379_v58 = vor.u32 %v5950_v0, %v5376_v44 }
 0x24d   : > { %v906_v15 = vadd.f32 %v905_v9, %v6646_v12  ;;  %v1712_v30 = vpop.f32.mrf.mxu2 }
 0x24e   : > { %v1713_v8 = vadd.f32 %v1712_v30, %v1624_v2  ;;  %v1626_v25 = vpop.f32.mrf.mxu1  ;;  %v2165_v2 = vmax.f32 %v1711_v45, 0.0 }
 0x24f   : > { %v972_v40 = vmax.f32 %v906_v15, 0.0  ;;  %v1627_v28 = vadd.f32 %v1626_v25, %v6998_v63  ;;  %v7312_v31 = vpop.f32.mrf.mxu0 }
 0x250   : > { %v2169_v9 = vmax.f32 %v1713_v8, 0.0  ;;  %1856 = vmatpush.bf16.msra.mxu0 %v5375_v51  ;;  %2034 = vmatpush.bf16.msra.mxu2 %v5379_v58 }
 0x251   : > { %v7303_v30 = vpack.c.bf16 %v972_v40, %v970_v49  ;;  %1447 = vmatmul.bf16.gmra.mxu3 %v6970_v1  ;;  %1665 = vmatmul.bf16.gmra.mxu1 %v7298_v41 }
 0x252   : > { %v7307_v36 = vpack.c.bf16 %v2169_v9, %v2165_v2 }
 0x253   : > { %1571 = vmatmul.bf16.gmra.mxu0 %v7303_v30  ;;  %1749 = vmatmul.bf16.gmra.mxu2 %v7303_v30 }
 0x254   : > { %9145 = vst [vmem:[#allocation14_spill] sm:$0xff] %v7307_v36  ;;  %v908_v54 = vpop.f32.mrf.mxu3 }
 0x255   : > { %v1715_v45 = vpop.f32.mrf.mxu2  ;;  %v909_v34 = vadd.f32 %v908_v54, %v6646_v12 }
 0x256   : > { %v1716_v15 = vadd.f32 %v1715_v45, %v1627_v28  ;;  %v1628_v8 = vpop.f32.mrf.mxu1  ;;  %v5278_v28 = vld [vmem:[%s9058_s3 + $0x48] sm:$0xf] }
 0x257   : > { %v1629_v0 = vadd.f32 %v1628_v8, %v6998_v63  ;;  %v974_v9 = vmax.f32 %v909_v34, 0.0  ;;  %v7327_v54 = vpop.f32.mrf.mxu0 }
 0x258   : > { %v2173_v36 = vmax.f32 %v1716_v15, 0.0 }
 0x25c   : > { %v910_v49 = vpop.f32.mrf.mxu3 }
 0x25d   : > { %v911_v40 = vadd.f32 %v910_v49, %v6646_v12  ;;  %v1717_v51 = vpop.f32.mrf.mxu2  ;;  %v5928_v12 = vld [vmem:[%s9058_s3 + $0x54] sm:$0xf0] }
 0x25e   : > { %v1718_v44 = vadd.f32 %v1717_v51, %v1629_v0  ;;  %v1631_v2 = vpop.f32.mrf.mxu1  ;;  %v5279_v45 = vor.u32 %v5928_v12, %v5278_v28  ;;  %v7335_v0 = vperm.slane %v6991_v21, 0 }
 0x25f   : > { %v976_v58 = vmax.f32 %v911_v40, 0.0  ;;  %v1632_v15 = vadd.f32 %v1631_v2, %v6998_v63 }
 0x260   : > { %v2177_v25 = vmax.f32 %v1718_v44, 0.0  ;;  %1765 = vmatpush.bf16.msra.mxu3 %v5279_v45 }
 0x261   : > { %v7317_v5 = vpack.c.bf16 %v976_v58, %v974_v9  ;;  %1452 = vmatmul.bf16.gmra.mxu3 %v6993_v27  ;;  %1946 = vmatmul.bf16.vlgmr.msra.gmra.mxu1 %v6766_v11  ;;  %v7338_v9 = vpop.f32.mrf.mxu0 }
 0x262   : > { %v7329_v8 = vpack.c.bf16 %v2177_v25, %v2173_v36 }
 0x263   : > { %9146 = vst [vmem:[#allocation15_spill] sm:$0xff] %v7317_v5  ;;  %1576 = vmatmul.bf16.gmra.mxu0 %v7317_v5  ;;  %1754 = vmatmul.bf16.gmra.mxu2 %v7317_v5 }
 0x264   : > { %9147 = vst [vmem:[#allocation16_spill] sm:$0xff] %v7329_v8  ;;  %v1413_v34 = vpop.f32.mrf.mxu3 }
 0x265   : > { %v1720_v49 = vpop.f32.mrf.mxu2  ;;  %v1414_v44 = vadd.f32 %v1413_v34, %v7335_v0 }
 0x266   : > { %v1721_v40 = vadd.f32 %v1720_v49, %v1632_v15  ;;  %v1633_v51 = vpop.f32.mrf.mxu1 }
 0x267   : > { %v1634_v36 = vadd.f32 %v1633_v51, %v6998_v63  ;;  %v1503_v25 = vadd.f32 %v6942_v38, %v1414_v44 }
 0x268   : > { %v2181_v8 = vmax.f32 %v1721_v40, 0.0 }
 0x269   : > { %v2116_v15 = vmax.f32 %v1503_v25, 0.0  ;;  %v7353_v40 = vpop.f32.mrf.mxu0 }
 0x26c   : > { %v1415_v58 = vpop.f32.mrf.mxu3 }
 0x26d   : > { %v1416_v28 = vadd.f32 %v1415_v58, %v7335_v0  ;;  %v1722_v2 = vpop.f32.mrf.mxu2 }
 0x26e   : > { %v1723_v12 = vadd.f32 %v1722_v2, %v1634_v36  ;;  %v1636_v45 = vpop.f32.mrf.mxu1 }
 0x26f   : > { %v1505_v21 = vadd.f32 %v6965_v57, %v1416_v28  ;;  %v1637_v38 = vadd.f32 %v1636_v45, %v6998_v63 }
 0x270   : > { %v2185_v5 = vmax.f32 %v1723_v12, 0.0 }
 0x271   : > { %v2120_v49 = vmax.f32 %v1505_v21, 0.0  ;;  %1457 = vmatmul.bf16.gmra.mxu3 %v7030_v7  ;;  %1951 = vmatmul.bf16.gmra.mxu1 %v6788_v17 }
 0x272   : > { %v7346_v34 = vpack.c.bf16 %v2185_v5, %v2181_v8 }
 0x273   : > { %v7348_v51 = vpack.c.bf16 %v2120_v49, %v2116_v15  ;;  %1857 = vmatmul.bf16.vlgmr.msra.gmra.mxu0 %v6690_v47  ;;  %2035 = vmatmul.bf16.vlgmr.msra.gmra.mxu2 %v6690_v47  ;;  %v7360_v15 = vpop.f32.mrf.mxu0 }
 0x274   : > { %9148 = vst [vmem:[#allocation17_spill] sm:$0xff] %v7346_v34  ;;  %v1418_v44 = vpop.f32.mrf.mxu3 }
 0x275   : > { %9149 = vst [vmem:[#allocation18_spill] sm:$0xff] %v7348_v51  ;;  %v1725_v57 = vpop.f32.mrf.mxu2  ;;  %v1419_v25 = vadd.f32 %v1418_v44, %v7335_v0  ;;  %v5924_v44 = vld [vmem:[%s9058_s3 + $0x34] sm:$0xf0] }
 0x276   : > { %v1726_v36 = vadd.f32 %v1725_v57, %v1637_v38  ;;  %v1638_v58 = vpop.f32.mrf.mxu1 }
 0x277   : > { %v1639_v28 = vadd.f32 %v1638_v58, %v6998_v63  ;;  %v1508_v8 = vadd.f32 %v6978_v4, %v1419_v25  ;;  %v5262_v4 = vld [vmem:[%s9058_s3 + $0x28] sm:$0xf] }
 0x278   : > { %v2189_v49 = vmax.f32 %v1726_v36, 0.0  ;;  %v5263_v58 = vor.u32 %v5924_v44, %v5262_v4 }
 0x279   : > { %v2124_v38 = vmax.f32 %v1508_v8, 0.0 }
 0x27a   : > { %1766 = vmatpush.bf16.msra.mxu3 %v5263_v58 }
 0x27c   : > { %v1420_v5 = vpop.f32.mrf.mxu3 }
 0x27d   : > { %v1421_v2 = vadd.f32 %v1420_v5, %v7335_v0  ;;  %v1727_v12 = vpop.f32.mrf.mxu2 }
 0x27e   : > { %v1728_v21 = vadd.f32 %v1727_v12, %v1639_v28  ;;  %v1641_v47 = vpop.f32.mrf.mxu1 }
 0x27f   : > { %v1510_v45 = vadd.f32 %v6995_v29, %v1421_v2  ;;  %v1642_v25 = vadd.f32 %v1641_v47, %v6998_v63 }
 0x280   : > { %v2193_v34 = vmax.f32 %v1728_v21, 0.0  ;;  %v7378_v21 = vpop.f32.mrf.mxu0 }
 0x281   : > { %v2128_v57 = vmax.f32 %v1510_v45, 0.0  ;;  %1462 = vmatmul.bf16.gmra.mxu3 %v7051_v10  ;;  %1956 = vmatmul.bf16.gmra.mxu1 %v6810_v23 }
 0x282   : > { %v7370_v29 = vpack.c.bf16 %v2193_v34, %v2189_v49 }
 0x283   : > { %1862 = vmatmul.bf16.gmra.mxu0 %v6737_v19  ;;  %2040 = vmatmul.bf16.gmra.mxu2 %v6737_v19  ;;  %v7374_v36 = vpack.c.bf16 %v2128_v57, %v2124_v38 }
 0x284   : > { %9150 = vst [vmem:[#allocation19_spill] sm:$0xff] %v7370_v29  ;;  %v1423_v28 = vpop.f32.mrf.mxu3 }
 0x285   : > { %9151 = vst [vmem:[#allocation20_spill] sm:$0xff] %v7374_v36  ;;  %v1730_v5 = vpop.f32.mrf.mxu2  ;;  %v1424_v12 = vadd.f32 %v1423_v28, %v7335_v0 }
 0x286   : > { %v1731_v8 = vadd.f32 %v1730_v5, %v1642_v25  ;;  %v1643_v2 = vpop.f32.mrf.mxu1 }
 0x287   : > { %v1644_v34 = vadd.f32 %v1643_v2, %v6998_v63  ;;  %v1513_v49 = vadd.f32 %v7025_v60, %v1424_v12 }
 0x288   : > { %v2197_v44 = vmax.f32 %v1731_v8, 0.0  ;;  %v7392_v2 = vpop.f32.mrf.mxu0 }
 0x289   : > { %v2132_v25 = vmax.f32 %v1513_v49, 0.0 }
 0x28c   : > { %v1425_v45 = vpop.f32.mrf.mxu3 }
 0x28d   : > { %v1426_v19 = vadd.f32 %v1425_v45, %v7335_v0  ;;  %v1732_v38 = vpop.f32.mrf.mxu2 }
 0x28e   : > { %v1733_v57 = vadd.f32 %v1732_v38, %v1644_v34  ;;  %v1646_v4 = vpop.f32.mrf.mxu1 }
 0x28f   : > { %v1515_v47 = vadd.f32 %v7037_v13, %v1426_v19  ;;  %v1647_v13 = vadd.f32 %v1646_v4, %v6998_v63 }
 0x290   : > { %v2201_v58 = vmax.f32 %v1733_v57, 0.0 }
 0x291   : > { %v2136_v5 = vmax.f32 %v1515_v47, 0.0  ;;  %1467 = vmatmul.bf16.gmra.mxu3 %v7082_v56  ;;  %1961 = vmatmul.bf16.gmra.mxu1 %v6844_v33 }
 0x292   : > { %v7386_v28 = vpack.c.bf16 %v2201_v58, %v2197_v44  ;;  %v7399_v44 = vpop.f32.mrf.mxu0 }
 0x293   : > { %1867 = vmatmul.bf16.gmra.mxu0 %v6748_v39  ;;  %2045 = vmatmul.bf16.gmra.mxu2 %v6748_v39  ;;  %v7390_v60 = vpack.c.bf16 %v2136_v5, %v2132_v25 }
 0x294   : > { %9152 = vst [vmem:[#allocation21_spill] sm:$0xff] %v7386_v28  ;;  %v1428_v8 = vpop.f32.mrf.mxu3 }
 0x295   : > { %9153 = vst [vmem:[#allocation22_spill] sm:$0xff] %v7390_v60  ;;  %v1735_v12 = vpop.f32.mrf.mxu2  ;;  %v1429_v49 = vadd.f32 %v1428_v8, %v7335_v0  ;;  %v5920_v8 = vld [vmem:[%s9058_s3 + $0x14] sm:$0xf0] }
 0x296   : > { %v1736_v34 = vadd.f32 %v1735_v12, %v1647_v13  ;;  %v1648_v45 = vpop.f32.mrf.mxu1  ;;  %v9182_v60 = vld [vmem:[#allocation8_spill] sm:$0xff] }
 0x297   : > { %v1649_v19 = vadd.f32 %v1648_v45, %v6998_v63  ;;  %v1518_v57 = vadd.f32 %v7049_v53, %v1429_v49  ;;  %v5246_v53 = vld [vmem:[%s9058_s3 + $0x8] sm:$0xf] }
 0x298   : > { %v2205_v5 = vmax.f32 %v1736_v34, 0.0  ;;  %v5247_v45 = vor.u32 %v5920_v8, %v5246_v53 }
 0x299   : > { %v2140_v13 = vmax.f32 %v1518_v57, 0.0 }
 0x29a   : > { %1767 = vmatpush.bf16.msra.mxu3 %v5247_v45 }
 0x29c   : > { %v1430_v38 = vpop.f32.mrf.mxu3 }
 0x29d   : > { %v1431_v47 = vadd.f32 %v1430_v38, %v7335_v0  ;;  %v1737_v39 = vpop.f32.mrf.mxu2  ;;  %v7416_v38 = vpop.f32.mrf.mxu0 }
 0x29e   : > { %v1738_v58 = vadd.f32 %v1737_v39, %v1649_v19  ;;  %v1651_v25 = vpop.f32.mrf.mxu1 }
 0x29f   : > { %v1520_v4 = vadd.f32 %v7069_v26, %v1431_v47  ;;  %v1652_v53 = vadd.f32 %v1651_v25, %v6998_v63 }
 0x2a0   : > { %v2209_v28 = vmax.f32 %v1738_v58, 0.0 }
 0x2a1   : > { %v2144_v12 = vmax.f32 %v1520_v4, 0.0  ;;  %1472 = vmatmul.bf16.gmra.mxu3 %v7103_v37  ;;  %1966 = vmatmul.bf16.gmra.mxu1 %v6876_v59 }
 0x2a2   : > { %v7410_v49 = vpack.c.bf16 %v2209_v28, %v2205_v5 }
 0x2a3   : > { %1872 = vmatmul.bf16.gmra.mxu0 %v6770_v62  ;;  %2050 = vmatmul.bf16.gmra.mxu2 %v6770_v62  ;;  %v7414_v26 = vpack.c.bf16 %v2144_v12, %v2140_v13 }
 0x2a4   : > { %9154 = vst [vmem:[#allocation23_spill] sm:$0xff] %v7410_v49  ;;  %v1433_v34 = vpop.f32.mrf.mxu3 }
 0x2a5   : > { %9155 = vst [vmem:[#allocation24_spill] sm:$0xff] %v7414_v26  ;;  %v1434_v57 = vadd.f32 %v1433_v34, %v7335_v0 }
 0x2a6   : > { %v1653_v19 = vpop.f32.mrf.mxu1 }
 0x2a7   : > { %v1523_v39 = vadd.f32 %v7086_v52, %v1434_v57 }
 0x2a9   : > { %v2148_v62 = vmax.f32 %v1523_v39, 0.0 }
 0x2ac   : > { %v1435_v47 = vpop.f32.mrf.mxu3 }
 0x2ad   : > { %v1436_v58 = vadd.f32 %v1435_v47, %v7335_v0 }
 0x2ae   : > { %v1656_v28 = vpop.f32.mrf.mxu1 }
 0x2af   : > { %v1525_v4 = vadd.f32 %v7098_v32, %v1436_v58  ;;  %v1654_v58 = vadd.f32 %v1653_v19, %v6998_v63 }
 0x2b0   : > { %v7422_v5 = vpop.f32.mrf.mxu0 }
 0x2b1   : > { %v2152_v13 = vmax.f32 %v1525_v4, 0.0  ;;  %1477 = vmatmul.bf16.gmra.mxu3 %v7155_v14  ;;  %1971 = vmatmul.bf16.gmra.mxu1 %v6906_v16 }
 0x2b3   : > { %1877 = vmatmul.bf16.gmra.mxu0 %v6792_v24  ;;  %2055 = vmatmul.bf16.gmra.mxu2 %v6792_v24  ;;  %v7428_v12 = vpack.c.bf16 %v2152_v13, %v2148_v62 }
 0x2b4   : > { %v1438_v52 = vpop.f32.mrf.mxu3 }
 0x2b5   : > { %9156 = vst [vmem:[#allocation25_spill] sm:$0xff] %v7428_v12  ;;  %v1439_v34 = vadd.f32 %v1438_v52, %v7335_v0 }
 0x2b6   : > { %v1658_v8 = vpop.f32.mrf.mxu1  ;;  %v1740_v45 = vpop.f32.mrf.mxu2 }
 0x2b7   : > { %v1741_v32 = vadd.f32 %v1740_v45, %v1652_v53  ;;  %v1528_v47 = vadd.f32 %v7128_v50, %v1439_v34  ;;  %v5551_v50 = vld [vmem:[#allocation2 + $0x70] sm:$0xf]  ;;  %v5996_v45 = vld [vmem:[#allocation2 + $0x74] sm:$0xf0] }
 0x2b8   : > { %v7432_v57 = vpop.f32.mrf.mxu0  ;;  %v5552_v19 = vor.u32 %v5996_v45, %v5551_v50  ;;  %v6012_v50 = vld [vmem:[#allocation2 + $0xf4] sm:$0xf0] }
 0x2b9   : > { %v2156_v25 = vmax.f32 %v1528_v47, 0.0  ;;  %v2213_v12 = vmax.f32 %v1741_v32, 0.0  ;;  %v1657_v47 = vadd.f32 %v1656_v28, %v6998_v63 }
 0x2ba   : > { %2699 = vmatpush.bf16.msrb.mxu3 %v5552_v19 }
 0x2bc   : > { %v1440_v39 = vpop.f32.mrf.mxu3 }
 0x2bd   : > { %v1441_v4 = vadd.f32 %v1440_v39, %v7335_v0 }
 0x2be   : > { %v1661_v24 = vpop.f32.mrf.mxu1  ;;  %v1742_v62 = vpop.f32.mrf.mxu2 }
 0x2bf   : > { %v1530_v13 = vadd.f32 %v7157_v55, %v1441_v4  ;;  %v1743_v49 = vadd.f32 %v1742_v62, %v1654_v58 }
 0x2c0   : > { %v7438_v26 = vpop.f32.mrf.mxu0 }
 0x2c1   : > { %v2160_v53 = vmax.f32 %v1530_v13, 0.0  ;;  %v2217_v52 = vmax.f32 %v1743_v49, 0.0  ;;  %1482 = vmatmul.bf16.gmra.mxu3 %v7225_v18  ;;  %1976 = vmatmul.bf16.gmra.mxu1 %v6936_v46  ;;  %v5615_v13 = vld [vmem:[#allocation2 + $0xf0] sm:$0xf] }
 0x2c2   : > { %v5616_v45 = vor.u32 %v6012_v50, %v5615_v13 }
 0x2c3   : > { %1882 = vmatmul.bf16.gmra.mxu0 %v6814_v22  ;;  %2060 = vmatmul.bf16.gmra.mxu2 %v6814_v22  ;;  %v7444_v34 = vpack.c.bf16 %v2160_v53, %v2156_v25  ;;  %v7446_v55 = vpack.c.bf16 %v2217_v52, %v2213_v12  ;;  %v1659_v22 = vadd.f32 %v1658_v8, %v6998_v63 }
 0x2c4   : > { %v1443_v32 = vpop.f32.mrf.mxu3  ;;  %2788 = vmatpush.bf16.msrb.mxu0 %v5616_v45  ;;  %v1662_v8 = vadd.f32 %v1661_v24, %v6998_v63 }
 0x2c5   : > { %9157 = vst [vmem:[#allocation26_spill] sm:$0xff] %v7444_v34  ;;  %v1444_v62 = vadd.f32 %v1443_v32, %v7335_v0 }
 0x2c6   : > { %9158 = vst [vmem:[#allocation27_spill] sm:$0xff] %v7446_v55  ;;  %v1663_v49 = vpop.f32.mrf.mxu1  ;;  %v1745_v39 = vpop.f32.mrf.mxu2 }
 0x2c7   : > { %v1746_v58 = vadd.f32 %v1745_v39, %v1657_v47  ;;  %v1533_v12 = vadd.f32 %v7202_v20, %v1444_v62 }
 0x2c8   : > { %v7449_v4 = vpop.f32.mrf.mxu0 }
 0x2c9   : > { %v2164_v39 = vmax.f32 %v1533_v12, 0.0  ;;  %v2221_v32 = vmax.f32 %v1746_v58, 0.0  ;;  %v1664_v12 = vadd.f32 %v1663_v49, %v6998_v63  ;;  %v5994_v49 = vld [vmem:[#allocation2 + $0x64] sm:$0xf0] }
 0x2cc   : > { %v1445_v29 = vpop.f32.mrf.mxu3 }
 0x2cd   : > { %v1446_v25 = vadd.f32 %v1445_v29, %v7335_v0 }
 0x2ce   : > { %v1666_v53 = vpop.f32.mrf.mxu1  ;;  %v1747_v28 = vpop.f32.mrf.mxu2 }
 0x2cf   : > { %v1535_v52 = vadd.f32 %v7253_v43, %v1446_v25  ;;  %v1748_v19 = vadd.f32 %v1747_v28, %v1659_v22 }
 0x2d0   : > { %v7456_v47 = vpop.f32.mrf.mxu0 }
 0x2d1   : > { %v2168_v55 = vmax.f32 %v1535_v52, 0.0  ;;  %v2225_v34 = vmax.f32 %v1748_v19, 0.0  ;;  %1487 = vmatmul.bf16.gmra.mxu3 %v7298_v41  ;;  %1981 = vmatmul.bf16.gmra.mxu1 %v6970_v1 }
 0x2d3   : > { %1887 = vmatmul.bf16.gmra.mxu0 %v6848_v6  ;;  %2065 = vmatmul.bf16.gmra.mxu2 %v6848_v6  ;;  %v7462_v20 = vpack.c.bf16 %v2168_v55, %v2164_v39  ;;  %v7464_v29 = vpack.c.bf16 %v2225_v34, %v2221_v32 }
 0x2d4   : > { %v1448_v43 = vpop.f32.mrf.mxu3 }
 0x2d5   : > { %9159 = vst [vmem:[#allocation28_spill] sm:$0xff] %v7462_v20  ;;  %v1449_v45 = vadd.f32 %v1448_v43, %v7335_v0  ;;  %v6016_v20 = vld [vmem:[#allocation2 + $0x114] sm:$0xf0] }
 0x2d6   : > { %9160 = vst [vmem:[#allocation29_spill] sm:$0xff] %v7464_v29  ;;  %v1668_v62 = vpop.f32.mrf.mxu1  ;;  %v1750_v13 = vpop.f32.mrf.mxu2 }
 0x2d7   : > { %v1751_v58 = vadd.f32 %v1750_v13, %v1662_v8  ;;  %v1538_v25 = vadd.f32 %v7287_v61, %v1449_v45  ;;  %v5543_v61 = vld [vmem:[#allocation2 + $0x60] sm:$0xf] }
 0x2d8   : > { %v7467_v50 = vpop.f32.mrf.mxu0  ;;  %v5544_v45 = vor.u32 %v5994_v49, %v5543_v61 }
 0x2d9   : > { %v2172_v19 = vmax.f32 %v1538_v25, 0.0  ;;  %v2229_v39 = vmax.f32 %v1751_v58, 0.0  ;;  %v1667_v58 = vadd.f32 %v1666_v53, %v6998_v63 }
 0x2da   : > { %2700 = vmatpush.bf16.msrb.mxu3 %v5544_v45 }
 0x2dc   : > { %v1450_v22 = vpop.f32.mrf.mxu3 }
 0x2dd   : > { %v1451_v6 = vadd.f32 %v1450_v22, %v7335_v0 }
 0x2de   : > { %v1752_v55 = vpop.f32.mrf.mxu2  ;;  %v1947_v34 = vpop.f32.mrf.mxu1 }
 0x2df   : > { %v1540_v28 = vadd.f32 %v7312_v31, %v1451_v6  ;;  %v1753_v52 = vadd.f32 %v1752_v55, %v1664_v12  ;;  %v5607_v55 = vld [vmem:[#allocation2 + $0xe0] sm:$0xf] }
 0x2e0   : > { %v7474_v24 = vpop.f32.mrf.mxu0 }
 0x2e1   : > { %v2176_v32 = vmax.f32 %v1540_v28, 0.0  ;;  %v2233_v8 = vmax.f32 %v1753_v52, 0.0  ;;  %1768 = vmatmul.bf16.vlgmr.msra.gmra.mxu3 %v6766_v11  ;;  %1986 = vmatmul.bf16.gmra.mxu1 %v6993_v27 }
 0x2e3   : > { %1892 = vmatmul.bf16.gmra.mxu0 %v6878_v48  ;;  %2070 = vmatmul.bf16.gmra.mxu2 %v6878_v48  ;;  %v7480_v43 = vpack.c.bf16 %v2176_v32, %v2172_v19  ;;  %v7482_v31 = vpack.c.bf16 %v2233_v8, %v2229_v39  ;;  %v6010_v48 = vld [vmem:[#allocation2 + $0xe4] sm:$0xf0]  ;;  %v1669_v19 = vadd.f32 %v1668_v62, %v6998_v63 }
 0x2e4   : > { %v1453_v13 = vpop.f32.mrf.mxu3  ;;  %v5608_v28 = vor.u32 %v6010_v48, %v5607_v55 }
 0x2e5   : > { %9161 = vst [vmem:[#allocation30_spill] sm:$0xff] %v7480_v43  ;;  %v1454_v6 = vadd.f32 %v1453_v13, %v7335_v0  ;;  %v7495_v13 = vld [vmem:[%s9064_s9 + $0x2] ss:$8 sm:$0xf] }
 0x2e6   : > { %9162 = vst [vmem:[#allocation31_spill] sm:$0xff] %v7482_v31  ;;  %v1755_v22 = vpop.f32.mrf.mxu2  ;;  %v1949_v12 = vpop.f32.mrf.mxu1  ;;  %2789 = vmatpush.bf16.msrb.mxu0 %v5608_v28  ;;  %v7498_v45 = vperm.slane %v7495_v13, 3  ;;  %v6004_v43 = vld [vmem:[#allocation2 + $0xb4] sm:$0xf0] }
 0x2e7   : > { %v1756_v11 = vadd.f32 %v1755_v22, %v1667_v58  ;;  %v1543_v39 = vadd.f32 %v7327_v54, %v1454_v6 }
 0x2e8   : > { %v7485_v25 = vpop.f32.mrf.mxu0  ;;  %v1948_v48 = vadd.f32 %v1947_v34, %v7498_v45 }
 0x2e9   : > { %v2180_v63 = vmax.f32 %v1543_v39, 0.0  ;;  %v2237_v62 = vmax.f32 %v1756_v11, 0.0 }
 0x2ec   : > { %v1455_v52 = vpop.f32.mrf.mxu3 }
 0x2ed   : > { %v1456_v32 = vadd.f32 %v1455_v52, %v7335_v0 }
 0x2ee   : > { %v1757_v53 = vpop.f32.mrf.mxu2  ;;  %v1952_v8 = vpop.f32.mrf.mxu1 }
 0x2ef   : > { %v1545_v61 = vadd.f32 %v7338_v9, %v1456_v32  ;;  %v1758_v49 = vadd.f32 %v1757_v53, %v1669_v19  ;;  %v1950_v53 = vadd.f32 %v1949_v12, %v7498_v45 }
 0x2f0   : > { %v7500_v58 = vpop.f32.mrf.mxu0 }
 0x2f1   : > { %v2184_v54 = vmax.f32 %v1545_v61, 0.0  ;;  %v2241_v22 = vmax.f32 %v1758_v49, 0.0  ;;  %1773 = vmatmul.bf16.gmra.mxu3 %v6788_v17  ;;  %1991 = vmatmul.bf16.gmra.mxu1 %v7030_v7 }
 0x2f3   : > { %1897 = vmatmul.bf16.gmra.mxu0 %v6908_v3  ;;  %2075 = vmatmul.bf16.gmra.mxu2 %v6908_v3  ;;  %v7506_v9 = vpack.c.bf16 %v2184_v54, %v2180_v63  ;;  %v7508_v6 = vpack.c.bf16 %v2241_v22, %v2237_v62 }
 0x2f4   : > { %v1458_v55 = vpop.f32.mrf.mxu3 }
 0x2f5   : > { %9163 = vst [vmem:[#allocation32_spill] sm:$0xff] %v7506_v9  ;;  %v1459_v19 = vadd.f32 %v1458_v55, %v7335_v0 }
 0x2f6   : > { %9164 = vst [vmem:[#allocation33_spill] sm:$0xff] %v7508_v6  ;;  %v1954_v28 = vpop.f32.mrf.mxu1  ;;  %v2036_v52 = vpop.f32.mrf.mxu2 }
 0x2f7   : > { %v2037_v11 = vadd.f32 %v2036_v52, %v1948_v48  ;;  %v1548_v17 = vadd.f32 %v7353_v40, %v1459_v19  ;;  %v5535_v40 = vld [vmem:[#allocation2 + $0x50] sm:$0xf]  ;;  %v5992_v52 = vld [vmem:[#allocation2 + $0x54] sm:$0xf0] }
 0x2f8   : > { %v7512_v39 = vpop.f32.mrf.mxu0  ;;  %v5536_v12 = vor.u32 %v5992_v52, %v5535_v40 }
 0x2f9   : > { %v2188_v34 = vmax.f32 %v1548_v17, 0.0  ;;  %v2119_v54 = vmax.f32 %v2037_v11, 0.0  ;;  %v1953_v17 = vadd.f32 %v1952_v8, %v7498_v45 }
 0x2fa   : > { %2701 = vmatpush.bf16.msrb.mxu3 %v5536_v12 }
 0x2fc   : > { %v1460_v32 = vpop.f32.mrf.mxu3 }
 0x2fd   : > { %v1461_v3 = vadd.f32 %v1460_v32, %v7335_v0 }
 0x2fe   : > { %v1957_v61 = vpop.f32.mrf.mxu1  ;;  %v2038_v49 = vpop.f32.mrf.mxu2 }
 0x2ff   : > { %v1550_v63 = vadd.f32 %v7360_v15, %v1461_v3  ;;  %v2039_v62 = vadd.f32 %v2038_v49, %v1950_v53 }
 0x300   : > { %v7518_v22 = vpop.f32.mrf.mxu0 }
 0x301   : > { %v2192_v48 = vmax.f32 %v1550_v63, 0.0  ;;  %v2123_v55 = vmax.f32 %v2039_v62, 0.0  ;;  %1778 = vmatmul.bf16.gmra.mxu3 %v6810_v23  ;;  %1996 = vmatmul.bf16.gmra.mxu1 %v7051_v10  ;;  %v5599_v63 = vld [vmem:[#allocation2 + $0xd0] sm:$0xf]  ;;  %v6008_v62 = vld [vmem:[#allocation2 + $0xd4] sm:$0xf0] }
 0x303   : > { %v7522_v19 = vpack.c.bf16 %v2123_v55, %v2119_v54  ;;  %1902 = vmatmul.bf16.gmra.mxu0 %v6938_v35  ;;  %2080 = vmatmul.bf16.gmra.mxu2 %v6938_v35  ;;  %v7526_v15 = vpack.c.bf16 %v2192_v48, %v2188_v34  ;;  %v5600_v54 = vor.u32 %v6008_v62, %v5599_v63 }
 0x304   : > { %v1463_v11 = vpop.f32.mrf.mxu3  ;;  %v1955_v35 = vadd.f32 %v1954_v28, %v7498_v45  ;;  %v9167_v28 = vld [vmem:[#allocation5_spill] sm:$0xff]  ;;  %v1958_v63 = vadd.f32 %v1957_v61, %v7498_v45 }
 0x305   : > { %9165 = vst [vmem:[#allocation34_spill] sm:$0xff] %v7522_v19  ;;  %v1464_v49 = vadd.f32 %v1463_v11, %v7335_v0  ;;  %2790 = vmatpush.bf16.msrb.mxu0 %v5600_v54 }
 0x306   : > { %9166 = vst [vmem:[#allocation35_spill] sm:$0xff] %v7526_v15  ;;  %v1959_v32 = vpop.f32.mrf.mxu1  ;;  %v2041_v53 = vpop.f32.mrf.mxu2 }
 0x307   : > { %v2042_v23 = vadd.f32 %v2041_v53, %v1953_v17  ;;  %v1553_v34 = vadd.f32 %v7378_v21, %v1464_v49 }
 0x308   : > { %v7529_v3 = vpop.f32.mrf.mxu0 }
 0x309   : > { %v2196_v53 = vmax.f32 %v1553_v34, 0.0  ;;  %v2127_v11 = vmax.f32 %v2042_v23, 0.0 }
 0x30c   : > { %v1465_v55 = vpop.f32.mrf.mxu3 }
 0x30d   : > { %v1466_v48 = vadd.f32 %v1465_v55, %v7335_v0 }
 0x30e   : > { %v1962_v40 = vpop.f32.mrf.mxu1  ;;  %v2043_v8 = vpop.f32.mrf.mxu2 }
 0x30f   : > { %v1555_v52 = vadd.f32 %v7392_v2, %v1466_v48  ;;  %v2044_v12 = vadd.f32 %v2043_v8, %v1955_v35  ;;  %v1960_v48 = vadd.f32 %v1959_v32, %v7498_v45  ;;  %v5990_v32 = vld [vmem:[#allocation2 + $0x44] sm:$0xf0] }
 0x310   : > { %v7536_v17 = vpop.f32.mrf.mxu0 }
 0x311   : > { %v2200_v15 = vmax.f32 %v1555_v52, 0.0  ;;  %v2131_v6 = vmax.f32 %v2044_v12, 0.0  ;;  %1783 = vmatmul.bf16.gmra.mxu3 %v6844_v33  ;;  %2001 = vmatmul.bf16.gmra.mxu1 %v7082_v56 }
 0x313   : > { %1907 = vmatmul.bf16.gmra.mxu0 %v9167_v28  ;;  %2085 = vmatmul.bf16.gmra.mxu2 %v9167_v28  ;;  %v7542_v21 = vpack.c.bf16 %v2131_v6, %v2127_v11  ;;  %v7544_v49 = vpack.c.bf16 %v2200_v15, %v2196_v53 }
 0x314   : > { %v1468_v2 = vpop.f32.mrf.mxu3 }
 0x315   : > { %9168 = vst [vmem:[#allocation5_spill] sm:$0xff] %v7542_v21  ;;  %v1469_v55 = vadd.f32 %v1468_v2, %v7335_v0 }
 0x316   : > { %9169 = vst [vmem:[#allocation36_spill] sm:$0xff] %v7544_v49  ;;  %v1964_v62 = vpop.f32.mrf.mxu1  ;;  %v2046_v54 = vpop.f32.mrf.mxu2 }
 0x317   : > { %v2047_v23 = vadd.f32 %v2046_v54, %v1958_v63  ;;  %v1558_v33 = vadd.f32 %v7399_v44, %v1469_v55  ;;  %v5527_v44 = vld [vmem:[#allocation2 + $0x40] sm:$0xf]  ;;  %v9170_v54 = vld [vmem:[#allocation6_spill] sm:$0xff] }
 0x318   : > { %v7548_v35 = vpop.f32.mrf.mxu0  ;;  %v5528_v63 = vor.u32 %v5990_v32, %v5527_v44 }
 0x319   : > { %v2204_v12 = vmax.f32 %v1558_v33, 0.0  ;;  %v2135_v53 = vmax.f32 %v2047_v23, 0.0  ;;  %v1963_v33 = vadd.f32 %v1962_v40, %v7498_v45 }
 0x31a   : > { %2702 = vmatpush.bf16.msrb.mxu3 %v5528_v63 }
 0x31c   : > { %v1470_v34 = vpop.f32.mrf.mxu3 }
 0x31d   : > { %v1471_v6 = vadd.f32 %v1470_v34, %v7335_v0 }
 0x31e   : > { %v7553_v8 = vpop.f32.mrf.mxu1  ;;  %v2048_v15 = vpop.f32.mrf.mxu2 }
 0x31f   : > { %v1560_v52 = vadd.f32 %v7416_v38, %v1471_v6  ;;  %v2049_v61 = vadd.f32 %v2048_v15, %v1960_v48 }
 0x320   : > { %v7556_v11 = vpop.f32.mrf.mxu0 }
 0x321   : > { %v2208_v28 = vmax.f32 %v1560_v52, 0.0  ;;  %v2139_v2 = vmax.f32 %v2049_v61, 0.0  ;;  %1788 = vmatmul.bf16.gmra.mxu3 %v6876_v59  ;;  %2006 = vmatmul.bf16.gmra.mxu1 %v7103_v37  ;;  %v5591_v52 = vld [vmem:[#allocation2 + $0xc0] sm:$0xf]  ;;  %v6006_v61 = vld [vmem:[#allocation2 + $0xc4] sm:$0xf0] }
 0x322   : > { %v5592_v44 = vor.u32 %v6006_v61, %v5591_v52 }
 0x323   : > { %1912 = vmatmul.bf16.gmra.mxu0 %v9170_v54  ;;  %2090 = vmatmul.bf16.gmra.mxu2 %v9170_v54  ;;  %v7562_v55 = vpack.c.bf16 %v2139_v2, %v2135_v53  ;;  %v7564_v38 = vpack.c.bf16 %v2208_v28, %v2204_v12  ;;  %v1965_v12 = vadd.f32 %v1964_v62, %v7498_v45  ;;  %v5743_v62 = vld [vmem:[#allocation2 + $0x1f0] sm:$0xf] }
 0x324   : > { %v1473_v23 = vpop.f32.mrf.mxu3  ;;  %2791 = vmatpush.bf16.msrb.mxu0 %v5592_v44 }
 0x325   : > { %9171 = vst [vmem:[#allocation6_spill] sm:$0xff] %v7562_v55  ;;  %v1474_v15 = vadd.f32 %v1473_v23, %v7335_v0 }
 0x326   : > { %9172 = vst [vmem:[#allocation37_spill] sm:$0xff] %v7564_v38  ;;  %v7567_v34 = vpop.f32.mrf.mxu1  ;;  %v2051_v59 = vpop.f32.mrf.mxu2 }
 0x327   : > { %v2052_v48 = vadd.f32 %v2051_v59, %v1963_v33  ;;  %v1563_v53 = vadd.f32 %v7422_v5, %v1474_v15  ;;  %v6044_v5 = vld [vmem:[#allocation2 + $0x1f4] sm:$0xf0]  ;;  %v9173_v15 = vld [vmem:[#allocation11_spill] sm:$0xff] }
 0x328   : > { %v7569_v6 = vpop.f32.mrf.mxu0  ;;  %v5744_v61 = vor.u32 %v6044_v5, %v5743_v62  ;;  %v5671_v62 = vld [vmem:[#allocation2 + $0x160] sm:$0xf]  ;;  %v6040_v5 = vld [vmem:[#allocation2 + $0x1d4] sm:$0xf0] }
 0x329   : > { %v2212_v23 = vmax.f32 %v1563_v53, 0.0  ;;  %v2143_v59 = vmax.f32 %v2052_v48, 0.0  ;;  %v6028_v48 = vld [vmem:[#allocation2 + $0x174] sm:$0xf0] }
 0x32a   : > { %2966 = vmatpush.bf16.msrb.mxu2 %v5744_v61 }
 0x32c   : > { %v1475_v32 = vpop.f32.mrf.mxu3 }
 0x32d   : > { %v1476_v28 = vadd.f32 %v1475_v32, %v7335_v0 }
 0x32e   : > { %v7575_v40 = vpop.f32.mrf.mxu1  ;;  %v2053_v2 = vpop.f32.mrf.mxu2 }
 0x32f   : > { %v1565_v63 = vadd.f32 %v7432_v57, %v1476_v28  ;;  %v2054_v54 = vadd.f32 %v2053_v2, %v1965_v12  ;;  %v5679_v12 = vld [vmem:[#allocation2 + $0x170] sm:$0xf]  ;;  %v5735_v2 = vld [vmem:[#allocation2 + $0x1e0] sm:$0xf] }
 0x330   : > { %v7578_v33 = vpop.f32.mrf.mxu0  ;;  %v5680_v53 = vor.u32 %v6028_v48, %v5679_v12  ;;  %v5663_v12 = vld [vmem:[#allocation2 + $0x150] sm:$0xf]  ;;  %v6024_v48 = vld [vmem:[#allocation2 + $0x154] sm:$0xf0] }
 0x331   : > { %v2216_v38 = vmax.f32 %v1565_v63, 0.0  ;;  %v2147_v52 = vmax.f32 %v2054_v54, 0.0  ;;  %1793 = vmatmul.bf16.gmra.mxu3 %v6906_v16  ;;  %2011 = vmatmul.bf16.gmra.mxu1 %v7155_v14  ;;  %v6042_v63 = vld [vmem:[#allocation2 + $0x1e4] sm:$0xf0] }
 0x332   : > { %2877 = vmatpush.bf16.msrb.mxu1 %v5680_v53  ;;  %v5736_v54 = vor.u32 %v6042_v63, %v5735_v2  ;;  %v5664_v2 = vor.u32 %v6024_v48, %v5663_v12  ;;  %v5583_v48 = vld [vmem:[#allocation2 + $0xb0] sm:$0xf] }
 0x333   : > { %1917 = vmatmul.bf16.gmra.mxu0 %v9173_v15  ;;  %2095 = vmatmul.bf16.gmra.mxu2 %v9173_v15  ;;  %v7584_v44 = vpack.c.bf16 %v2147_v52, %v2143_v59  ;;  %v7586_v57 = vpack.c.bf16 %v2216_v38, %v2212_v23  ;;  %v6026_v59 = vld [vmem:[#allocation2 + $0x164] sm:$0xf0]  ;;  %v5727_v52 = vld [vmem:[#allocation2 + $0x1d0] sm:$0xf] }
 0x334   : > { %v1478_v32 = vpop.f32.mrf.mxu3  ;;  %2967 = vmatpush.bf16.msrb.mxu2 %v5736_v54  ;;  %v5672_v23 = vor.u32 %v6026_v59, %v5671_v62  ;;  %v5728_v15 = vor.u32 %v6040_v5, %v5727_v52  ;;  %v6038_v54 = vld [vmem:[#allocation2 + $0x1c4] sm:$0xf0]  ;;  %v5655_v52 = vld [vmem:[#allocation2 + $0x140] sm:$0xf] }
 0x335   : > { %9174 = vst [vmem:[#allocation11_spill] sm:$0xff] %v7584_v44  ;;  %v1479_v38 = vadd.f32 %v1478_v32, %v7335_v0  ;;  %v5719_v32 = vld [vmem:[#allocation2 + $0x1c0] sm:$0xf]  ;;  %v6022_v5 = vld [vmem:[#allocation2 + $0x144] sm:$0xf0] }
 0x336   : > { %9175 = vst [vmem:[#allocation38_spill] sm:$0xff] %v7586_v57  ;;  %v7588_v28 = vpop.f32.mrf.mxu1  ;;  %v7590_v16 = vpop.f32.mrf.mxu2  ;;  %2878 = vmatpush.bf16.msrb.mxu1 %v5672_v23  ;;  %v5720_v59 = vor.u32 %v6038_v54, %v5719_v32  ;;  %v5647_v54 = vld [vmem:[#allocation2 + $0x130] sm:$0xf] }
 0x337   : > { %v1568_v57 = vadd.f32 %v7438_v26, %v1479_v38  ;;  %v5519_v38 = vld [vmem:[#allocation2 + $0x30] sm:$0xf] }
 0x338   : > { %v7592_v49 = vpop.f32.mrf.mxu0  ;;  %2968 = vmatpush.bf16.msrb.mxu2 %v5728_v15  ;;  %v5988_v15 = vld [vmem:[#allocation2 + $0x34] sm:$0xf0] }
 0x339   : > { %v2220_v31 = vmax.f32 %v1568_v57, 0.0  ;;  %v5520_v12 = vor.u32 %v5988_v15, %v5519_v38  ;;  %v5575_v38 = vld [vmem:[#allocation2 + $0xa0] sm:$0xf]  ;;  %v6002_v15 = vld [vmem:[#allocation2 + $0xa4] sm:$0xf0] }
 0x33a   : > { %2879 = vmatpush.bf16.msrb.mxu1 %v5664_v2  ;;  %v6036_v2 = vld [vmem:[#allocation2 + $0x1b4] sm:$0xf0] }
 0x33b   : > { %2703 = vmatpush.bf16.msrb.mxu3 %v5520_v12  ;;  %v6018_v12 = vld [vmem:[#allocation2 + $0x124] sm:$0xf0] }
 0x33c   : > { %v1480_v61 = vpop.f32.mrf.mxu3  ;;  %2969 = vmatpush.bf16.msrb.mxu2 %v5720_v59 }
 0x33d   : > { %v1481_v53 = vadd.f32 %v1480_v61, %v7335_v0  ;;  %v5656_v61 = vor.u32 %v6022_v5, %v5655_v52 }
 0x33e   : > { %v7597_v63 = vpop.f32.mrf.mxu1  ;;  %v7599_v9 = vpop.f32.mrf.mxu2 }
 0x33f   : > { %v1570_v62 = vadd.f32 %v7449_v4, %v1481_v53  ;;  %v5711_v4 = vld [vmem:[#allocation2 + $0x1b0] sm:$0xf]  ;;  %v5584_v53 = vor.u32 %v6004_v43, %v5583_v48  ;;  %2880 = vmatpush.bf16.msrb.mxu1 %v5656_v61  ;;  %v5576_v43 = vor.u32 %v6002_v15, %v5575_v38  ;;  %v6034_v48 = vld [vmem:[#allocation2 + $0x1a4] sm:$0xf0]  ;;  %v5639_v61 = vld [vmem:[#allocation2 + $0x120] sm:$0xf] }
 0x340   : > { %v7602_v23 = vpop.f32.mrf.mxu0  ;;  %v5631_v15 = vld [vmem:[#allocation2 + $0x110] sm:$0xf] }
 0x341   : > { %v2224_v26 = vmax.f32 %v1570_v62, 0.0  ;;  %1798 = vmatmul.bf16.gmra.mxu3 %v6936_v46  ;;  %2016 = vmatmul.bf16.gmra.mxu1 %v7225_v18  ;;  %v5712_v46 = vor.u32 %v6036_v2, %v5711_v4  ;;  %v6020_v62 = vld [vmem:[#allocation2 + $0x134] sm:$0xf0]  ;;  %v5567_v2 = vld [vmem:[#allocation2 + $0x90] sm:$0xf] }
 0x342   : > { %2792 = vmatpush.bf16.msrb.mxu0 %v5584_v53  ;;  %v5648_v59 = vor.u32 %v6020_v62, %v5647_v54  ;;  %v5640_v53 = vor.u32 %v6018_v12, %v5639_v61  ;;  %v6000_v54 = vld [vmem:[#allocation2 + $0x94] sm:$0xf0]  ;;  %v5695_v62 = vld [vmem:[#allocation2 + $0x190] sm:$0xf]  ;;  %v5998_v61 = vld [vmem:[#allocation2 + $0x84] sm:$0xf0] }
 0x343   : > { %1922 = vmatmul.bf16.gmra.mxu0 %v7227_v42  ;;  %2100 = vmatmul.bf16.gmra.mxu2 %v7227_v42  ;;  %v7608_v57 = vpack.c.bf16 %v2224_v26, %v2220_v31  ;;  %v5703_v42 = vld [vmem:[#allocation2 + $0x1a0] sm:$0xf] }
 0x344   : > { %v1483_v32 = vpop.f32.mrf.mxu3  ;;  %2970 = vmatpush.bf16.msrb.mxu2 %v5712_v46  ;;  %2881 = vmatpush.bf16.msrb.mxu1 %v5648_v59  ;;  %v5704_v26 = vor.u32 %v6034_v48, %v5703_v42  ;;  %v5568_v46 = vor.u32 %v6000_v54, %v5567_v2  ;;  %v5632_v48 = vor.u32 %v6016_v20, %v5631_v15  ;;  %v5687_v12 = vld [vmem:[#allocation2 + $0x180] sm:$0xf] }
 0x345   : > { %9176 = vst [vmem:[#allocation39_spill] sm:$0xff] %v7608_v57  ;;  %v1484_v4 = vadd.f32 %v1483_v32, %v7335_v0  ;;  %v6032_v57 = vld [vmem:[#allocation2 + $0x194] sm:$0xf0] }
 0x346   : > { %v7610_v52 = vpop.f32.mrf.mxu1  ;;  %v7612_v5 = vpop.f32.mrf.mxu2  ;;  %2793 = vmatpush.bf16.msrb.mxu0 %v5576_v43  ;;  %v5696_v38 = vor.u32 %v6032_v57, %v5695_v62  ;;  %v6030_v57 = vld [vmem:[#allocation2 + $0x184] sm:$0xf0] }
 0x347   : > { %v1573_v59 = vadd.f32 %v7456_v47, %v1484_v4  ;;  %v5688_v47 = vor.u32 %v6030_v57, %v5687_v12  ;;  %v5623_v4 = vld [vmem:[#allocation2 + $0x100] sm:$0xf] }
 0x348   : > { %v7614_v31 = vpop.f32.mrf.mxu0  ;;  %2971 = vmatpush.bf16.msrb.mxu2 %v5704_v26  ;;  %2882 = vmatpush.bf16.msrb.mxu1 %v5640_v53  ;;  %v5559_v26 = vld [vmem:[#allocation2 + $0x80] sm:$0xf] }
 0x349   : > { %v5560_v53 = vor.u32 %v5998_v61, %v5559_v26  ;;  %v2228_v62 = vmax.f32 %v1573_v59, 0.0 }
 0x34a   : > { %2794 = vmatpush.bf16.msrb.mxu0 %v5568_v46 }
 0x34c   : > { %v1485_v29 = vpop.f32.mrf.mxu3  ;;  %2972 = vmatpush.bf16.msrb.mxu2 %v5696_v38  ;;  %2883 = vmatpush.bf16.msrb.mxu1 %v5632_v48 }
 0x34d   : > { %v1486_v42 = vadd.f32 %v1485_v29, %v7335_v0  ;;  %v6014_v29 = vld [vmem:[#allocation2 + $0x104] sm:$0xf0] }
 0x34e   : > { %v7619_v32 = vpop.f32.mrf.mxu1  ;;  %v7621_v43 = vpop.f32.mrf.mxu2  ;;  %v5624_v46 = vor.u32 %v6014_v29, %v5623_v4  ;;  %2795 = vmatpush.bf16.msrb.mxu0 %v5560_v53  ;;  %v5511_v4 = vld [vmem:[#allocation2 + $0x20] sm:$0xf]  ;;  %v5986_v29 = vld [vmem:[#allocation2 + $0x24] sm:$0xf0] }
 0x34f   : > { %v1575_v2 = vadd.f32 %v7467_v50, %v1486_v42 }
 0x350   : > { %v7624_v54 = vpop.f32.mrf.mxu0  ;;  %2973 = vmatpush.bf16.msrb.mxu2 %v5688_v47  ;;  %2884 = vmatpush.bf16.msrb.mxu1 %v5624_v46  ;;  %v7654_v46 = vperm.slane %v7495_v13, 2 }
 0x351   : > { %v2232_v20 = vmax.f32 %v1575_v2, 0.0  ;;  %1803 = vmatmul.bf16.gmra.mxu3 %v6970_v1  ;;  %2021 = vmatmul.bf16.gmra.mxu1 %v7298_v41 }
 0x353   : > { %1927 = vmatmul.bf16.gmra.mxu0 %v7303_v30  ;;  %2105 = vmatmul.bf16.gmra.mxu2 %v7303_v30  ;;  %v7630_v50 = vpack.c.bf16 %v2232_v20, %v2228_v62  ;;  %v5512_v62 = vor.u32 %v5986_v29, %v5511_v4  ;;  %v9178_v20 = vld [vmem:[#allocation15_spill] sm:$0xff] }
 0x354   : > { %v1488_v38 = vpop.f32.mrf.mxu3 }
 0x355   : > { %9177 = vst [vmem:[#allocation40_spill] sm:$0xff] %v7630_v50  ;;  %v1489_v1 = vadd.f32 %v1488_v38, %v7335_v0  ;;  %2704 = vmatpush.bf16.msrb.mxu3 %v5512_v62 }
 0x356   : > { %v7632_v15 = vpop.f32.mrf.mxu1  ;;  %v7634_v42 = vpop.f32.mrf.mxu2 }
 0x357   : > { %v1578_v26 = vadd.f32 %v7474_v24, %v1489_v1 }
 0x358   : > { %v7636_v59 = vpop.f32.mrf.mxu0 }
 0x359   : > { %v2236_v57 = vmax.f32 %v1578_v26, 0.0 }
 0x35c   : > { %v1490_v48 = vpop.f32.mrf.mxu3 }
 0x35d   : > { %v1491_v61 = vadd.f32 %v1490_v48, %v7335_v0 }
 0x35e   : > { %v7641_v12 = vpop.f32.mrf.mxu1  ;;  %v7643_v30 = vpop.f32.mrf.mxu2 }
 0x35f   : > { %v1580_v2 = vadd.f32 %v7485_v25, %v1491_v61 }
 0x360   : > { %v7646_v53 = vpop.f32.mrf.mxu0 }
 0x361   : > { %v2240_v47 = vmax.f32 %v1580_v2, 0.0  ;;  %1808 = vmatmul.bf16.gmra.mxu3 %v6993_v27 }
 0x363   : > { %1932 = vmatmul.bf16.gmra.mxu0 %v9178_v20  ;;  %2110 = vmatmul.bf16.gmra.mxu2 %v9178_v20  ;;  %v7651_v0 = vpack.c.bf16 %v2240_v47, %v2236_v57  ;;  %v9181_v20 = vld [vmem:[#allocation7_spill] sm:$0xff] }
 0x364   : > { %v1769_v24 = vpop.f32.mrf.mxu3 }
 0x365   : > { %9179 = vst [vmem:[#allocation15_spill] sm:$0xff] %v7651_v0  ;;  %v1770_v27 = vadd.f32 %v1769_v24, %v7654_v46 }
 0x366   : > { %v7656_v25 = vpop.f32.mrf.mxu1  ;;  %v7658_v38 = vpop.f32.mrf.mxu2 }
 0x367   : > { %v1859_v26 = vadd.f32 %v7500_v58, %v1770_v27 }
 0x368   : > { %v7660_v1 = vpop.f32.mrf.mxu0 }
 0x369   : > { %v2118_v4 = vmax.f32 %v1859_v26, 0.0 }
 0x36c   : > { %v1771_v48 = vpop.f32.mrf.mxu3 }
 0x36d   : > { %v1772_v61 = vadd.f32 %v1771_v48, %v7654_v46 }
 0x36e   : > { %v7665_v2 = vpop.f32.mrf.mxu1  ;;  %v7667_v57 = vpop.f32.mrf.mxu2 }
 0x36f   : > { %v1861_v13 = vadd.f32 %v7512_v39, %v1772_v61 }
 0x370   : > { %v7670_v47 = vpop.f32.mrf.mxu0 }
 0x371   : > { %v2122_v29 = vmax.f32 %v1861_v13, 0.0  ;;  %1813 = vmatmul.bf16.gmra.mxu3 %v7030_v7 }
 0x373   : > { %v7673_v62 = vpack.c.bf16 %v2122_v29, %v2118_v4  ;;  %2796 = vmatmul.bf16.vlgmr.msrb.gmra.mxu0 %v9181_v20  ;;  %2974 = vmatmul.bf16.vlgmr.msrb.gmra.mxu2 %v7522_v19  ;;  %v5503_v19 = vld [vmem:[#allocation2 + $0x10] sm:$0xf]  ;;  %v5984_v20 = vld [vmem:[#allocation2 + $0x14] sm:$0xf0] }
 0x374   : > { %v1774_v58 = vpop.f32.mrf.mxu3 }
 0x375   : > { %9180 = vst [vmem:[#allocation41_spill] sm:$0xff] %v7673_v62  ;;  %2885 = vmatmul.bf16.vlgmr.msrb.gmra.mxu1 %v7673_v62  ;;  %v1775_v48 = vadd.f32 %v1774_v58, %v7654_v46  ;;  %v5504_v58 = vor.u32 %v5984_v20, %v5503_v19 }
 0x376   : > { %v7678_v24 = vpop.f32.mrf.mxu1  ;;  %v7680_v27 = vpop.f32.mrf.mxu2 }
 0x377   : > { %v1864_v7 = vadd.f32 %v7518_v22, %v1775_v48  ;;  %2705 = vmatpush.bf16.msrb.mxu3 %v5504_v58 }
 0x378   : > { %v7682_v39 = vpop.f32.mrf.mxu0 }
 0x379   : > { %v2126_v50 = vmax.f32 %v1864_v7, 0.0 }
 0x37c   : > { %v1776_v26 = vpop.f32.mrf.mxu3 }
 0x37d   : > { %v1777_v61 = vadd.f32 %v1776_v26, %v7654_v46 }
 0x37e   : > { %v7687_v13 = vpop.f32.mrf.mxu1  ;;  %v7689_v4 = vpop.f32.mrf.mxu2 }
 0x37f   : > { %v1866_v29 = vadd.f32 %v7529_v3, %v1777_v61 }
 0x380   : > { %v7692_v0 = vpop.f32.mrf.mxu0 }
 0x381   : > { %v2130_v62 = vmax.f32 %v1866_v29, 0.0  ;;  %1818 = vmatmul.bf16.gmra.mxu3 %v7051_v10 }
 0x383   : > { %2801 = vmatmul.bf16.gmra.mxu0 %v9182_v60  ;;  %2979 = vmatmul.bf16.gmra.mxu2 %v7542_v21  ;;  %v7697_v22 = vpack.c.bf16 %v2130_v62, %v2126_v50  ;;  %v9186_v60 = vld [vmem:[#allocation9_spill] sm:$0xff] }
 0x384   : > { %v1779_v48 = vpop.f32.mrf.mxu3 }
 0x385   : > { %9183 = vst [vmem:[#allocation42_spill] sm:$0xff] %v7697_v22  ;;  %2890 = vmatmul.bf16.gmra.mxu1 %v7697_v22  ;;  %v1780_v10 = vadd.f32 %v1779_v48, %v7654_v46 }
 0x386   : > { %v7700_v3 = vpop.f32.mrf.mxu1  ;;  %v7702_v26 = vpop.f32.mrf.mxu2 }
 0x387   : > { %v1869_v19 = vadd.f32 %v7536_v17, %v1780_v10 }
 0x388   : > { %v7704_v7 = vpop.f32.mrf.mxu0 }
 0x389   : > { %v2134_v22 = vmax.f32 %v1869_v19, 0.0 }
 0x38c   : > { %v1781_v61 = vpop.f32.mrf.mxu3 }
 0x38d   : > { %v1782_v20 = vadd.f32 %v1781_v61, %v7654_v46 }
 0x38e   : > { %v7709_v29 = vpop.f32.mrf.mxu2  ;;  %v7712_v62 = vpop.f32.mrf.mxu1 }
 0x38f   : > { %v1871_v50 = vadd.f32 %v7548_v35, %v1782_v20  ;;  %9184 = vst [vmem:[#allocation43_spill] sm:$0xff] %v7712_v62  ;;  %v5495_v62 = vld [vmem:[#allocation2] sm:$0xf] }
 0x390   : > { %v7714_v58 = vpop.f32.mrf.mxu0 }
 0x391   : > { %9185 = vst [vmem:[#allocation44_spill] sm:$0xff] %v7714_v58  ;;  %v2138_v21 = vmax.f32 %v1871_v50, 0.0  ;;  %1823 = vmatmul.bf16.gmra.mxu3 %v7082_v56  ;;  %v9189_v58 = vld [vmem:[#allocation10_spill] sm:$0xff] }
 0x393   : > { %2806 = vmatmul.bf16.gmra.mxu0 %v9186_v60  ;;  %2984 = vmatmul.bf16.gmra.mxu2 %v7562_v55  ;;  %v7719_v48 = vpack.c.bf16 %v2138_v21, %v2134_v22 }
 0x394   : > { %v1784_v17 = vpop.f32.mrf.mxu3 }
 0x395   : > { %9187 = vst [vmem:[#allocation45_spill] sm:$0xff] %v7719_v48  ;;  %2895 = vmatmul.bf16.gmra.mxu1 %v7719_v48  ;;  %v1785_v61 = vadd.f32 %v1784_v17, %v7654_v46 }
 0x396   : > { %v7722_v10 = vpop.f32.mrf.mxu2  ;;  %v7727_v20 = vpop.f32.mrf.mxu1 }
 0x397   : > { %v1874_v56 = vadd.f32 %v7556_v11, %v1785_v61 }
 0x398   : > { %v7724_v35 = vpop.f32.mrf.mxu0 }
 0x399   : > { %9188 = vst [vmem:[#allocation46_spill] sm:$0xff] %v7724_v35  ;;  %v2142_v48 = vmax.f32 %v1874_v56, 0.0  ;;  %v5982_v35 = vld [vmem:[#allocation2 + $0x4] sm:$0xf0] }
 0x39a   : > { %v5496_v17 = vor.u32 %v5982_v35, %v5495_v62  ;;  %v1968_v62 = vadd.f32 %v7553_v8, %v7498_v45 }
 0x39c   : > { %v1786_v19 = vpop.f32.mrf.mxu3  ;;  %2706 = vmatpush.bf16.msrb.mxu3 %v5496_v17 }
 0x39d   : > { %v1787_v50 = vadd.f32 %v1786_v19, %v7654_v46 }
 0x39e   : > { %v7731_v60 = vpop.f32.mrf.mxu2  ;;  %v7741_v61 = vpop.f32.mrf.mxu1 }
 0x39f   : > { %v1876_v21 = vadd.f32 %v7569_v6, %v1787_v50  ;;  %9191 = vst [vmem:[#allocation48_spill] sm:$0xff] %v7741_v61 }
 0x3a0   : > { %v7734_v22 = vpop.f32.mrf.mxu0 }
 0x3a1   : > { %v2146_v55 = vmax.f32 %v1876_v21, 0.0  ;;  %1828 = vmatmul.bf16.gmra.mxu3 %v7103_v37  ;;  %v1970_v37 = vadd.f32 %v7567_v34, %v7498_v45 }
 0x3a3   : > { %2811 = vmatmul.bf16.gmra.mxu0 %v9189_v58  ;;  %2989 = vmatmul.bf16.gmra.mxu2 %v7584_v44  ;;  %v7739_v11 = vpack.c.bf16 %v2146_v55, %v2142_v48  ;;  %v2059_v35 = vadd.f32 %v7599_v9, %v1970_v37  ;;  %v2057_v48 = vadd.f32 %v7590_v16, %v1968_v62 }
 0x3a4   : > { %v1789_v19 = vpop.f32.mrf.mxu3 }
 0x3a5   : > { %9190 = vst [vmem:[#allocation47_spill] sm:$0xff] %v7739_v11  ;;  %2900 = vmatmul.bf16.gmra.mxu1 %v7739_v11  ;;  %v1790_v55 = vadd.f32 %v1789_v19, %v7654_v46  ;;  %v2155_v21 = vmax.f32 %v2059_v35, 0.0  ;;  %v2151_v58 = vmax.f32 %v2057_v48, 0.0  ;;  %v9193_v19 = vld [vmem:[#allocation12_spill] sm:$0xff] }
 0x3a6   : > { %v7744_v6 = vpop.f32.mrf.mxu2  ;;  %v7757_v44 = vpop.f32.mrf.mxu1 }
 0x3a7   : > { %v1879_v17 = vadd.f32 %v7578_v33, %v1790_v55  ;;  %v7765_v16 = vpack.c.bf16 %v2155_v21, %v2151_v58 }
 0x3a8   : > { %v7748_v56 = vpop.f32.mrf.mxu0 }
 0x3a9   : > { %v2150_v9 = vmax.f32 %v1879_v17, 0.0  ;;  %9192 = vst [vmem:[#allocation49_spill] sm:$0xff] %v7765_v16 }
 0x3ac   : > { %v1791_v50 = vpop.f32.mrf.mxu3 }
 0x3ad   : > { %v1792_v11 = vadd.f32 %v1791_v50, %v7654_v46 }
 0x3ae   : > { %v7759_v34 = vpop.f32.mrf.mxu2 }
 0x3af   : > { %v1881_v61 = vadd.f32 %v7592_v49, %v1792_v11  ;;  %v1975_v49 = vadd.f32 %v7588_v28, %v7498_v45  ;;  %v7776_v11 = vpop.f32.mrf.mxu1 }
 0x3b0   : > { %v7762_v8 = vpop.f32.mrf.mxu0 }
 0x3b1   : > { %v2154_v37 = vmax.f32 %v1881_v61, 0.0  ;;  %1833 = vmatmul.bf16.gmra.mxu3 %v7155_v14  ;;  %v1973_v14 = vadd.f32 %v7575_v40, %v7498_v45  ;;  %v2064_v58 = vadd.f32 %v7621_v43, %v1975_v49 }
 0x3b3   : > { %2816 = vmatmul.bf16.gmra.mxu0 %v9193_v19  ;;  %2994 = vmatmul.bf16.gmra.mxu2 %v7765_v16  ;;  %v7769_v33 = vpack.c.bf16 %v2154_v37, %v2150_v9  ;;  %v2062_v48 = vadd.f32 %v7612_v5, %v1973_v14  ;;  %v2163_v21 = vmax.f32 %v2064_v58, 0.0  ;;  %v5995_v5 = vld [vmem:[#allocation2 + $0x74] sm:$0xf]  ;;  %v9196_v14 = vld [vmem:[#allocation13_spill] sm:$0xff] }
 0x3b4   : > { %v1794_v62 = vpop.f32.mrf.mxu3 }
 0x3b5   : > { %9194 = vst [vmem:[#allocation50_spill] sm:$0xff] %v7769_v33  ;;  %2905 = vmatmul.bf16.gmra.mxu1 %v7769_v33  ;;  %v1795_v55 = vadd.f32 %v1794_v62, %v7654_v46  ;;  %v2159_v37 = vmax.f32 %v2062_v48, 0.0  ;;  %v5553_v62 = vld [vmem:[#allocation2 + $0x78] sm:$0xf0]  ;;  %v1978_v48 = vadd.f32 %v7597_v63, %v7498_v45 }
 0x3b6   : > { %v7772_v35 = vpop.f32.mrf.mxu2 }
 0x3b7   : > { %v1884_v17 = vadd.f32 %v7602_v23, %v1795_v55  ;;  %v7793_v43 = vpack.c.bf16 %v2163_v21, %v2159_v37  ;;  %v7795_v49 = vpop.f32.mrf.mxu1  ;;  %v5556_v23 = vor.u32 %v5995_v5, %v5553_v62  ;;  %v2067_v37 = vadd.f32 %v7634_v42, %v1978_v48  ;;  %v9199_v48 = vld [vmem:[#allocation14_spill] sm:$0xff] }
 0x3b8   : > { %v7778_v61 = vpop.f32.mrf.mxu0 }
 0x3b9   : > { %v2158_v40 = vmax.f32 %v1884_v17, 0.0  ;;  %9195 = vst [vmem:[#allocation51_spill] sm:$0xff] %v7793_v43  ;;  %3055 = vmatpush.bf16.msra.mxu3 %v5556_v23  ;;  %v5617_v17 = vld [vmem:[#allocation2 + $0xf8] sm:$0xf0]  ;;  %v2167_v63 = vmax.f32 %v2067_v37, 0.0 }
 0x3bc   : > { %v1796_v50 = vpop.f32.mrf.mxu3 }
 0x3bd   : > { %v1797_v9 = vadd.f32 %v1796_v50, %v7654_v46 }
 0x3be   : > { %v7787_v28 = vpop.f32.mrf.mxu2 }
 0x3bf   : > { %v1886_v33 = vadd.f32 %v7614_v31, %v1797_v9 }
 0x3c0   : > { %v7790_v16 = vpop.f32.mrf.mxu0 }
 0x3c1   : > { %v2162_v19 = vmax.f32 %v1886_v33, 0.0  ;;  %1838 = vmatmul.bf16.gmra.mxu3 %v7225_v18  ;;  %v1980_v18 = vadd.f32 %v7610_v52, %v7498_v45 }
 0x3c3   : > { %2821 = vmatmul.bf16.gmra.mxu0 %v9196_v14  ;;  %2999 = vmatmul.bf16.gmra.mxu2 %v7793_v43  ;;  %v7799_v58 = vpack.c.bf16 %v2162_v19, %v2158_v40  ;;  %v2069_v50 = vadd.f32 %v7643_v30, %v1980_v18  ;;  %v6011_v19 = vld [vmem:[#allocation2 + $0xf4] sm:$0xf]  ;;  %v7813_v40 = vpop.f32.mrf.mxu1  ;;  %v9223_v14 = vld [vmem:[#allocation26_spill] sm:$0xff] }
 0x3c4   : > { %v1799_v31 = vpop.f32.mrf.mxu3  ;;  %v5620_v9 = vor.u32 %v6011_v19, %v5617_v17  ;;  %v1985_v17 = vadd.f32 %v7632_v15, %v7498_v45 }
 0x3c5   : > { %9197 = vst [vmem:[#allocation52_spill] sm:$0xff] %v7799_v58  ;;  %2910 = vmatmul.bf16.gmra.mxu1 %v7799_v58  ;;  %v1800_v21 = vadd.f32 %v1799_v31, %v7654_v46  ;;  %v2171_v62 = vmax.f32 %v2069_v50, 0.0 }
 0x3c6   : > { %v7802_v33 = vpop.f32.mrf.mxu2  ;;  %3144 = vmatpush.bf16.msra.mxu0 %v5620_v9  ;;  %v2074_v37 = vadd.f32 %v7667_v57, %v1985_v17 }
 0x3c7   : > { %v1889_v52 = vadd.f32 %v7624_v54, %v1800_v21  ;;  %v7823_v42 = vpack.c.bf16 %v2171_v62, %v2167_v63 }
 0x3c8   : > { %v7806_v55 = vpop.f32.mrf.mxu0 }
 0x3c9   : > { %v2166_v18 = vmax.f32 %v1889_v52, 0.0  ;;  %9198 = vst [vmem:[#allocation53_spill] sm:$0xff] %v7823_v42 }
 0x3cb   : > { %v7830_v21 = vpop.f32.mrf.mxu1 }
 0x3cc   : > { %v1801_v5 = vpop.f32.mrf.mxu3 }
 0x3cd   : > { %v1802_v23 = vadd.f32 %v1801_v5, %v7654_v46 }
 0x3ce   : > { %v7817_v58 = vpop.f32.mrf.mxu2 }
 0x3cf   : > { %v1891_v30 = vadd.f32 %v7636_v59, %v1802_v23  ;;  %v2179_v23 = vmax.f32 %v2074_v37, 0.0  ;;  %v9202_v37 = vld [vmem:[#allocation16_spill] sm:$0xff] }
 0x3d0   : > { %v7820_v31 = vpop.f32.mrf.mxu0 }
 0x3d1   : > { %v2170_v19 = vmax.f32 %v1891_v30, 0.0  ;;  %1843 = vmatmul.bf16.gmra.mxu3 %v7298_v41  ;;  %v1983_v41 = vadd.f32 %v7619_v32, %v7498_v45 }
 0x3d3   : > { %2826 = vmatmul.bf16.gmra.mxu0 %v9199_v48  ;;  %3004 = vmatmul.bf16.gmra.mxu2 %v7823_v42  ;;  %v7827_v54 = vpack.c.bf16 %v2170_v19, %v2166_v18  ;;  %v2072_v62 = vadd.f32 %v7658_v38, %v1983_v41  ;;  %v5545_v41 = vld [vmem:[#allocation2 + $0x68] sm:$0xf0]  ;;  %v9213_v48 = vld [vmem:[#allocation24_spill] sm:$0xff] }
 0x3d4   : > { %v1804_v50 = vpop.f32.mrf.mxu3 }
 0x3d5   : > { %9200 = vst [vmem:[#allocation54_spill] sm:$0xff] %v7827_v54  ;;  %2915 = vmatmul.bf16.gmra.mxu1 %v7827_v54  ;;  %v1805_v5 = vadd.f32 %v1804_v50, %v7654_v46  ;;  %v2175_v15 = vmax.f32 %v2072_v62, 0.0  ;;  %v7848_v54 = vpop.f32.mrf.mxu1  ;;  %v5993_v50 = vld [vmem:[#allocation2 + $0x64] sm:$0xf] }
 0x3d6   : > { %v7832_v59 = vpop.f32.mrf.mxu2 }
 0x3d7   : > { %v1894_v63 = vadd.f32 %v7646_v53, %v1805_v5  ;;  %v7853_v38 = vpack.c.bf16 %v2179_v23, %v2175_v15  ;;  %v5548_v53 = vor.u32 %v5993_v50, %v5545_v41 }
 0x3d8   : > { %v7836_v9 = vpop.f32.mrf.mxu0 }
 0x3d9   : > { %v2174_v57 = vmax.f32 %v1894_v63, 0.0  ;;  %9201 = vst [vmem:[#allocation55_spill] sm:$0xff] %v7853_v38  ;;  %3056 = vmatpush.bf16.msra.mxu3 %v5548_v53  ;;  %v1988_v63 = vadd.f32 %v7641_v12, %v7498_v45 }
 0x3db   : > { %v2077_v41 = vadd.f32 %v7680_v27, %v1988_v63  ;;  %v9205_v63 = vld [vmem:[#allocation17_spill] sm:$0xff] }
 0x3dc   : > { %v1806_v52 = vpop.f32.mrf.mxu3 }
 0x3dd   : > { %v1807_v30 = vadd.f32 %v1806_v52, %v7654_v46  ;;  %v1990_v52 = vadd.f32 %v7656_v25, %v7498_v45  ;;  %v2183_v12 = vmax.f32 %v2077_v41, 0.0 }
 0x3de   : > { %v7845_v18 = vpop.f32.mrf.mxu2 }
 0x3df   : > { %v1896_v19 = vadd.f32 %v7660_v1, %v1807_v30  ;;  %v2079_v30 = vadd.f32 %v7689_v4, %v1990_v52 }
 0x3e0   : > { %v7850_v32 = vpop.f32.mrf.mxu0 }
 0x3e1   : > { %v2178_v17 = vmax.f32 %v1896_v19, 0.0  ;;  %2707 = vmatmul.bf16.vlgmr.msrb.gmra.mxu3 %v7348_v51  ;;  %v6009_v19 = vld [vmem:[#allocation2 + $0xe4] sm:$0xf] }
 0x3e3   : > { %2831 = vmatmul.bf16.gmra.mxu0 %v9202_v37  ;;  %3009 = vmatmul.bf16.gmra.mxu2 %v7853_v38  ;;  %v7857_v5 = vpack.c.bf16 %v2178_v17, %v2174_v57  ;;  %v5609_v57 = vld [vmem:[#allocation2 + $0xe8] sm:$0xf0]  ;;  %v7870_v17 = vpop.f32.mrf.mxu1 }
 0x3e4   : > { %v1809_v1 = vpop.f32.mrf.mxu3  ;;  %v5612_v50 = vor.u32 %v6009_v19, %v5609_v57 }
 0x3e5   : > { %9203 = vst [vmem:[#allocation56_spill] sm:$0xff] %v7857_v5  ;;  %2920 = vmatmul.bf16.gmra.mxu1 %v7857_v5  ;;  %v1810_v15 = vadd.f32 %v1809_v1, %v7654_v46  ;;  %v2187_v5 = vmax.f32 %v2079_v30, 0.0 }
 0x3e6   : > { %v7860_v62 = vpop.f32.mrf.mxu2  ;;  %3145 = vmatpush.bf16.msra.mxu0 %v5612_v50 }
 0x3e7   : > { %v1899_v25 = vadd.f32 %v7670_v47, %v1810_v15  ;;  %v7881_v19 = vpack.c.bf16 %v2187_v5, %v2183_v12  ;;  %v1993_v5 = vadd.f32 %v7665_v2, %v7498_v45 }
 0x3e8   : > { %v7864_v23 = vpop.f32.mrf.mxu0 }
 0x3e9   : > { %v2182_v52 = vmax.f32 %v1899_v25, 0.0  ;;  %9204 = vst [vmem:[#allocation57_spill] sm:$0xff] %v7881_v19 }
 0x3ec   : > { %v1811_v53 = vpop.f32.mrf.mxu3 }
 0x3ed   : > { %v1812_v38 = vadd.f32 %v1811_v53, %v7654_v46 }
 0x3ee   : > { %v7875_v37 = vpop.f32.mrf.mxu2 }
 0x3ef   : > { %v1901_v4 = vadd.f32 %v7682_v39, %v1812_v38  ;;  %v1995_v38 = vadd.f32 %v7678_v24, %v7498_v45 }
 0x3f0   : > { %v7878_v1 = vpop.f32.mrf.mxu0 }
 0x3f1   : > { %v2186_v51 = vmax.f32 %v1901_v4, 0.0  ;;  %2712 = vmatmul.bf16.gmra.mxu3 %v7374_v36  ;;  %v2084_v57 = vadd.f32 %v7709_v29, %v1995_v38 }
 0x3f2   : > { %v7883_v27 = vpop.f32.mrf.mxu1 }
 0x3f3   : > { %2836 = vmatmul.bf16.gmra.mxu0 %v9205_v63  ;;  %3014 = vmatmul.bf16.gmra.mxu2 %v7881_v19  ;;  %v7887_v47 = vpack.c.bf16 %v2186_v51, %v2182_v52  ;;  %v2082_v51 = vadd.f32 %v7702_v26, %v1993_v5  ;;  %v2195_v25 = vmax.f32 %v2084_v57, 0.0  ;;  %v5991_v26 = vld [vmem:[#allocation2 + $0x54] sm:$0xf]  ;;  %v5537_v5 = vld [vmem:[#allocation2 + $0x58] sm:$0xf0] }
 0x3f4   : > { %v1814_v30 = vpop.f32.mrf.mxu3 }
 0x3f5   : > { %9206 = vst [vmem:[#allocation58_spill] sm:$0xff] %v7887_v47  ;;  %2925 = vmatmul.bf16.gmra.mxu1 %v7887_v47  ;;  %v1815_v50 = vadd.f32 %v1814_v30, %v7654_v46  ;;  %v2191_v52 = vmax.f32 %v2082_v51, 0.0  ;;  %v9207_v30 = vld [vmem:[#allocation22_spill] sm:$0xff] }
 0x3f6   : > { %v7890_v39 = vpop.f32.mrf.mxu2 }
 0x3f7   : > { %v1904_v12 = vadd.f32 %v7692_v0, %v1815_v50  ;;  %v7911_v19 = vpack.c.bf16 %v2195_v25, %v2191_v52  ;;  %v5540_v0 = vor.u32 %v5991_v26, %v5537_v5  ;;  %v9209_v50 = vld [vmem:[#allocation19_spill] sm:$0xff] }
 0x3f8   : > { %v7894_v15 = vpop.f32.mrf.mxu0 }
 0x3f9   : > { %v2190_v29 = vmax.f32 %v1904_v12, 0.0  ;;  %9208 = vst [vmem:[#allocation59_spill] sm:$0xff] %v7911_v19  ;;  %3057 = vmatpush.bf16.msra.mxu3 %v5540_v0  ;;  %v1998_v12 = vadd.f32 %v7687_v13, %v7498_v45 }
 0x3fa   : > { %v7900_v41 = vpop.f32.mrf.mxu1 }
 0x3fb   : > { %v2087_v0 = vadd.f32 %v7722_v10, %v1998_v12  ;;  %v9215_v12 = vld [vmem:[#allocation21_spill] sm:$0xff] }
 0x3fc   : > { %v1816_v53 = vpop.f32.mrf.mxu3 }
 0x3fd   : > { %v1817_v4 = vadd.f32 %v1816_v53, %v7654_v46  ;;  %v2000_v53 = vadd.f32 %v7700_v3, %v7498_v45  ;;  %v9211_v3 = vld [vmem:[#allocation44_spill] sm:$0xff]  ;;  %v2199_v13 = vmax.f32 %v2087_v0, 0.0 }
 0x3fe   : > { %v7905_v24 = vpop.f32.mrf.mxu2 }
 0x3ff   : > { %v1906_v47 = vadd.f32 %v7704_v7, %v1817_v4  ;;  %v2089_v4 = vadd.f32 %v7731_v60, %v2000_v53  ;;  %v9212_v60 = vld [vmem:[#allocation46_spill] sm:$0xff] }
 0x400   : > { %v7908_v2 = vpop.f32.mrf.mxu0 }
 0x401   : > { %v2194_v38 = vmax.f32 %v1906_v47, 0.0  ;;  %2717 = vmatmul.bf16.gmra.mxu3 %v9207_v30 }
 0x402   : > { %v7913_v57 = vpop.f32.mrf.mxu1 }
 0x403   : > { %2841 = vmatmul.bf16.gmra.mxu0 %v9209_v50  ;;  %3019 = vmatmul.bf16.gmra.mxu2 %v7911_v19  ;;  %v7917_v51 = vpack.c.bf16 %v2194_v38, %v2190_v29  ;;  %v6007_v29 = vld [vmem:[#allocation2 + $0xd4] sm:$0xf]  ;;  %v5601_v38 = vld [vmem:[#allocation2 + $0xd8] sm:$0xf0]  ;;  %v2203_v19 = vmax.f32 %v2089_v4, 0.0 }
 0x404   : > { %v1819_v7 = vpop.f32.mrf.mxu3  ;;  %v5604_v5 = vor.u32 %v6007_v29, %v5601_v38 }
 0x405   : > { %9210 = vst [vmem:[#allocation60_spill] sm:$0xff] %v7917_v51  ;;  %2930 = vmatmul.bf16.gmra.mxu1 %v7917_v51  ;;  %v1820_v52 = vadd.f32 %v1819_v7, %v7654_v46  ;;  %v7941_v29 = vpack.c.bf16 %v2203_v19, %v2199_v13  ;;  %v9217_v19 = vld [vmem:[#allocation43_spill] sm:$0xff] }
 0x406   : > { %v7920_v47 = vpop.f32.mrf.mxu2  ;;  %3146 = vmatpush.bf16.msra.mxu0 %v5604_v5  ;;  %v2003_v38 = vadd.f32 %v9217_v19, %v7498_v45 }
 0x407   : > { %v1909_v50 = vadd.f32 %v9211_v3, %v1820_v52  ;;  %9214 = vst [vmem:[#allocation44_spill] sm:$0xff] %v7941_v29 }
 0x408   : > { %v7924_v25 = vpop.f32.mrf.mxu0 }
 0x409   : > { %v2198_v36 = vmax.f32 %v1909_v50, 0.0  ;;  %v2005_v50 = vadd.f32 %v7727_v20, %v7498_v45 }
 0x40a   : > { %v7930_v26 = vpop.f32.mrf.mxu1 }
 0x40b   : > { %v2094_v5 = vadd.f32 %v7759_v34, %v2005_v50 }
 0x40c   : > { %v1821_v51 = vpop.f32.mrf.mxu3 }
 0x40d   : > { %v1822_v30 = vadd.f32 %v1821_v51, %v7654_v46  ;;  %v2211_v13 = vmax.f32 %v2094_v5, 0.0 }
 0x40e   : > { %v7935_v63 = vpop.f32.mrf.mxu2 }
 0x40f   : > { %v1911_v53 = vadd.f32 %v9212_v60, %v1822_v30 }
 0x410   : > { %v7938_v7 = vpop.f32.mrf.mxu0 }
 0x411   : > { %v2202_v42 = vmax.f32 %v1911_v53, 0.0  ;;  %2722 = vmatmul.bf16.gmra.mxu3 %v9213_v48 }
 0x412   : > { %v7943_v10 = vpop.f32.mrf.mxu1 }
 0x413   : > { %2846 = vmatmul.bf16.gmra.mxu0 %v9215_v12  ;;  %3024 = vmatmul.bf16.gmra.mxu2 %v7941_v29  ;;  %v7947_v51 = vpack.c.bf16 %v2202_v42, %v2198_v36  ;;  %v2092_v36 = vadd.f32 %v7744_v6, %v2003_v38  ;;  %v5989_v6 = vld [vmem:[#allocation2 + $0x44] sm:$0xf]  ;;  %v5529_v38 = vld [vmem:[#allocation2 + $0x48] sm:$0xf0] }
 0x414   : > { %v1824_v4 = vpop.f32.mrf.mxu3 }
 0x415   : > { %9216 = vst [vmem:[#allocation46_spill] sm:$0xff] %v7947_v51  ;;  %2935 = vmatmul.bf16.gmra.mxu1 %v7947_v51  ;;  %v1825_v0 = vadd.f32 %v1824_v4, %v7654_v46  ;;  %v2207_v51 = vmax.f32 %v2092_v36, 0.0  ;;  %v9218_v4 = vld [vmem:[#allocation25_spill] sm:$0xff] }
 0x416   : > { %v7950_v30 = vpop.f32.mrf.mxu2 }
 0x417   : > { %v1914_v60 = vadd.f32 %v7734_v22, %v1825_v0  ;;  %v7971_v12 = vpack.c.bf16 %v2211_v13, %v2207_v51  ;;  %v5532_v22 = vor.u32 %v5989_v6, %v5529_v38  ;;  %v9220_v0 = vld [vmem:[#allocation23_spill] sm:$0xff]  ;;  %v2010_v51 = vadd.f32 %v7757_v44, %v7498_v45  ;;  %v9222_v13 = vld [vmem:[#allocation48_spill] sm:$0xff] }
 0x418   : > { %v7954_v52 = vpop.f32.mrf.mxu0 }
 0x419   : > { %v2206_v34 = vmax.f32 %v1914_v60, 0.0  ;;  %9219 = vst [vmem:[#allocation43_spill] sm:$0xff] %v7971_v12  ;;  %3058 = vmatpush.bf16.msra.mxu3 %v5532_v22  ;;  %v2008_v60 = vadd.f32 %v9222_v13, %v7498_v45 }
 0x41a   : > { %v7960_v3 = vpop.f32.mrf.mxu1 }
 0x41c   : > { %v1826_v42 = vpop.f32.mrf.mxu3 }
 0x41d   : > { %v1827_v53 = vadd.f32 %v1826_v42, %v7654_v46 }
 0x41e   : > { %v7965_v20 = vpop.f32.mrf.mxu2 }
 0x41f   : > { %v1916_v29 = vadd.f32 %v7748_v56, %v1827_v53  ;;  %v2099_v53 = vadd.f32 %v7787_v28, %v2010_v51 }
 0x420   : > { %v7968_v19 = vpop.f32.mrf.mxu0 }
 0x421   : > { %v2210_v50 = vmax.f32 %v1916_v29, 0.0  ;;  %2727 = vmatmul.bf16.gmra.mxu3 %v9218_v4 }
 0x422   : > { %v7973_v5 = vpop.f32.mrf.mxu1 }
 0x423   : > { %2851 = vmatmul.bf16.gmra.mxu0 %v9220_v0  ;;  %3029 = vmatmul.bf16.gmra.mxu2 %v7971_v12  ;;  %v7977_v36 = vpack.c.bf16 %v2210_v50, %v2206_v34  ;;  %v6005_v34 = vld [vmem:[#allocation2 + $0xc4] sm:$0xf]  ;;  %v5593_v50 = vld [vmem:[#allocation2 + $0xc8] sm:$0xf0]  ;;  %v2219_v0 = vmax.f32 %v2099_v53, 0.0 }
 0x424   : > { %v1829_v56 = vpop.f32.mrf.mxu3  ;;  %v5596_v22 = vor.u32 %v6005_v34, %v5593_v50  ;;  %v5745_v53 = vld [vmem:[#allocation2 + $0x1f8] sm:$0xf0] }
 0x425   : > { %9221 = vst [vmem:[#allocation61_spill] sm:$0xff] %v7977_v36  ;;  %2940 = vmatmul.bf16.gmra.mxu1 %v7977_v36  ;;  %v1830_v6 = vadd.f32 %v1829_v56, %v7654_v46  ;;  %v2097_v36 = vadd.f32 %v7772_v35, %v2008_v60  ;;  %v6043_v60 = vld [vmem:[#allocation2 + $0x1f4] sm:$0xf] }
 0x426   : > { %v7980_v29 = vpop.f32.mrf.mxu2  ;;  %3147 = vmatpush.bf16.msra.mxu0 %v5596_v22  ;;  %v6041_v22 = vld [vmem:[#allocation2 + $0x1e4] sm:$0xf] }
 0x427   : > { %v1919_v44 = vadd.f32 %v7762_v8, %v1830_v6  ;;  %v2215_v13 = vmax.f32 %v2097_v36, 0.0  ;;  %v9225_v8 = vld [vmem:[#allocation27_spill] sm:$0xff]  ;;  %v5748_v36 = vor.u32 %v6043_v60, %v5745_v53  ;;  %v5681_v6 = vld [vmem:[#allocation2 + $0x178] sm:$0xf0]  ;;  %v2013_v60 = vadd.f32 %v7776_v11, %v7498_v45 }
 0x428   : > { %v7984_v42 = vpop.f32.mrf.mxu0 }
 0x429   : > { %v2214_v51 = vmax.f32 %v1919_v44, 0.0  ;;  %v8001_v34 = vpack.c.bf16 %v2219_v0, %v2215_v13  ;;  %3322 = vmatpush.bf16.msra.mxu2 %v5748_v36  ;;  %v5737_v44 = vld [vmem:[#allocation2 + $0x1e8] sm:$0xf0]  ;;  %v2015_v13 = vadd.f32 %v7795_v49, %v7498_v45  ;;  %v2102_v49 = vadd.f32 %v7802_v33, %v2013_v60 }
 0x42a   : > { %v7990_v38 = vpop.f32.mrf.mxu1  ;;  %v5657_v60 = vld [vmem:[#allocation2 + $0x148] sm:$0xf0] }
 0x42b   : > { %9224 = vst [vmem:[#allocation48_spill] sm:$0xff] %v8001_v34  ;;  %v2104_v53 = vadd.f32 %v7817_v58, %v2015_v13 }
 0x42c   : > { %v1831_v12 = vpop.f32.mrf.mxu3 }
 0x42d   : > { %v1832_v4 = vadd.f32 %v1831_v12, %v7654_v46 }
 0x42e   : > { %v7995_v48 = vpop.f32.mrf.mxu2 }
 0x42f   : > { %v1921_v28 = vadd.f32 %v7778_v61, %v1832_v4  ;;  %v6027_v4 = vld [vmem:[#allocation2 + $0x174] sm:$0xf] }
 0x430   : > { %v7998_v56 = vpop.f32.mrf.mxu0  ;;  %v5684_v50 = vor.u32 %v6027_v4, %v5681_v6 }
 0x431   : > { %v2218_v43 = vmax.f32 %v1921_v28, 0.0  ;;  %2732 = vmatmul.bf16.gmra.mxu3 %v9223_v14  ;;  %v5740_v28 = vor.u32 %v6041_v22, %v5737_v44  ;;  %v6023_v44 = vld [vmem:[#allocation2 + $0x154] sm:$0xf]  ;;  %v5665_v14 = vld [vmem:[#allocation2 + $0x158] sm:$0xf0] }
 0x432   : > { %v8003_v35 = vpop.f32.mrf.mxu1  ;;  %3233 = vmatpush.bf16.msra.mxu1 %v5684_v50 }
 0x433   : > { %2856 = vmatmul.bf16.gmra.mxu0 %v9225_v8  ;;  %3034 = vmatmul.bf16.gmra.mxu2 %v8001_v34  ;;  %v8007_v12 = vpack.c.bf16 %v2218_v43, %v2214_v51  ;;  %v6025_v43 = vld [vmem:[#allocation2 + $0x164] sm:$0xf]  ;;  %v5673_v51 = vld [vmem:[#allocation2 + $0x168] sm:$0xf0]  ;;  %v5729_v8 = vld [vmem:[#allocation2 + $0x1d8] sm:$0xf0] }
 0x434   : > { %v1834_v61 = vpop.f32.mrf.mxu3  ;;  %3323 = vmatpush.bf16.msra.mxu2 %v5740_v28  ;;  %v5676_v4 = vor.u32 %v6025_v43, %v5673_v51  ;;  %v6037_v28 = vld [vmem:[#allocation2 + $0x1c4] sm:$0xf]  ;;  %v5721_v43 = vld [vmem:[#allocation2 + $0x1c8] sm:$0xf0]  ;;  %v2223_v51 = vmax.f32 %v2102_v49, 0.0 }
 0x435   : > { %9226 = vst [vmem:[#allocation62_spill] sm:$0xff] %v8007_v12  ;;  %2945 = vmatmul.bf16.gmra.mxu1 %v8007_v12  ;;  %v1835_v36 = vadd.f32 %v1834_v61, %v7654_v46  ;;  %v6039_v12 = vld [vmem:[#allocation2 + $0x1d4] sm:$0xf]  ;;  %v5668_v61 = vor.u32 %v6023_v44, %v5665_v14  ;;  %v5724_v33 = vor.u32 %v6037_v28, %v5721_v43  ;;  %v5713_v28 = vld [vmem:[#allocation2 + $0x1b8] sm:$0xf0] }
 0x436   : > { %v8010_v0 = vpop.f32.mrf.mxu2  ;;  %3234 = vmatpush.bf16.msra.mxu1 %v5676_v4  ;;  %v5732_v50 = vor.u32 %v6039_v12, %v5729_v8  ;;  %v6021_v12 = vld [vmem:[#allocation2 + $0x144] sm:$0xf]  ;;  %v5987_v14 = vld [vmem:[#allocation2 + $0x34] sm:$0xf] }
 0x437   : > { %9227 = vst [vmem:[#allocation63_spill] sm:$0xff] %v8010_v0  ;;  %v2227_v0 = vmax.f32 %v2104_v53, 0.0  ;;  %v1924_v11 = vadd.f32 %v7790_v16, %v1835_v36  ;;  %v9230_v16 = vld [vmem:[#allocation28_spill] sm:$0xff]  ;;  %v6003_v49 = vld [vmem:[#allocation2 + $0xb4] sm:$0xf] }
 0x438   : > { %v8014_v34 = vpop.f32.mrf.mxu0  ;;  %3324 = vmatpush.bf16.msra.mxu2 %v5732_v50  ;;  %v5521_v50 = vld [vmem:[#allocation2 + $0x38] sm:$0xf0] }
 0x439   : > { %v2222_v53 = vmax.f32 %v1924_v11, 0.0  ;;  %v8031_v36 = vpack.c.bf16 %v2227_v0, %v2223_v51  ;;  %v5524_v44 = vor.u32 %v5987_v14, %v5521_v50  ;;  %v6019_v51 = vld [vmem:[#allocation2 + $0x134] sm:$0xf]  ;;  %v6001_v14 = vld [vmem:[#allocation2 + $0xa4] sm:$0xf] }
 0x43a   : > { %v8020_v6 = vpop.f32.mrf.mxu1  ;;  %3235 = vmatpush.bf16.msra.mxu1 %v5668_v61  ;;  %v9232_v61 = vld [vmem:[#allocation29_spill] sm:$0xff]  ;;  %v5577_v50 = vld [vmem:[#allocation2 + $0xa8] sm:$0xf0] }
 0x43b   : > { %9228 = vst [vmem:[#allocation64_spill] sm:$0xff] %v8020_v6  ;;  %3059 = vmatpush.bf16.msra.mxu3 %v5524_v44 }
 0x43c   : > { %v1836_v22 = vpop.f32.mrf.mxu3  ;;  %9231 = vst [vmem:[#allocation66_spill] sm:$0xff] %v8031_v36  ;;  %3325 = vmatpush.bf16.msra.mxu2 %v5724_v33  ;;  %v5649_v33 = vld [vmem:[#allocation2 + $0x138] sm:$0xf0] }
 0x43d   : > { %v1837_v58 = vadd.f32 %v1836_v22, %v7654_v46  ;;  %v5660_v22 = vor.u32 %v6021_v12, %v5657_v60  ;;  %v5652_v12 = vor.u32 %v6019_v51, %v5649_v33  ;;  %v5999_v33 = vld [vmem:[#allocation2 + $0x94] sm:$0xf] }
 0x43e   : > { %v8025_v13 = vpop.f32.mrf.mxu2 }
 0x43f   : > { %9229 = vst [vmem:[#allocation65_spill] sm:$0xff] %v8025_v13  ;;  %v1926_v6 = vadd.f32 %v7806_v55, %v1837_v58  ;;  %v5585_v13 = vld [vmem:[#allocation2 + $0xb8] sm:$0xf0]  ;;  %v6035_v55 = vld [vmem:[#allocation2 + $0x1b4] sm:$0xf]  ;;  %3236 = vmatpush.bf16.msra.mxu1 %v5660_v22 }
 0x440   : > { %v8028_v8 = vpop.f32.mrf.mxu0  ;;  %v5716_v43 = vor.u32 %v6035_v55, %v5713_v28  ;;  %v5641_v55 = vld [vmem:[#allocation2 + $0x128] sm:$0xf0] }
 0x441   : > { %v2226_v4 = vmax.f32 %v1926_v6, 0.0  ;;  %2737 = vmatmul.bf16.gmra.mxu3 %v9230_v16  ;;  %v5588_v6 = vor.u32 %v6003_v49, %v5585_v13  ;;  %v2020_v13 = vadd.f32 %v7830_v21, %v7498_v45  ;;  %v6017_v49 = vld [vmem:[#allocation2 + $0x124] sm:$0xf]  ;;  %v5569_v21 = vld [vmem:[#allocation2 + $0x98] sm:$0xf0] }
 0x442   : > { %v8033_v58 = vpop.f32.mrf.mxu1  ;;  %3326 = vmatpush.bf16.msra.mxu2 %v5716_v43  ;;  %v5644_v51 = vor.u32 %v6017_v49, %v5641_v55  ;;  %v5633_v16 = vld [vmem:[#allocation2 + $0x118] sm:$0xf0]  ;;  %v5561_v49 = vld [vmem:[#allocation2 + $0x88] sm:$0xf0]  ;;  %v6029_v55 = vld [vmem:[#allocation2 + $0x184] sm:$0xf] }
 0x443   : > { %2861 = vmatmul.bf16.gmra.mxu0 %v9232_v61  ;;  %3039 = vmatmul.bf16.gmra.mxu2 %v8031_v36  ;;  %v8037_v11 = vpack.c.bf16 %v2226_v4, %v2222_v53  ;;  %v6033_v36 = vld [vmem:[#allocation2 + $0x1a4] sm:$0xf]  ;;  %v5580_v53 = vor.u32 %v6001_v14, %v5577_v50  ;;  %v5705_v4 = vld [vmem:[#allocation2 + $0x1a8] sm:$0xf0]  ;;  %v2109_v28 = vadd.f32 %v7845_v18, %v2020_v13  ;;  %v6031_v14 = vld [vmem:[#allocation2 + $0x194] sm:$0xf] }
 0x444   : > { %v1839_v0 = vpop.f32.mrf.mxu3  ;;  %3148 = vmatpush.bf16.msra.mxu0 %v5588_v6  ;;  %3237 = vmatpush.bf16.msra.mxu1 %v5652_v12  ;;  %v5708_v22 = vor.u32 %v6033_v36, %v5705_v4  ;;  %v2018_v6 = vadd.f32 %v7813_v40, %v7498_v45  ;;  %v5697_v12 = vld [vmem:[#allocation2 + $0x198] sm:$0xf0]  ;;  %v6015_v61 = vld [vmem:[#allocation2 + $0x114] sm:$0xf] }
 0x445   : > { %9233 = vst [vmem:[#allocation67_spill] sm:$0xff] %v8037_v11  ;;  %2950 = vmatmul.bf16.gmra.mxu1 %v8037_v11  ;;  %v1840_v43 = vadd.f32 %v1839_v0, %v7654_v46  ;;  %v5572_v11 = vor.u32 %v5999_v33, %v5569_v21  ;;  %v5700_v4 = vor.u32 %v6031_v14, %v5697_v12  ;;  %v2235_v40 = vmax.f32 %v2109_v28, 0.0  ;;  %v5689_v21 = vld [vmem:[#allocation2 + $0x188] sm:$0xf0] }
 0x446   : > { %v8040_v60 = vpop.f32.mrf.mxu2  ;;  %3327 = vmatpush.bf16.msra.mxu2 %v5708_v22  ;;  %v2107_v50 = vadd.f32 %v7832_v59, %v2018_v6  ;;  %v5997_v59 = vld [vmem:[#allocation2 + $0x84] sm:$0xf]  ;;  %v5625_v14 = vld [vmem:[#allocation2 + $0x108] sm:$0xf0] }
 0x447   : > { %v1929_v18 = vadd.f32 %v7820_v31, %v1840_v43  ;;  %v5564_v33 = vor.u32 %v5997_v59, %v5561_v49  ;;  %v5692_v31 = vor.u32 %v6029_v55, %v5689_v21  ;;  %v6013_v43 = vld [vmem:[#allocation2 + $0x104] sm:$0xf]  ;;  %v2023_v59 = vadd.f32 %v7848_v54, %v7498_v45 }
 0x448   : > { %v8044_v44 = vpop.f32.mrf.mxu0  ;;  %3149 = vmatpush.bf16.msra.mxu0 %v5580_v53  ;;  %3238 = vmatpush.bf16.msra.mxu1 %v5644_v51  ;;  %v5636_v53 = vor.u32 %v6015_v61, %v5633_v16  ;;  %v2231_v6 = vmax.f32 %v2107_v50, 0.0  ;;  %v9234_v16 = vld [vmem:[#allocation30_spill] sm:$0xff]  ;;  %v9235_v50 = vld [vmem:[#allocation31_spill] sm:$0xff] }
 0x449   : > { %v2230_v12 = vmax.f32 %v1929_v18, 0.0  ;;  %v2025_v18 = vadd.f32 %v7870_v17, %v7498_v45  ;;  %v8086_v17 = vld [vmem:[%s9064_s9 + $0x3] ss:$8 sm:$0x3] }
 0x44a   : > { %v8052_v13 = vpop.f32.mrf.mxu1  ;;  %3328 = vmatpush.bf16.msra.mxu2 %v5700_v4  ;;  %v8061_v61 = vpack.c.bf16 %v2235_v40, %v2231_v6  ;;  %v2112_v6 = vadd.f32 %v7860_v62, %v2023_v59  ;;  %v8094_v62 = vperm.slane %v8086_v17, 0  ;;  %v9238_v59 = vld [vmem:[#allocation33_spill] sm:$0xff] }
 0x44b   : > { %v2114_v49 = vadd.f32 %v7875_v37, %v2025_v18 }
 0x44c   : > { %v1841_v36 = vpop.f32.mrf.mxu3  ;;  %3150 = vmatpush.bf16.msra.mxu0 %v5572_v11  ;;  %3239 = vmatpush.bf16.msra.mxu1 %v5636_v53 }
 0x44d   : > { %v1842_v0 = vadd.f32 %v1841_v36, %v7654_v46  ;;  %v5628_v36 = vor.u32 %v6013_v43, %v5625_v14  ;;  %v2239_v43 = vmax.f32 %v2112_v6, 0.0 }
 0x44e   : > { %v8055_v22 = vpop.f32.mrf.mxu2  ;;  %3329 = vmatpush.bf16.msra.mxu2 %v5692_v31 }
 0x44f   : > { %v1931_v51 = vadd.f32 %v7836_v9, %v1842_v0 }
 0x450   : > { %v8058_v28 = vpop.f32.mrf.mxu0  ;;  %3151 = vmatpush.bf16.msra.mxu0 %v5564_v33  ;;  %3240 = vmatpush.bf16.msra.mxu1 %v5628_v36  ;;  %v2243_v33 = vmax.f32 %v2114_v49, 0.0  ;;  %v5985_v36 = vld [vmem:[#allocation2 + $0x24] sm:$0xf] }
 0x451   : > { %v2234_v11 = vmax.f32 %v1931_v51, 0.0  ;;  %2742 = vmatmul.bf16.gmra.mxu3 %v9234_v16 }
 0x452   : > { %v8072_v40 = vpop.f32.mrf.mxu1 }
 0x453   : > { %2866 = vmatmul.bf16.gmra.mxu0 %v9235_v50  ;;  %3044 = vmatmul.bf16.gmra.mxu2 %v8061_v61  ;;  %v8065_v9 = vpack.c.bf16 %v2234_v11, %v2230_v12  ;;  %v8099_v11 = vpack.c.bf16 %v2243_v33, %v2239_v43 }
 0x454   : > { %v1844_v4 = vpop.f32.mrf.mxu3 }
 0x455   : > { %2955 = vmatmul.bf16.gmra.mxu1 %v8065_v9  ;;  %v1845_v55 = vadd.f32 %v1844_v4, %v7654_v46  ;;  %9237 = vst [vmem:[#allocation30_spill] sm:$0xff] %v8099_v11  ;;  %v5513_v4 = vld [vmem:[#allocation2 + $0x28] sm:$0xf0] }
 0x456   : > { %v8068_v0 = vpop.f32.mrf.mxu2  ;;  %v5516_v18 = vor.u32 %v5985_v36, %v5513_v4 }
 0x457   : > { %v1934_v21 = vadd.f32 %v7850_v32, %v1845_v55 }
 0x458   : > { %v8074_v53 = vpop.f32.mrf.mxu0  ;;  %3060 = vmatpush.bf16.msra.mxu3 %v5516_v18  ;;  %v9240_v18 = vld [vmem:[#allocation35_spill] sm:$0xff] }
 0x459   : > { %v2238_v14 = vmax.f32 %v1934_v21, 0.0 }
 0x45a   : > { %v8096_v12 = vpop.f32.mrf.mxu1 }
 0x45c   : > { %v1846_v51 = vpop.f32.mrf.mxu3 }
 0x45d   : > { %v1847_v31 = vadd.f32 %v1846_v51, %v7654_v46  ;;  %v9236_v46 = vld [vmem:[#allocation32_spill] sm:$0xff] }
 0x45e   : > { %v8089_v54 = vpop.f32.mrf.mxu2 }
 0x45f   : > { %v1936_v45 = vadd.f32 %v7864_v23, %v1847_v31 }
 0x460   : > { %v8091_v37 = vpop.f32.mrf.mxu0 }
 0x461   : > { %v2242_v32 = vmax.f32 %v1936_v45, 0.0  ;;  %2747 = vmatmul.bf16.gmra.mxu3 %v9236_v46 }
 0x462   : > { %v8112_v21 = vpop.f32.mrf.mxu1 }
 0x463   : > { %2871 = vmatmul.bf16.gmra.mxu0 %v9238_v59  ;;  %3049 = vmatmul.bf16.gmra.mxu2 %v8099_v11  ;;  %v8103_v23 = vpack.c.bf16 %v2242_v32, %v2238_v14 }
 0x464   : > { %v2708_v49 = vpop.f32.mrf.mxu3 }
 0x465   : > { %9239 = vst [vmem:[#allocation31_spill] sm:$0xff] %v8103_v23  ;;  %v2709_v55 = vadd.f32 %v2708_v49, %v8094_v62  ;;  %2960 = vmatmul.bf16.gmra.mxu1 %v8103_v23  ;;  %v9242_v23 = vld [vmem:[#allocation34_spill] sm:$0xff] }
 0x466   : > { %v8110_v33 = vpop.f32.mrf.mxu2 }
 0x467   : > { %v2798_v51 = vadd.f32 %v7878_v1, %v2709_v55  ;;  %v9241_v55 = vld [vmem:[#allocation7_spill] sm:$0xff] }
 0x468   : > { %v8107_v6 = vpop.f32.mrf.mxu0 }
 0x469   : > { %v2887_v43 = vadd.f32 %v7883_v27, %v2798_v51 }
 0x46b   : > { %v2976_v36 = vadd.f32 %v7890_v39, %v2887_v43  ;;  %v9243_v39 = vld [vmem:[#allocation41_spill] sm:$0xff] }
 0x46c   : > { %v2710_v31 = vpop.f32.mrf.mxu3 }
 0x46d   : > { %v2711_v45 = vadd.f32 %v2710_v31, %v8094_v62  ;;  %v3411_v51 = vmax.f32 %v2976_v36, 0.0  ;;  %v8127_v31 = vpop.f32.mrf.mxu1 }
 0x46e   : > { %v8123_v49 = vpop.f32.mrf.mxu2 }
 0x46f   : > { %v2800_v14 = vadd.f32 %v7894_v15, %v2711_v45 }
 0x470   : > { %v8117_v32 = vpop.f32.mrf.mxu0 }
 0x471   : > { %v2889_v4 = vadd.f32 %v7900_v41, %v2800_v14  ;;  %2752 = vmatmul.bf16.gmra.mxu3 %v9240_v18 }
 0x473   : > { %v2978_v1 = vadd.f32 %v7905_v24, %v2889_v4  ;;  %3152 = vmatmul.bf16.vlgmr.msra.gmra.mxu0 %v9241_v55  ;;  %3330 = vmatmul.bf16.vlgmr.msra.gmra.mxu2 %v9242_v23 }
 0x474   : > { %v2713_v27 = vpop.f32.mrf.mxu3 }
 0x475   : > { %v3413_v15 = vmax.f32 %v2978_v1, 0.0  ;;  %v2714_v45 = vadd.f32 %v2713_v27, %v8094_v62  ;;  %3241 = vmatmul.bf16.vlgmr.msra.gmra.mxu1 %v9243_v39  ;;  %v8140_v36 = vpop.f32.mrf.mxu1  ;;  %v5983_v39 = vld [vmem:[#allocation2 + $0x14] sm:$0xf] }
 0x476   : > { %v8137_v55 = vpop.f32.mrf.mxu2 }
 0x477   : > { %v8131_v41 = vpack.c.bf16 %v3413_v15, %v3411_v51  ;;  %v2803_v24 = vadd.f32 %v7908_v2, %v2714_v45  ;;  %v9245_v15 = vld [vmem:[#allocation36_spill] sm:$0xff] }
 0x478   : > { %v8133_v43 = vpop.f32.mrf.mxu0 }
 0x479   : > { %9244 = vst [vmem:[#allocation32_spill] sm:$0xff] %v8131_v41  ;;  %v2892_v4 = vadd.f32 %v7913_v57, %v2803_v24  ;;  %v5505_v41 = vld [vmem:[#allocation2 + $0x18] sm:$0xf0]  ;;  %v9247_v24 = vld [vmem:[#allocation5_spill] sm:$0xff] }
 0x47a   : > { %v5508_v45 = vor.u32 %v5983_v39, %v5505_v41  ;;  %v9246_v57 = vld [vmem:[#allocation8_spill] sm:$0xff] }
 0x47b   : > { %v2981_v2 = vadd.f32 %v7920_v47, %v2892_v4 }
 0x47c   : > { %v2715_v14 = vpop.f32.mrf.mxu3  ;;  %3061 = vmatpush.bf16.msra.mxu3 %v5508_v45 }
 0x47d   : > { %v2716_v23 = vadd.f32 %v2715_v14, %v8094_v62  ;;  %v8159_v41 = vpop.f32.mrf.mxu1 }
 0x47f   : > { %v2805_v1 = vadd.f32 %v7924_v25, %v2716_v23  ;;  %v9248_v23 = vld [vmem:[#allocation42_spill] sm:$0xff] }
 0x480   : > { %v8143_v27 = vpop.f32.mrf.mxu0 }
 0x481   : > { %v2894_v51 = vadd.f32 %v7930_v26, %v2805_v1  ;;  %2757 = vmatmul.bf16.gmra.mxu3 %v9245_v15  ;;  %v3415_v26 = vmax.f32 %v2981_v2, 0.0  ;;  %v8153_v15 = vpop.f32.mrf.mxu2 }
 0x483   : > { %3157 = vmatmul.bf16.gmra.mxu0 %v9246_v57  ;;  %3335 = vmatmul.bf16.gmra.mxu2 %v9247_v24  ;;  %v2983_v14 = vadd.f32 %v7935_v63, %v2894_v51  ;;  %v9250_v24 = vld [vmem:[#allocation37_spill] sm:$0xff] }
 0x484   : > { %v2718_v18 = vpop.f32.mrf.mxu3 }
 0x485   : > { %v2719_v25 = vadd.f32 %v2718_v18, %v8094_v62  ;;  %3246 = vmatmul.bf16.gmra.mxu1 %v9248_v23  ;;  %v3417_v1 = vmax.f32 %v2983_v14, 0.0  ;;  %v8172_v23 = vpop.f32.mrf.mxu1 }
 0x487   : > { %v8155_v11 = vpack.c.bf16 %v3417_v1, %v3415_v26  ;;  %v2808_v4 = vadd.f32 %v7938_v7, %v2719_v25  ;;  %v9251_v7 = vld [vmem:[#allocation9_spill] sm:$0xff]  ;;  %v9252_v25 = vld [vmem:[#allocation6_spill] sm:$0xff] }
 0x488   : > { %v8157_v47 = vpop.f32.mrf.mxu0  ;;  %v9253_v1 = vld [vmem:[#allocation45_spill] sm:$0xff] }
 0x489   : > { %9249 = vst [vmem:[#allocation33_spill] sm:$0xff] %v8155_v11  ;;  %v2897_v63 = vadd.f32 %v7943_v10, %v2808_v4  ;;  %v8167_v2 = vpop.f32.mrf.mxu2 }
 0x48b   : > { %v2986_v14 = vadd.f32 %v7950_v30, %v2897_v63 }
 0x48c   : > { %v2720_v39 = vpop.f32.mrf.mxu3 }
 0x48d   : > { %v2721_v51 = vadd.f32 %v2720_v39, %v8094_v62  ;;  %v3419_v4 = vmax.f32 %v2986_v14, 0.0 }
 0x48f   : > { %v2810_v18 = vadd.f32 %v7954_v52, %v2721_v51 }
 0x490   : > { %v8165_v45 = vpop.f32.mrf.mxu0 }
 0x491   : > { %v2899_v57 = vadd.f32 %v7960_v3, %v2810_v18  ;;  %2762 = vmatmul.bf16.gmra.mxu3 %v9250_v24  ;;  %v8184_v63 = vpop.f32.mrf.mxu2 }
 0x493   : > { %3162 = vmatmul.bf16.gmra.mxu0 %v9251_v7  ;;  %3340 = vmatmul.bf16.gmra.mxu2 %v9252_v25  ;;  %v2988_v10 = vadd.f32 %v7965_v20, %v2899_v57  ;;  %v8186_v7 = vpop.f32.mrf.mxu1 }
 0x494   : > { %v2723_v26 = vpop.f32.mrf.mxu3 }
 0x495   : > { %v2724_v52 = vadd.f32 %v2723_v26, %v8094_v62  ;;  %3251 = vmatmul.bf16.gmra.mxu1 %v9253_v1  ;;  %v3421_v39 = vmax.f32 %v2988_v10, 0.0  ;;  %v9255_v10 = vld [vmem:[#allocation38_spill] sm:$0xff]  ;;  %v5981_v1 = vld [vmem:[#allocation2 + $0x4] sm:$0xf] }
 0x497   : > { %v8179_v3 = vpack.c.bf16 %v3421_v39, %v3419_v4  ;;  %v2813_v30 = vadd.f32 %v7968_v19, %v2724_v52  ;;  %v5497_v4 = vld [vmem:[#allocation2 + $0x8] sm:$0xf0] }
 0x498   : > { %v8181_v51 = vpop.f32.mrf.mxu0  ;;  %v5500_v52 = vor.u32 %v5981_v1, %v5497_v4  ;;  %v9256_v39 = vld [vmem:[#allocation10_spill] sm:$0xff] }
 0x499   : > { %9254 = vst [vmem:[#allocation7_spill] sm:$0xff] %v8179_v3  ;;  %v2902_v20 = vadd.f32 %v7973_v5, %v2813_v30  ;;  %v9257_v3 = vld [vmem:[#allocation11_spill] sm:$0xff] }
 0x49a   : > { %3062 = vmatpush.bf16.msra.mxu3 %v5500_v52 }
 0x49b   : > { %v2991_v19 = vadd.f32 %v7980_v29, %v2902_v20  ;;  %v8203_v11 = vpop.f32.mrf.mxu1 }
 0x49c   : > { %v2725_v18 = vpop.f32.mrf.mxu3 }
 0x49d   : > { %v2726_v57 = vadd.f32 %v2725_v18, %v8094_v62 }
 0x49f   : > { %v2815_v25 = vadd.f32 %v7984_v42, %v2726_v57  ;;  %v8199_v42 = vpop.f32.mrf.mxu2  ;;  %v3423_v57 = vmax.f32 %v2991_v19, 0.0 }
 0x4a0   : > { %v8191_v26 = vpop.f32.mrf.mxu0 }
 0x4a1   : > { %v2904_v14 = vadd.f32 %v7990_v38, %v2815_v25  ;;  %2767 = vmatmul.bf16.gmra.mxu3 %v9255_v10  ;;  %v9258_v38 = vld [vmem:[#allocation47_spill] sm:$0xff] }
 0x4a3   : > { %3167 = vmatmul.bf16.gmra.mxu0 %v9256_v39  ;;  %3345 = vmatmul.bf16.gmra.mxu2 %v9257_v3  ;;  %v2993_v5 = vadd.f32 %v7995_v48, %v2904_v14  ;;  %v8217_v19 = vpop.f32.mrf.mxu1 }
 0x4a4   : > { %v2728_v30 = vpop.f32.mrf.mxu3 }
 0x4a5   : > { %v2729_v18 = vadd.f32 %v2728_v30, %v8094_v62  ;;  %3256 = vmatmul.bf16.gmra.mxu1 %v9258_v38  ;;  %v3425_v25 = vmax.f32 %v2993_v5, 0.0  ;;  %v9260_v5 = vld [vmem:[#allocation64_spill] sm:$0xff]  ;;  %v9261_v38 = vld [vmem:[#allocation39_spill] sm:$0xff] }
 0x4a7   : > { %v8205_v29 = vpack.c.bf16 %v3425_v25, %v3423_v57  ;;  %v2818_v3 = vadd.f32 %v7998_v56, %v2729_v18  ;;  %v8212_v4 = vpop.f32.mrf.mxu2  ;;  %v9262_v57 = vld [vmem:[#allocation63_spill] sm:$0xff]  ;;  %v9263_v56 = vld [vmem:[#allocation12_spill] sm:$0xff]  ;;  %v9264_v18 = vld [vmem:[#allocation49_spill] sm:$0xff] }
 0x4a8   : > { %v8207_v20 = vpop.f32.mrf.mxu0 }
 0x4a9   : > { %9259 = vst [vmem:[#allocation34_spill] sm:$0xff] %v8205_v29  ;;  %v2907_v48 = vadd.f32 %v8003_v35, %v2818_v3  ;;  %v9265_v35 = vld [vmem:[#allocation65_spill] sm:$0xff] }
 0x4ab   : > { %v2996_v25 = vadd.f32 %v9262_v57, %v2907_v48  ;;  %v8234_v57 = vpop.f32.mrf.mxu1 }
 0x4ac   : > { %v2730_v1 = vpop.f32.mrf.mxu3 }
 0x4ad   : > { %v2731_v14 = vadd.f32 %v2730_v1, %v8094_v62 }
 0x4af   : > { %v2820_v52 = vadd.f32 %v8014_v34, %v2731_v14  ;;  %v9266_v34 = vld [vmem:[#allocation50_spill] sm:$0xff]  ;;  %v3427_v14 = vmax.f32 %v2996_v25, 0.0  ;;  %v9268_v25 = vld [vmem:[#allocation40_spill] sm:$0xff] }
 0x4b0   : > { %v8215_v39 = vpop.f32.mrf.mxu0 }
 0x4b1   : > { %v2909_v30 = vadd.f32 %v9260_v5, %v2820_v52  ;;  %2772 = vmatmul.bf16.gmra.mxu3 %v9261_v38  ;;  %v8231_v5 = vpop.f32.mrf.mxu2 }
 0x4b3   : > { %3172 = vmatmul.bf16.gmra.mxu0 %v9263_v56  ;;  %3350 = vmatmul.bf16.gmra.mxu2 %v9264_v18  ;;  %v2998_v3 = vadd.f32 %v9265_v35, %v2909_v30 }
 0x4b4   : > { %v2733_v1 = vpop.f32.mrf.mxu3 }
 0x4b5   : > { %v2734_v29 = vadd.f32 %v2733_v1, %v8094_v62  ;;  %3261 = vmatmul.bf16.gmra.mxu1 %v9266_v34  ;;  %v3429_v10 = vmax.f32 %v2998_v3, 0.0  ;;  %v6052_v3 = vld [vmem:[%s9060_s5 + $0x38] sm:$0xff]  ;;  %v9269_v34 = vld [vmem:[#allocation13_spill] sm:$0xff] }
 0x4b6   : > { %3636 = vmatpush.bf16.msrb.mxu3 %v6052_v3 }
 0x4b7   : > { %v8227_v24 = vpack.c.bf16 %v3429_v10, %v3427_v14  ;;  %v2823_v48 = vadd.f32 %v8028_v8, %v2734_v29 }
 0x4b8   : > { %v8229_v52 = vpop.f32.mrf.mxu0 }
 0x4b9   : > { %9267 = vst [vmem:[#allocation41_spill] sm:$0xff] %v8227_v24  ;;  %v2912_v30 = vadd.f32 %v8033_v58, %v2823_v48  ;;  %v8247_v29 = vpop.f32.mrf.mxu2  ;;  %v9270_v58 = vld [vmem:[#allocation51_spill] sm:$0xff]  ;;  %v8252_v48 = vpop.f32.mrf.mxu1 }
 0x4bb   : > { %v3001_v8 = vadd.f32 %v8040_v60, %v2912_v30 }
 0x4bc   : > { %v2735_v56 = vpop.f32.mrf.mxu3 }
 0x4bd   : > { %v2736_v18 = vadd.f32 %v2735_v56, %v8094_v62  ;;  %v9271_v56 = vld [vmem:[#allocation52_spill] sm:$0xff] }
 0x4bf   : > { %v2825_v35 = vadd.f32 %v8044_v44, %v2736_v18  ;;  %v3431_v18 = vmax.f32 %v3001_v8, 0.0 }
 0x4c0   : > { %v8239_v1 = vpop.f32.mrf.mxu0 }
 0x4c1   : > { %v2914_v10 = vadd.f32 %v8052_v13, %v2825_v35  ;;  %2777 = vmatmul.bf16.gmra.mxu3 %v9268_v25  ;;  %v8264_v3 = vpop.f32.mrf.mxu2  ;;  %v8268_v8 = vpop.f32.mrf.mxu1 }
 0x4c3   : > { %3177 = vmatmul.bf16.gmra.mxu0 %v9269_v34  ;;  %3355 = vmatmul.bf16.gmra.mxu2 %v9270_v58  ;;  %v3003_v44 = vadd.f32 %v8055_v22, %v2914_v10  ;;  %v6060_v22 = vld [vmem:[%s9060_s5 + $0x78] sm:$0xff] }
 0x4c4   : > { %v2738_v14 = vpop.f32.mrf.mxu3  ;;  %3725 = vmatpush.bf16.msrb.mxu0 %v6060_v22 }
 0x4c5   : > { %v2739_v13 = vadd.f32 %v2738_v14, %v8094_v62  ;;  %3266 = vmatmul.bf16.gmra.mxu1 %v9271_v56  ;;  %v3433_v35 = vmax.f32 %v3003_v44, 0.0 }
 0x4c7   : > { %v8256_v24 = vpack.c.bf16 %v3433_v35, %v3431_v18  ;;  %v2828_v30 = vadd.f32 %v8058_v28, %v2739_v13  ;;  %v9273_v13 = vld [vmem:[#allocation15_spill] sm:$0xff]  ;;  %v9274_v18 = vld [vmem:[#allocation14_spill] sm:$0xff]  ;;  %v9275_v35 = vld [vmem:[#allocation53_spill] sm:$0xff] }
 0x4c8   : > { %v8258_v60 = vpop.f32.mrf.mxu0 }
 0x4c9   : > { %9272 = vst [vmem:[#allocation8_spill] sm:$0xff] %v8256_v24  ;;  %v2917_v34 = vadd.f32 %v8072_v40, %v2828_v30  ;;  %v8281_v24 = vpop.f32.mrf.mxu2 }
 0x4cb   : > { %v3006_v56 = vadd.f32 %v8068_v0, %v2917_v34  ;;  %v8287_v0 = vpop.f32.mrf.mxu1 }
 0x4cc   : > { %v2740_v10 = vpop.f32.mrf.mxu3 }
 0x4cd   : > { %v2741_v58 = vadd.f32 %v2740_v10, %v8094_v62  ;;  %v9276_v10 = vld [vmem:[#allocation54_spill] sm:$0xff] }
 0x4cf   : > { %v2830_v44 = vadd.f32 %v8074_v53, %v2741_v58  ;;  %v3435_v53 = vmax.f32 %v3006_v56, 0.0 }
 0x4d0   : > { %v8271_v14 = vpop.f32.mrf.mxu0 }
 0x4d1   : > { %v2919_v28 = vadd.f32 %v8096_v12, %v2830_v44  ;;  %2782 = vmatmul.bf16.gmra.mxu3 %v9273_v13  ;;  %v8295_v56 = vpop.f32.mrf.mxu2 }
 0x4d3   : > { %3182 = vmatmul.bf16.gmra.mxu0 %v9274_v18  ;;  %3360 = vmatmul.bf16.gmra.mxu2 %v9275_v35  ;;  %v3008_v40 = vadd.f32 %v8089_v54, %v2919_v28 }
 0x4d4   : > { %v2743_v30 = vpop.f32.mrf.mxu3 }
 0x4d5   : > { %v2744_v22 = vadd.f32 %v2743_v30, %v8094_v62  ;;  %3271 = vmatmul.bf16.gmra.mxu1 %v9276_v10  ;;  %v3437_v58 = vmax.f32 %v3008_v40, 0.0  ;;  %v9278_v10 = vld [vmem:[#allocation18_spill] sm:$0xff] }
 0x4d7   : > { %v8283_v12 = vpack.c.bf16 %v3437_v58, %v3435_v53  ;;  %v2833_v34 = vadd.f32 %v8091_v37, %v2744_v22  ;;  %v6051_v53 = vld [vmem:[%s9060_s5 + $0x30] sm:$0xff]  ;;  %v8303_v22 = vpop.f32.mrf.mxu1 }
 0x4d8   : > { %v8285_v44 = vpop.f32.mrf.mxu0  ;;  %v9280_v58 = vld [vmem:[#allocation55_spill] sm:$0xff]  ;;  %3637 = vmatpush.bf16.msrb.mxu3 %v6051_v53 }
 0x4d9   : > { %9277 = vst [vmem:[#allocation5_spill] sm:$0xff] %v8283_v12  ;;  %v2922_v54 = vadd.f32 %v8112_v21, %v2833_v34  ;;  %v9279_v21 = vld [vmem:[#allocation16_spill] sm:$0xff] }
 0x4db   : > { %v3011_v37 = vadd.f32 %v8110_v33, %v2922_v54  ;;  %v6059_v54 = vld [vmem:[%s9060_s5 + $0x70] sm:$0xff] }
 0x4dc   : > { %v2745_v18 = vpop.f32.mrf.mxu3  ;;  %3726 = vmatpush.bf16.msrb.mxu0 %v6059_v54 }
 0x4dd   : > { %v2746_v28 = vadd.f32 %v2745_v18, %v8094_v62  ;;  %v9281_v18 = vld [vmem:[#allocation56_spill] sm:$0xff] }
 0x4df   : > { %v2835_v35 = vadd.f32 %v8107_v6, %v2746_v28  ;;  %v3439_v28 = vmax.f32 %v3011_v37, 0.0 }
 0x4e0   : > { %v8293_v30 = vpop.f32.mrf.mxu0 }
 0x4e1   : > { %v2924_v40 = vadd.f32 %v8127_v31, %v2835_v35  ;;  %3063 = vmatmul.bf16.vlgmr.msra.gmra.mxu3 %v9278_v10 }
 0x4e3   : > { %3187 = vmatmul.bf16.gmra.mxu0 %v9279_v21  ;;  %3365 = vmatmul.bf16.gmra.mxu2 %v9280_v58  ;;  %v3013_v6 = vadd.f32 %v8123_v49, %v2924_v40  ;;  %v8318_v21 = vpop.f32.mrf.mxu2  ;;  %v8320_v40 = vpop.f32.mrf.mxu1 }
 0x4e4   : > { %v2748_v34 = vpop.f32.mrf.mxu3 }
 0x4e5   : > { %v2749_v31 = vadd.f32 %v2748_v34, %v8094_v62  ;;  %3276 = vmatmul.bf16.gmra.mxu1 %v9281_v18  ;;  %v3441_v35 = vmax.f32 %v3013_v6, 0.0  ;;  %v9282_v34 = vld [vmem:[#allocation20_spill] sm:$0xff]  ;;  %v9283_v18 = vld [vmem:[#allocation17_spill] sm:$0xff] }
 0x4e7   : > { %v8310_v10 = vpack.c.bf16 %v3441_v35, %v3439_v28  ;;  %v2838_v33 = vadd.f32 %v8117_v32, %v2749_v31  ;;  %v9284_v28 = vld [vmem:[#allocation57_spill] sm:$0xff] }
 0x4e8   : > { %v8312_v12 = vpop.f32.mrf.mxu0 }
 0x4e9   : > { %v2927_v53 = vadd.f32 %v8140_v36, %v2838_v33 }
 0x4eb   : > { %v3016_v31 = vadd.f32 %v8137_v55, %v2927_v53  ;;  %v8333_v36 = vpop.f32.mrf.mxu2 }
 0x4ec   : > { %v2750_v49 = vpop.f32.mrf.mxu3 }
 0x4ed   : > { %v2751_v37 = vadd.f32 %v2750_v49, %v8094_v62  ;;  %v3443_v49 = vmax.f32 %v3016_v31, 0.0 }
 0x4ef   : > { %v2840_v58 = vadd.f32 %v8133_v43, %v2751_v37  ;;  %v9285_v43 = vld [vmem:[#allocation58_spill] sm:$0xff] }
 0x4f0   : > { %v8325_v6 = vpop.f32.mrf.mxu0 }
 0x4f1   : > { %v2929_v32 = vadd.f32 %v8159_v41, %v2840_v58  ;;  %3068 = vmatmul.bf16.gmra.mxu3 %v9282_v34  ;;  %v8337_v41 = vpop.f32.mrf.mxu1 }
 0x4f3   : > { %3192 = vmatmul.bf16.gmra.mxu0 %v9283_v18  ;;  %3370 = vmatmul.bf16.gmra.mxu2 %v9284_v28  ;;  %v3018_v35 = vadd.f32 %v8153_v15, %v2929_v32  ;;  %v8346_v18 = vpop.f32.mrf.mxu2 }
 0x4f4   : > { %v2753_v54 = vpop.f32.mrf.mxu3 }
 0x4f5   : > { %v2754_v33 = vadd.f32 %v2753_v54, %v8094_v62  ;;  %3281 = vmatmul.bf16.gmra.mxu1 %v9285_v43  ;;  %v3445_v37 = vmax.f32 %v3018_v35, 0.0  ;;  %v9287_v43 = vld [vmem:[#allocation22_spill] sm:$0xff] }
 0x4f7   : > { %v8339_v58 = vpack.c.bf16 %v3445_v37, %v3443_v49  ;;  %v2843_v53 = vadd.f32 %v8143_v27, %v2754_v33  ;;  %v6050_v27 = vld [vmem:[%s9060_s5 + $0x28] sm:$0xff]  ;;  %v9288_v33 = vld [vmem:[#allocation19_spill] sm:$0xff] }
 0x4f8   : > { %v8341_v55 = vpop.f32.mrf.mxu0  ;;  %v9289_v49 = vld [vmem:[#allocation59_spill] sm:$0xff]  ;;  %3638 = vmatpush.bf16.msrb.mxu3 %v6050_v27 }
 0x4f9   : > { %9286 = vst [vmem:[#allocation42_spill] sm:$0xff] %v8339_v58  ;;  %v2932_v15 = vadd.f32 %v8172_v23, %v2843_v53  ;;  %v8351_v31 = vpop.f32.mrf.mxu1 }
 0x4fb   : > { %v3021_v23 = vadd.f32 %v8167_v2, %v2932_v15  ;;  %v8368_v58 = vpop.f32.mrf.mxu2 }
 0x4fc   : > { %v2755_v34 = vpop.f32.mrf.mxu3 }
 0x4fd   : > { %v2756_v32 = vadd.f32 %v2755_v34, %v8094_v62  ;;  %v9290_v34 = vld [vmem:[#allocation60_spill] sm:$0xff] }
 0x4ff   : > { %v2845_v28 = vadd.f32 %v8157_v47, %v2756_v32 }
 0x500   : > { %v8349_v54 = vpop.f32.mrf.mxu0 }
 0x501   : > { %v2934_v35 = vadd.f32 %v8186_v7, %v2845_v28  ;;  %3073 = vmatmul.bf16.gmra.mxu3 %v9287_v43  ;;  %v3447_v7 = vmax.f32 %v3021_v23, 0.0  ;;  %v8374_v15 = vpop.f32.mrf.mxu1 }
 0x503   : > { %3197 = vmatmul.bf16.gmra.mxu0 %v9288_v33  ;;  %3375 = vmatmul.bf16.gmra.mxu2 %v9289_v49  ;;  %v3023_v47 = vadd.f32 %v8184_v63, %v2934_v35  ;;  %v6058_v63 = vld [vmem:[%s9060_s5 + $0x68] sm:$0xff] }
 0x504   : > { %v2758_v37 = vpop.f32.mrf.mxu3  ;;  %3727 = vmatpush.bf16.msrb.mxu0 %v6058_v63  ;;  %v9294_v63 = vld [vmem:[#allocation46_spill] sm:$0xff] }
 0x505   : > { %v2759_v53 = vadd.f32 %v2758_v37, %v8094_v62  ;;  %3286 = vmatmul.bf16.gmra.mxu1 %v9290_v34  ;;  %v3449_v32 = vmax.f32 %v3023_v47, 0.0  ;;  %v9291_v37 = vld [vmem:[#allocation24_spill] sm:$0xff]  ;;  %v9292_v34 = vld [vmem:[#allocation21_spill] sm:$0xff] }
 0x507   : > { %v8364_v28 = vpack.c.bf16 %v3449_v32, %v3447_v7  ;;  %v2848_v2 = vadd.f32 %v8165_v45, %v2759_v53  ;;  %v8384_v53 = vpop.f32.mrf.mxu2  ;;  %v9293_v7 = vld [vmem:[#allocation44_spill] sm:$0xff] }
 0x508   : > { %v8366_v43 = vpop.f32.mrf.mxu0 }
 0x509   : > { %v2937_v27 = vadd.f32 %v8203_v11, %v2848_v2  ;;  %v8389_v2 = vpop.f32.mrf.mxu1 }
 0x50b   : > { %v3026_v45 = vadd.f32 %v8199_v42, %v2937_v27 }
 0x50c   : > { %v2760_v35 = vpop.f32.mrf.mxu3 }
 0x50d   : > { %v2761_v23 = vadd.f32 %v2760_v35, %v8094_v62 }
 0x50f   : > { %v2850_v33 = vadd.f32 %v8181_v51, %v2761_v23 }
 0x510   : > { %v8379_v49 = vpop.f32.mrf.mxu0 }
 0x511   : > { %v2939_v47 = vadd.f32 %v8217_v19, %v2850_v33  ;;  %3078 = vmatmul.bf16.gmra.mxu3 %v9291_v37  ;;  %v3451_v19 = vmax.f32 %v3026_v45, 0.0  ;;  %v8398_v37 = vpop.f32.mrf.mxu2 }
 0x513   : > { %3202 = vmatmul.bf16.gmra.mxu0 %v9292_v34  ;;  %3380 = vmatmul.bf16.gmra.mxu2 %v9293_v7  ;;  %v3028_v11 = vadd.f32 %v8212_v4, %v2939_v47  ;;  %v8402_v34 = vpop.f32.mrf.mxu1 }
 0x514   : > { %v2763_v32 = vpop.f32.mrf.mxu3 }
 0x515   : > { %v2764_v51 = vadd.f32 %v2763_v32, %v8094_v62  ;;  %3291 = vmatmul.bf16.gmra.mxu1 %v9294_v63  ;;  %v3453_v35 = vmax.f32 %v3028_v11, 0.0  ;;  %v9295_v32 = vld [vmem:[#allocation25_spill] sm:$0xff]  ;;  %v9296_v63 = vld [vmem:[#allocation23_spill] sm:$0xff] }
 0x517   : > { %v8393_v23 = vpack.c.bf16 %v3453_v35, %v3451_v19  ;;  %v2853_v27 = vadd.f32 %v8191_v26, %v2764_v51  ;;  %v6049_v26 = vld [vmem:[%s9060_s5 + $0x20] sm:$0xff] }
 0x518   : > { %v8395_v42 = vpop.f32.mrf.mxu0  ;;  %3639 = vmatpush.bf16.msrb.mxu3 %v6049_v26 }
 0x519   : > { %v2942_v4 = vadd.f32 %v8234_v57, %v2853_v27  ;;  %v9297_v57 = vld [vmem:[#allocation43_spill] sm:$0xff] }
 0x51b   : > { %v3031_v51 = vadd.f32 %v8231_v5, %v2942_v4 }
 0x51c   : > { %v2765_v33 = vpop.f32.mrf.mxu3 }
 0x51d   : > { %v2766_v47 = vadd.f32 %v2765_v33, %v8094_v62  ;;  %v3455_v27 = vmax.f32 %v3031_v51, 0.0 }
 0x51f   : > { %v2855_v7 = vadd.f32 %v8207_v20, %v2766_v47  ;;  %v8418_v47 = vpop.f32.mrf.mxu2 }
 0x520   : > { %v8406_v11 = vpop.f32.mrf.mxu0 }
 0x521   : > { %v2944_v45 = vadd.f32 %v8252_v48, %v2855_v7  ;;  %3083 = vmatmul.bf16.gmra.mxu3 %v9295_v32  ;;  %v9298_v48 = vld [vmem:[#allocation61_spill] sm:$0xff]  ;;  %v8422_v32 = vpop.f32.mrf.mxu1 }
 0x523   : > { %3207 = vmatmul.bf16.gmra.mxu0 %v9296_v63  ;;  %3385 = vmatmul.bf16.gmra.mxu2 %v9297_v57  ;;  %v3033_v19 = vadd.f32 %v8247_v29, %v2944_v45  ;;  %v6057_v29 = vld [vmem:[%s9060_s5 + $0x60] sm:$0xff] }
 0x524   : > { %v2768_v35 = vpop.f32.mrf.mxu3  ;;  %3728 = vmatpush.bf16.msrb.mxu0 %v6057_v29  ;;  %v9302_v29 = vld [vmem:[#allocation62_spill] sm:$0xff] }
 0x525   : > { %v2769_v20 = vadd.f32 %v2768_v35, %v8094_v62  ;;  %3296 = vmatmul.bf16.gmra.mxu1 %v9298_v48  ;;  %v3457_v33 = vmax.f32 %v3033_v19, 0.0  ;;  %v9299_v35 = vld [vmem:[#allocation26_spill] sm:$0xff]  ;;  %v9300_v48 = vld [vmem:[#allocation27_spill] sm:$0xff] }
 0x527   : > { %v8420_v7 = vpack.c.bf16 %v3457_v33, %v3455_v27  ;;  %v2858_v5 = vadd.f32 %v8215_v39, %v2769_v20  ;;  %v8433_v57 = vpop.f32.mrf.mxu2  ;;  %v9301_v27 = vld [vmem:[#allocation48_spill] sm:$0xff] }
 0x528   : > { %v8428_v4 = vpop.f32.mrf.mxu0 }
 0x529   : > { %v2947_v26 = vadd.f32 %v8268_v8, %v2858_v5  ;;  %v8438_v20 = vpop.f32.mrf.mxu1 }
 0x52b   : > { %v3036_v39 = vadd.f32 %v8264_v3, %v2947_v26 }
 0x52c   : > { %v2770_v45 = vpop.f32.mrf.mxu3 }
 0x52d   : > { %v2771_v51 = vadd.f32 %v2770_v45, %v8094_v62 }
 0x52f   : > { %v2860_v63 = vadd.f32 %v8229_v52, %v2771_v51  ;;  %v8450_v26 = vpop.f32.mrf.mxu2 }
 0x530   : > { %v8443_v5 = vpop.f32.mrf.mxu0 }
 0x531   : > { %v2949_v19 = vadd.f32 %v8287_v0, %v2860_v63  ;;  %3088 = vmatmul.bf16.gmra.mxu3 %v9299_v35  ;;  %v3459_v0 = vmax.f32 %v3036_v39, 0.0  ;;  %v8452_v35 = vpop.f32.mrf.mxu1 }
 0x533   : > { %3212 = vmatmul.bf16.gmra.mxu0 %v9300_v48  ;;  %3390 = vmatmul.bf16.gmra.mxu2 %v9301_v27  ;;  %v3038_v8 = vadd.f32 %v8281_v24, %v2949_v19 }
 0x534   : > { %v2773_v33 = vpop.f32.mrf.mxu3 }
 0x535   : > { %v2774_v52 = vadd.f32 %v2773_v33, %v8094_v62  ;;  %3301 = vmatmul.bf16.gmra.mxu1 %v9302_v29  ;;  %v3461_v45 = vmax.f32 %v3038_v8, 0.0  ;;  %v9303_v8 = vld [vmem:[#allocation28_spill] sm:$0xff]  ;;  %v9305_v29 = vld [vmem:[#allocation66_spill] sm:$0xff] }
 0x537   : > { %v8447_v51 = vpack.c.bf16 %v3461_v45, %v3459_v0  ;;  %v2863_v3 = vadd.f32 %v8239_v1, %v2774_v52  ;;  %v6048_v1 = vld [vmem:[%s9060_s5 + $0x18] sm:$0xff]  ;;  %v9304_v52 = vld [vmem:[#allocation29_spill] sm:$0xff]  ;;  %v8468_v45 = vpop.f32.mrf.mxu2 }
 0x538   : > { %v8456_v48 = vpop.f32.mrf.mxu0  ;;  %3640 = vmatpush.bf16.msrb.mxu3 %v6048_v1 }
 0x539   : > { %v2952_v24 = vadd.f32 %v8303_v22, %v2863_v3 }
 0x53b   : > { %v3041_v33 = vadd.f32 %v8295_v56, %v2952_v24 }
 0x53c   : > { %v2775_v63 = vpop.f32.mrf.mxu3 }
 0x53d   : > { %v2776_v19 = vadd.f32 %v2775_v63, %v8094_v62  ;;  %v3463_v3 = vmax.f32 %v3041_v33, 0.0  ;;  %v6055_v33 = vld [vmem:[%s9060_s5 + $0x50] sm:$0xff] }
 0x53f   : > { %v2865_v27 = vadd.f32 %v8258_v60, %v2776_v19  ;;  %v8472_v19 = vpop.f32.mrf.mxu1 }
 0x540   : > { %v8476_v56 = vpop.f32.mrf.mxu0 }
 0x541   : > { %v2954_v39 = vadd.f32 %v8320_v40, %v2865_v27  ;;  %3093 = vmatmul.bf16.gmra.mxu3 %v9303_v8  ;;  %v9306_v40 = vld [vmem:[#allocation67_spill] sm:$0xff] }
 0x543   : > { %3217 = vmatmul.bf16.gmra.mxu0 %v9304_v52  ;;  %3395 = vmatmul.bf16.gmra.mxu2 %v9305_v29  ;;  %v3043_v22 = vadd.f32 %v8318_v21, %v2954_v39  ;;  %v6056_v21 = vld [vmem:[%s9060_s5 + $0x58] sm:$0xff]  ;;  %v8487_v52 = vpop.f32.mrf.mxu2 }
 0x544   : > { %v2778_v0 = vpop.f32.mrf.mxu3  ;;  %3729 = vmatpush.bf16.msrb.mxu0 %v6056_v21 }
 0x545   : > { %v2779_v60 = vadd.f32 %v2778_v0, %v8094_v62  ;;  %3306 = vmatmul.bf16.gmra.mxu1 %v9306_v40  ;;  %v3465_v63 = vmax.f32 %v3043_v22, 0.0 }
 0x547   : > { %v8474_v27 = vpack.c.bf16 %v3465_v63, %v3463_v3  ;;  %v2868_v24 = vadd.f32 %v8271_v14, %v2779_v60  ;;  %v8490_v14 = vpop.f32.mrf.mxu1 }
 0x548   : > { %3730 = vmatpush.bf16.msrb.mxu0 %v6055_v33  ;;  %v8498_v60 = vpop.f32.mrf.mxu0 }
 0x549   : > { %v2957_v8 = vadd.f32 %v8337_v41, %v2868_v24  ;;  %v6054_v41 = vld [vmem:[%s9060_s5 + $0x48] sm:$0xff] }
 0x54b   : > { %v3046_v0 = vadd.f32 %v8333_v36, %v2957_v8 }
 0x54c   : > { %v2780_v39 = vpop.f32.mrf.mxu3  ;;  %3731 = vmatpush.bf16.msrb.mxu0 %v6054_v41 }
 0x54d   : > { %v2781_v1 = vadd.f32 %v2780_v39, %v8094_v62  ;;  %v3467_v3 = vmax.f32 %v3046_v0, 0.0 }
 0x54f   : > { %v2870_v29 = vadd.f32 %v8285_v44, %v2781_v1  ;;  %v8516_v24 = vpop.f32.mrf.mxu1 }
 0x550   : > { %v8518_v21 = vpop.f32.mrf.mxu0 }
 0x551   : > { %v2959_v22 = vadd.f32 %v8351_v31, %v2870_v29  ;;  %3098 = vmatmul.bf16.gmra.mxu3 %v9234_v16  ;;  %v6053_v16 = vld [vmem:[%s9060_s5 + $0x40] sm:$0xff]  ;;  %v6047_v29 = vld [vmem:[%s9060_s5 + $0x10] sm:$0xff] }
 0x552   : > { %3732 = vmatpush.bf16.msrb.mxu0 %v6053_v16  ;;  %3641 = vmatpush.bf16.msrb.mxu3 %v6047_v29 }
 0x553   : > { %3222 = vmatmul.bf16.gmra.mxu0 %v9235_v50  ;;  %3400 = vmatmul.bf16.gmra.mxu2 %v8061_v61  ;;  %v3048_v44 = vadd.f32 %v8346_v18, %v2959_v22  ;;  %v8510_v50 = vpop.f32.mrf.mxu2  ;;  %v6064_v18 = vld [vmem:[%s9061_s6 + $0x18] sm:$0xff] }
 0x554   : > { %v2783_v40 = vpop.f32.mrf.mxu3  ;;  %3948 = vmatpush.bf16.msrb.mxu1 %v6064_v18 }
 0x555   : > { %v2784_v31 = vadd.f32 %v2783_v40, %v8094_v62  ;;  %3311 = vmatmul.bf16.gmra.mxu1 %v8065_v9  ;;  %v3469_v36 = vmax.f32 %v3048_v44, 0.0 }
 0x557   : > { %v8508_v63 = vpack.c.bf16 %v3469_v36, %v3467_v3  ;;  %v2873_v61 = vadd.f32 %v8293_v30, %v2784_v31  ;;  %v8526_v30 = vperm.slane %v8086_v17, 1 }
 0x558   : > { %v8541_v40 = vpop.f32.mrf.mxu0 }
 0x559   : > { %v2962_v39 = vadd.f32 %v8374_v15, %v2873_v61 }
 0x55b   : > { %v3051_v22 = vadd.f32 %v8368_v58, %v2962_v39  ;;  %v8532_v41 = vpop.f32.mrf.mxu2 }
 0x55c   : > { %v2785_v9 = vpop.f32.mrf.mxu3 }
 0x55d   : > { %v2786_v8 = vadd.f32 %v2785_v9, %v8094_v62  ;;  %v9307_v62 = vld [vmem:[#allocation30_spill] sm:$0xff]  ;;  %v3471_v0 = vmax.f32 %v3051_v22, 0.0  ;;  %v9309_v9 = vld [vmem:[#allocation35_spill] sm:$0xff] }
 0x55f   : > { %v2875_v1 = vadd.f32 %v8312_v12, %v2786_v8 }
 0x560   : > { %v8550_v61 = vpop.f32.mrf.mxu0 }
 0x561   : > { %v2964_v33 = vadd.f32 %v8389_v2, %v2875_v1  ;;  %3103 = vmatmul.bf16.gmra.mxu3 %v9236_v46  ;;  %v8537_v46 = vpop.f32.mrf.mxu1  ;;  %v9308_v2 = vld [vmem:[#allocation31_spill] sm:$0xff] }
 0x563   : > { %3227 = vmatmul.bf16.gmra.mxu0 %v9238_v59  ;;  %3405 = vmatmul.bf16.gmra.mxu2 %v9307_v62  ;;  %v3053_v12 = vadd.f32 %v8384_v53, %v2964_v33  ;;  %v8563_v62 = vpop.f32.mrf.mxu2 }
 0x564   : > { %v3064_v15 = vpop.f32.mrf.mxu3 }
 0x565   : > { %v3065_v17 = vadd.f32 %v3064_v15, %v8526_v30  ;;  %3316 = vmatmul.bf16.gmra.mxu1 %v9308_v2  ;;  %v3473_v44 = vmax.f32 %v3053_v12, 0.0  ;;  %v9310_v2 = vld [vmem:[#allocation36_spill] sm:$0xff] }
 0x567   : > { %v3154_v58 = vadd.f32 %v8325_v6, %v3065_v17  ;;  %v8544_v31 = vpack.c.bf16 %v3473_v44, %v3471_v0 }
 0x568   : > { %v8560_v22 = vpop.f32.mrf.mxu0 }
 0x569   : > { %v3243_v59 = vadd.f32 %v8402_v34, %v3154_v58 }
 0x56b   : > { %v3332_v53 = vadd.f32 %v8398_v37, %v3243_v59 }
 0x56c   : > { %v3066_v16 = vpop.f32.mrf.mxu3 }
 0x56d   : > { %v3067_v3 = vadd.f32 %v3066_v16, %v8526_v30  ;;  %v3412_v8 = vmax.f32 %v3332_v53, 0.0 }
 0x56f   : > { %v3156_v36 = vadd.f32 %v8341_v55, %v3067_v3  ;;  %v8558_v55 = vpop.f32.mrf.mxu1 }
 0x570   : > { %v8573_v44 = vpop.f32.mrf.mxu0 }
 0x571   : > { %v3245_v18 = vadd.f32 %v8422_v32, %v3156_v36  ;;  %3108 = vmatmul.bf16.gmra.mxu3 %v9309_v9 }
 0x573   : > { %v3334_v39 = vadd.f32 %v8418_v47, %v3245_v18 }
 0x574   : > { %v3069_v6 = vpop.f32.mrf.mxu3 }
 0x575   : > { %v3414_v1 = vmax.f32 %v3334_v39, 0.0  ;;  %v3070_v34 = vadd.f32 %v3069_v6, %v8526_v30 }
 0x577   : > { %v3477_v33 = vpack.c.bf16 %v3414_v1, %v3412_v8  ;;  %v3159_v37 = vadd.f32 %v8349_v54, %v3070_v34  ;;  %v6046_v54 = vld [vmem:[%s9060_s5 + $0x8] sm:$0xff]  ;;  %v3264_v0 = vpop.f32.mrf.mxu1  ;;  %v9311_v34 = vld [vmem:[#allocation37_spill] sm:$0xff] }
 0x578   : > { %3642 = vmatpush.bf16.msrb.mxu3 %v6046_v54  ;;  %v8580_v39 = vpop.f32.mrf.mxu0 }
 0x579   : > { %v3248_v29 = vadd.f32 %v8438_v20, %v3159_v37  ;;  %3733 = vmatmul.bf16.vlgmr.msrb.gmra.mxu0 %v3477_v33 }
 0x57b   : > { %v3337_v32 = vadd.f32 %v8433_v57, %v3248_v29 }
 0x57c   : > { %v3071_v47 = vpop.f32.mrf.mxu3 }
 0x57d   : > { %v3072_v12 = vadd.f32 %v3071_v47, %v8526_v30  ;;  %v3416_v59 = vmax.f32 %v3337_v32, 0.0 }
 0x57f   : > { %v3161_v15 = vadd.f32 %v8366_v43, %v3072_v12  ;;  %v3353_v43 = vpop.f32.mrf.mxu2  ;;  %v3267_v9 = vpop.f32.mrf.mxu1 }
 0x580   : > { %v8590_v12 = vpop.f32.mrf.mxu0 }
 0x581   : > { %v3250_v17 = vadd.f32 %v8452_v35, %v3161_v15  ;;  %3113 = vmatmul.bf16.gmra.mxu3 %v9310_v2 }
 0x583   : > { %v3339_v20 = vadd.f32 %v8450_v26, %v3250_v17 }
 0x584   : > { %v3074_v57 = vpop.f32.mrf.mxu3 }
 0x585   : > { %v3075_v58 = vadd.f32 %v3074_v57, %v8526_v30  ;;  %v3418_v53 = vmax.f32 %v3339_v20, 0.0  ;;  %v9312_v20 = vld [vmem:[#allocation38_spill] sm:$0xff] }
 0x587   : > { %v3164_v35 = vadd.f32 %v8379_v49, %v3075_v58  ;;  %v3479_v16 = vpack.c.bf16 %v3418_v53, %v3416_v59  ;;  %v8583_v8 = vpop.f32.mrf.mxu2  ;;  %v3269_v47 = vpop.f32.mrf.mxu1 }
 0x588   : > { %v8604_v58 = vpop.f32.mrf.mxu0 }
 0x589   : > { %v3253_v3 = vadd.f32 %v8472_v19, %v3164_v35  ;;  %3738 = vmatmul.bf16.gmra.mxu0 %v3479_v16 }
 0x58b   : > { %v3342_v36 = vadd.f32 %v8468_v45, %v3253_v3 }
 0x58c   : > { %v3076_v18 = vpop.f32.mrf.mxu3 }
 0x58d   : > { %v3077_v26 = vadd.f32 %v3076_v18, %v8526_v30  ;;  %v3420_v45 = vmax.f32 %v3342_v36, 0.0 }
 0x58f   : > { %v3166_v6 = vadd.f32 %v8395_v42, %v3077_v26  ;;  %v3358_v15 = vpop.f32.mrf.mxu2  ;;  %v3272_v57 = vpop.f32.mrf.mxu1 }
 0x590   : > { %v8609_v26 = vpop.f32.mrf.mxu0 }
 0x591   : > { %v3255_v1 = vadd.f32 %v8490_v14, %v3166_v6  ;;  %3118 = vmatmul.bf16.gmra.mxu3 %v9311_v34  ;;  %v6063_v14 = vld [vmem:[%s9061_s6 + $0x10] sm:$0xff] }
 0x592   : > { %3949 = vmatpush.bf16.msrb.mxu1 %v6063_v14 }
 0x593   : > { %v3344_v49 = vadd.f32 %v8487_v52, %v3255_v1 }
 0x594   : > { %v3079_v19 = vpop.f32.mrf.mxu3 }
 0x595   : > { %v3080_v33 = vadd.f32 %v3079_v19, %v8526_v30  ;;  %v3422_v37 = vmax.f32 %v3344_v49, 0.0 }
 0x597   : > { %v3169_v29 = vadd.f32 %v8406_v11, %v3080_v33  ;;  %v3481_v32 = vpack.c.bf16 %v3422_v37, %v3420_v45  ;;  %v3274_v36 = vpop.f32.mrf.mxu1 }
 0x599   : > { %v3258_v42 = vadd.f32 %v8516_v24, %v3169_v29  ;;  %3743 = vmatmul.bf16.gmra.mxu0 %v3481_v32  ;;  %v6045_v24 = vld [vmem:[%s9060_s5] sm:$0xff] }
 0x59a   : > { %3643 = vmatpush.bf16.msrb.mxu3 %v6045_v24 }
 0x59b   : > { %v3347_v52 = vadd.f32 %v8510_v50, %v3258_v42  ;;  %v3361_v50 = vpop.f32.mrf.mxu2  ;;  %v8617_v42 = vpop.f32.mrf.mxu0 }
 0x59c   : > { %v3081_v17 = vpop.f32.mrf.mxu3 }
 0x59d   : > { %v3082_v2 = vadd.f32 %v3081_v17, %v8526_v30  ;;  %v3424_v16 = vmax.f32 %v3347_v52, 0.0 }
 0x59f   : > { %v3171_v11 = vadd.f32 %v8428_v4, %v3082_v2  ;;  %v3277_v32 = vpop.f32.mrf.mxu1 }
 0x5a1   : > { %v3260_v54 = vadd.f32 %v8537_v46, %v3171_v11  ;;  %3123 = vmatmul.bf16.gmra.mxu3 %v9312_v20 }
 0x5a3   : > { %v3349_v59 = vadd.f32 %v8532_v41, %v3260_v54  ;;  %v3363_v41 = vpop.f32.mrf.mxu2  ;;  %v8622_v17 = vpop.f32.mrf.mxu0 }
 0x5a4   : > { %v3084_v53 = vpop.f32.mrf.mxu3 }
 0x5a5   : > { %v3085_v35 = vadd.f32 %v3084_v53, %v8526_v30  ;;  %v3426_v4 = vmax.f32 %v3349_v59, 0.0 }
 0x5a7   : > { %v3483_v3 = vpack.c.bf16 %v3426_v4, %v3424_v16  ;;  %v3174_v46 = vadd.f32 %v8443_v5, %v3085_v35 }
 0x5a9   : > { %3748 = vmatmul.bf16.gmra.mxu0 %v3483_v3  ;;  %v3263_v6 = vadd.f32 %v8558_v55, %v3174_v46 }
 0x5ab   : > { %v3352_v19 = vadd.f32 %v8563_v62, %v3263_v6  ;;  %v3366_v14 = vpop.f32.mrf.mxu2  ;;  %v8628_v16 = vpop.f32.mrf.mxu0 }
 0x5ac   : > { %v3086_v18 = vpop.f32.mrf.mxu3 }
 0x5ad   : > { %v3087_v1 = vadd.f32 %v3086_v18, %v8526_v30  ;;  %v3428_v37 = vmax.f32 %v3352_v19, 0.0 }
 0x5af   : > { %v3176_v34 = vadd.f32 %v8456_v48, %v3087_v1 }
 0x5b1   : > { %v3265_v49 = vadd.f32 %v3264_v0, %v3176_v34  ;;  %3128 = vmatmul.bf16.gmra.mxu3 %v9261_v38 }
 0x5b3   : > { %v3354_v33 = vadd.f32 %v3353_v43, %v3265_v49  ;;  %v3279_v43 = vpop.f32.mrf.mxu1  ;;  %v3368_v54 = vpop.f32.mrf.mxu2 }
 0x5b4   : > { %v3089_v45 = vpop.f32.mrf.mxu3  ;;  %v8633_v34 = vpop.f32.mrf.mxu0 }
 0x5b5   : > { %v3090_v5 = vadd.f32 %v3089_v45, %v8526_v30  ;;  %v3430_v29 = vmax.f32 %v3354_v33, 0.0 }
 0x5b7   : > { %v3485_v55 = vpack.c.bf16 %v3430_v29, %v3428_v37  ;;  %v3179_v52 = vadd.f32 %v8476_v56, %v3090_v5 }
 0x5b9   : > { %3753 = vmatmul.bf16.gmra.mxu0 %v3485_v55  ;;  %v3268_v0 = vadd.f32 %v3267_v9, %v3179_v52  ;;  %v9313_v52 = vld [vmem:[#allocation32_spill] sm:$0xff] }
 0x5bb   : > { %v3357_v11 = vadd.f32 %v8583_v8, %v3268_v0  ;;  %v3371_v4 = vpop.f32.mrf.mxu2 }
 0x5bc   : > { %v3091_v48 = vpop.f32.mrf.mxu3  ;;  %v8641_v5 = vpop.f32.mrf.mxu0 }
 0x5bd   : > { %v3092_v38 = vadd.f32 %v3091_v48, %v8526_v30  ;;  %v3432_v59 = vmax.f32 %v3357_v11, 0.0  ;;  %v6065_v48 = vld [vmem:[%s9062_s7] sm:$0xff] }
 0x5be   : > { %4146 = vmatpush.bf16.msrb.mxu2 %v6065_v48 }
 0x5bf   : > { %v3181_v62 = vadd.f32 %v8498_v60, %v3092_v38  ;;  %v3282_v60 = vpop.f32.mrf.mxu1 }
 0x5c1   : > { %v3270_v2 = vadd.f32 %v3269_v47, %v3181_v62  ;;  %3133 = vmatmul.bf16.gmra.mxu3 %v9268_v25 }
 0x5c3   : > { %v3359_v20 = vadd.f32 %v3358_v15, %v3270_v2  ;;  %v3373_v33 = vpop.f32.mrf.mxu2 }
 0x5c4   : > { %v3094_v24 = vpop.f32.mrf.mxu3 }
 0x5c5   : > { %v3095_v56 = vadd.f32 %v3094_v24, %v8526_v30  ;;  %v3434_v53 = vmax.f32 %v3359_v20, 0.0  ;;  %v8649_v24 = vpop.f32.mrf.mxu0 }
 0x5c7   : > { %v3487_v9 = vpack.c.bf16 %v3434_v53, %v3432_v59  ;;  %v3184_v35 = vadd.f32 %v8518_v21, %v3095_v56  ;;  %v3284_v6 = vpop.f32.mrf.mxu1 }
 0x5c9   : > { %3758 = vmatmul.bf16.gmra.mxu0 %v3487_v9  ;;  %v3273_v3 = vadd.f32 %v3272_v57, %v3184_v35  ;;  %v9314_v9 = vld [vmem:[#allocation33_spill] sm:$0xff] }
 0x5cb   : > { %v3362_v46 = vadd.f32 %v3361_v50, %v3273_v3  ;;  %v3376_v29 = vpop.f32.mrf.mxu2 }
 0x5cc   : > { %v3096_v47 = vpop.f32.mrf.mxu3 }
 0x5cd   : > { %v3097_v25 = vadd.f32 %v3096_v47, %v8526_v30  ;;  %v3436_v49 = vmax.f32 %v3362_v46, 0.0  ;;  %v8655_v3 = vpop.f32.mrf.mxu0 }
 0x5cf   : > { %v3186_v8 = vadd.f32 %v8541_v40, %v3097_v25  ;;  %v6062_v40 = vld [vmem:[%s9061_s6 + $0x8] sm:$0xff] }
 0x5d0   : > { %3950 = vmatpush.bf16.msrb.mxu1 %v6062_v40 }
 0x5d1   : > { %v3275_v15 = vadd.f32 %v3274_v36, %v3186_v8  ;;  %3138 = vmatmul.bf16.gmra.mxu3 %v9273_v13 }
 0x5d3   : > { %v3364_v18 = vadd.f32 %v3363_v41, %v3275_v15  ;;  %v3287_v41 = vpop.f32.mrf.mxu1 }
 0x5d4   : > { %v3099_v1 = vpop.f32.mrf.mxu3 }
 0x5d5   : > { %v3100_v21 = vadd.f32 %v3099_v1, %v8526_v30  ;;  %v3438_v19 = vmax.f32 %v3364_v18, 0.0 }
 0x5d7   : > { %v3489_v45 = vpack.c.bf16 %v3438_v19, %v3436_v49  ;;  %v3189_v57 = vadd.f32 %v8550_v61, %v3100_v21 }
 0x5d9   : > { %3763 = vmatmul.bf16.gmra.mxu0 %v3489_v45  ;;  %v3278_v50 = vadd.f32 %v3277_v32, %v3189_v57  ;;  %v9315_v57 = vld [vmem:[#allocation7_spill] sm:$0xff] }
 0x5db   : > { %v3367_v61 = vadd.f32 %v3366_v14, %v3278_v50  ;;  %v3289_v20 = vpop.f32.mrf.mxu1 }
 0x5dc   : > { %v3101_v13 = vpop.f32.mrf.mxu3 }
 0x5dd   : > { %v3102_v36 = vadd.f32 %v3101_v13, %v8526_v30  ;;  %v3440_v62 = vmax.f32 %v3367_v61, 0.0 }
 0x5df   : > { %v3191_v37 = vadd.f32 %v8560_v22, %v3102_v36 }
 0x5e1   : > { %v3280_v55 = vadd.f32 %v3279_v43, %v3191_v37  ;;  %3644 = vmatmul.bf16.vlgmr.msrb.gmra.mxu3 %v9313_v52  ;;  %v3378_v43 = vpop.f32.mrf.mxu2 }
 0x5e3   : > { %v3369_v0 = vadd.f32 %v3368_v54, %v3280_v55  ;;  %v3292_v47 = vpop.f32.mrf.mxu1 }
 0x5e4   : > { %v3104_v38 = vpop.f32.mrf.mxu3 }
 0x5e5   : > { %v3105_v32 = vadd.f32 %v3104_v38, %v8526_v30  ;;  %v3442_v2 = vmax.f32 %v3369_v0, 0.0 }
 0x5e7   : > { %v3491_v11 = vpack.c.bf16 %v3442_v2, %v3440_v62  ;;  %v3194_v22 = vadd.f32 %v8573_v44, %v3105_v32 }
 0x5e9   : > { %3768 = vmatmul.bf16.gmra.mxu0 %v3491_v11  ;;  %v3283_v56 = vadd.f32 %v3282_v60, %v3194_v22  ;;  %v3381_v8 = vpop.f32.mrf.mxu2  ;;  %v9316_v11 = vld [vmem:[#allocation34_spill] sm:$0xff] }
 0x5eb   : > { %v3372_v35 = vadd.f32 %v3371_v4, %v3283_v56  ;;  %v3294_v21 = vpop.f32.mrf.mxu1 }
 0x5ec   : > { %v3106_v14 = vpop.f32.mrf.mxu3 }
 0x5ed   : > { %v3107_v59 = vadd.f32 %v3106_v14, %v8526_v30  ;;  %v3444_v46 = vmax.f32 %v3372_v35, 0.0 }
 0x5ef   : > { %v3196_v54 = vadd.f32 %v8580_v39, %v3107_v59 }
 0x5f1   : > { %v3285_v53 = vadd.f32 %v3284_v6, %v3196_v54  ;;  %3649 = vmatmul.bf16.gmra.mxu3 %v9314_v9  ;;  %v8659_v6 = vpop.f32.mrf.mxu0  ;;  %v3383_v19 = vpop.f32.mrf.mxu2 }
 0x5f3   : > { %v3374_v25 = vadd.f32 %v3373_v33, %v3285_v53  ;;  %v3297_v55 = vpop.f32.mrf.mxu1 }
 0x5f4   : > { %v3109_v15 = vpop.f32.mrf.mxu3 }
 0x5f5   : > { %v3110_v44 = vadd.f32 %v3109_v15, %v8526_v30  ;;  %v3446_v18 = vmax.f32 %v3374_v25, 0.0 }
 0x5f7   : > { %v3493_v1 = vpack.c.bf16 %v3446_v18, %v3444_v46  ;;  %v3199_v60 = vadd.f32 %v8590_v12, %v3110_v44  ;;  %v9317_v18 = vld [vmem:[#allocation41_spill] sm:$0xff] }
 0x5f9   : > { %3773 = vmatmul.bf16.gmra.mxu0 %v3493_v1  ;;  %v3288_v49 = vadd.f32 %v3287_v41, %v3199_v60  ;;  %v8665_v52 = vpop.f32.mrf.mxu0  ;;  %v3386_v41 = vpop.f32.mrf.mxu2 }
 0x5fb   : > { %v3377_v40 = vadd.f32 %v3376_v29, %v3288_v49  ;;  %v3299_v32 = vpop.f32.mrf.mxu1 }
 0x5fc   : > { %v3111_v39 = vpop.f32.mrf.mxu3 }
 0x5fd   : > { %v3112_v4 = vadd.f32 %v3111_v39, %v8526_v30  ;;  %v3448_v12 = vmax.f32 %v3377_v40, 0.0 }
 0x5ff   : > { %v3201_v33 = vadd.f32 %v8604_v58, %v3112_v4 }
 0x601   : > { %v3290_v45 = vadd.f32 %v3289_v20, %v3201_v33  ;;  %3654 = vmatmul.bf16.gmra.mxu3 %v9315_v57  ;;  %v8670_v62 = vpop.f32.mrf.mxu0  ;;  %v3388_v22 = vpop.f32.mrf.mxu2 }
 0x603   : > { %v3379_v13 = vadd.f32 %v3378_v43, %v3290_v45  ;;  %v3302_v9 = vpop.f32.mrf.mxu1 }
 0x604   : > { %v3114_v50 = vpop.f32.mrf.mxu3 }
 0x605   : > { %v3115_v36 = vadd.f32 %v3114_v50, %v8526_v30  ;;  %v3450_v37 = vmax.f32 %v3379_v13, 0.0 }
 0x607   : > { %v3495_v61 = vpack.c.bf16 %v3450_v37, %v3448_v12  ;;  %v3204_v48 = vadd.f32 %v8609_v26, %v3115_v36 }
 0x609   : > { %3778 = vmatmul.bf16.gmra.mxu0 %v3495_v61  ;;  %v3293_v58 = vadd.f32 %v3292_v47, %v3204_v48  ;;  %v8678_v35 = vpop.f32.mrf.mxu0  ;;  %v3391_v47 = vpop.f32.mrf.mxu2  ;;  %v9318_v61 = vld [vmem:[#allocation8_spill] sm:$0xff] }
 0x60b   : > { %v3382_v20 = vadd.f32 %v3381_v8, %v3293_v58 }
 0x60c   : > { %v3116_v0 = vpop.f32.mrf.mxu3 }
 0x60d   : > { %v3117_v38 = vadd.f32 %v3116_v0, %v8526_v30  ;;  %v3452_v26 = vmax.f32 %v3382_v20, 0.0 }
 0x60f   : > { %v3206_v29 = vadd.f32 %v8617_v42, %v3117_v38  ;;  %v6061_v42 = vld [vmem:[%s9061_s6] sm:$0xff] }
 0x610   : > { %3951 = vmatpush.bf16.msrb.mxu1 %v6061_v42 }
 0x611   : > { %v3295_v2 = vadd.f32 %v3294_v21, %v3206_v29  ;;  %3659 = vmatmul.bf16.gmra.mxu3 %v9316_v11  ;;  %v8683_v1 = vpop.f32.mrf.mxu0  ;;  %v3304_v21 = vpop.f32.mrf.mxu1 }
 0x612   : > { %v3393_v33 = vpop.f32.mrf.mxu2 }
 0x613   : > { %v3384_v43 = vadd.f32 %v3383_v19, %v3295_v2 }
 0x614   : > { %v3119_v14 = vpop.f32.mrf.mxu3 }
 0x615   : > { %v3120_v56 = vadd.f32 %v3119_v14, %v8526_v30  ;;  %v3454_v59 = vmax.f32 %v3384_v43, 0.0 }
 0x617   : > { %v3497_v54 = vpack.c.bf16 %v3454_v59, %v3452_v26  ;;  %v3209_v53 = vadd.f32 %v8622_v17, %v3120_v56  ;;  %v9319_v59 = vld [vmem:[#allocation5_spill] sm:$0xff] }
 0x619   : > { %3783 = vmatmul.bf16.gmra.mxu0 %v3497_v54  ;;  %v3298_v8 = vadd.f32 %v3297_v55, %v3209_v53  ;;  %v3307_v36 = vpop.f32.mrf.mxu1 }
 0x61a   : > { %v3396_v37 = vpop.f32.mrf.mxu2 }
 0x61b   : > { %v3387_v17 = vadd.f32 %v3386_v41, %v3298_v8 }
 0x61c   : > { %v3121_v25 = vpop.f32.mrf.mxu3 }
 0x61d   : > { %v3122_v15 = vadd.f32 %v3121_v25, %v8526_v30  ;;  %v3456_v4 = vmax.f32 %v3387_v17, 0.0 }
 0x61f   : > { %v3211_v44 = vadd.f32 %v8628_v16, %v3122_v15  ;;  %v8687_v16 = vpop.f32.mrf.mxu0 }
 0x621   : > { %v3300_v46 = vadd.f32 %v3299_v32, %v3211_v44  ;;  %3664 = vmatmul.bf16.gmra.mxu3 %v9317_v18  ;;  %v3309_v2 = vpop.f32.mrf.mxu1 }
 0x622   : > { %v3398_v20 = vpop.f32.mrf.mxu2 }
 0x623   : > { %v3389_v60 = vadd.f32 %v3388_v22, %v3300_v46 }
 0x624   : > { %v3124_v39 = vpop.f32.mrf.mxu3 }
 0x625   : > { %v3125_v49 = vadd.f32 %v3124_v39, %v8526_v30  ;;  %v3458_v19 = vmax.f32 %v3389_v60, 0.0 }
 0x627   : > { %v3499_v45 = vpack.c.bf16 %v3458_v19, %v3456_v4  ;;  %v3214_v57 = vadd.f32 %v8633_v34, %v3125_v49  ;;  %v8693_v29 = vpop.f32.mrf.mxu0 }
 0x629   : > { %3788 = vmatmul.bf16.gmra.mxu0 %v3499_v45  ;;  %v3303_v13 = vadd.f32 %v3302_v9, %v3214_v57  ;;  %v3312_v53 = vpop.f32.mrf.mxu1 }
 0x62a   : > { %v3401_v9 = vpop.f32.mrf.mxu2 }
 0x62b   : > { %v3392_v41 = vadd.f32 %v3391_v47, %v3303_v13 }
 0x62c   : > { %v3126_v40 = vpop.f32.mrf.mxu3 }
 0x62d   : > { %v3127_v50 = vadd.f32 %v3126_v40, %v8526_v30  ;;  %v3460_v34 = vmax.f32 %v3392_v41, 0.0 }
 0x62f   : > { %v3216_v12 = vadd.f32 %v8641_v5, %v3127_v50  ;;  %v8698_v56 = vpop.f32.mrf.mxu0 }
 0x631   : > { %v3305_v55 = vadd.f32 %v3304_v21, %v3216_v12  ;;  %3669 = vmatmul.bf16.gmra.mxu3 %v9318_v61 }
 0x632   : > { %v3403_v21 = vpop.f32.mrf.mxu2 }
 0x633   : > { %v3394_v48 = vadd.f32 %v3393_v33, %v3305_v55 }
 0x634   : > { %v3129_v0 = vpop.f32.mrf.mxu3 }
 0x635   : > { %v3130_v58 = vadd.f32 %v3129_v0, %v8526_v30  ;;  %v3462_v38 = vmax.f32 %v3394_v48, 0.0  ;;  %v9320_v0 = vld [vmem:[#allocation42_spill] sm:$0xff] }
 0x637   : > { %v3501_v32 = vpack.c.bf16 %v3462_v38, %v3460_v34  ;;  %v3219_v11 = vadd.f32 %v8649_v24, %v3130_v58  ;;  %v8703_v46 = vpop.f32.mrf.mxu0 }
 0x639   : > { %3793 = vmatmul.bf16.gmra.mxu0 %v3501_v32  ;;  %v3308_v22 = vadd.f32 %v3307_v36, %v3219_v11 }
 0x63a   : > { %v3406_v36 = vpop.f32.mrf.mxu2 }
 0x63b   : > { %v3397_v54 = vadd.f32 %v3396_v37, %v3308_v22 }
 0x63c   : > { %v3131_v5 = vpop.f32.mrf.mxu3 }
 0x63d   : > { %v3132_v43 = vadd.f32 %v3131_v5, %v8526_v30  ;;  %v3464_v25 = vmax.f32 %v3397_v54, 0.0 }
 0x63f   : > { %v3221_v14 = vadd.f32 %v8655_v3, %v3132_v43  ;;  %v3314_v3 = vpop.f32.mrf.mxu1  ;;  %v3746_v45 = vpop.f32.mrf.mxu0 }
 0x641   : > { %v3310_v26 = vadd.f32 %v3309_v2, %v3221_v14  ;;  %3674 = vmatmul.bf16.gmra.mxu3 %v9319_v59 }
 0x642   : > { %v3408_v34 = vpop.f32.mrf.mxu2 }
 0x643   : > { %v3399_v42 = vadd.f32 %v3398_v20, %v3310_v26 }
 0x644   : > { %v3134_v47 = vpop.f32.mrf.mxu3 }
 0x645   : > { %v3135_v24 = vadd.f32 %v3134_v47, %v8526_v30  ;;  %v3466_v8 = vmax.f32 %v3399_v42, 0.0 }
 0x647   : > { %v3503_v15 = vpack.c.bf16 %v3466_v8, %v3464_v25  ;;  %v3224_v44 = vadd.f32 %v8659_v6, %v3135_v24  ;;  %v3317_v13 = vpop.f32.mrf.mxu1  ;;  %v3749_v61 = vpop.f32.mrf.mxu0 }
 0x649   : > { %3798 = vmatmul.bf16.gmra.mxu0 %v3503_v15  ;;  %v3313_v17 = vadd.f32 %v3312_v53, %v3224_v44 }
 0x64b   : > { %v3402_v4 = vadd.f32 %v3401_v9, %v3313_v17 }
 0x64c   : > { %v3136_v18 = vpop.f32.mrf.mxu3 }
 0x64d   : > { %v3137_v60 = vadd.f32 %v3136_v18, %v8526_v30  ;;  %v3468_v57 = vmax.f32 %v3402_v4, 0.0 }
 0x64f   : > { %v3226_v39 = vadd.f32 %v8665_v52, %v3137_v60  ;;  %v3319_v41 = vpop.f32.mrf.mxu1 }
 0x651   : > { %v3315_v49 = vadd.f32 %v3314_v3, %v3226_v39  ;;  %3679 = vmatmul.bf16.gmra.mxu3 %v8310_v10 }
 0x653   : > { %v3404_v19 = vadd.f32 %v3403_v21, %v3315_v49 }
 0x654   : > { %v3139_v33 = vpop.f32.mrf.mxu3 }
 0x655   : > { %v3140_v6 = vadd.f32 %v3139_v33, %v8526_v30  ;;  %v3470_v40 = vmax.f32 %v3404_v19, 0.0 }
 0x657   : > { %v3505_v50 = vpack.c.bf16 %v3470_v40, %v3468_v57  ;;  %v3229_v12 = vadd.f32 %v8670_v62, %v3140_v6  ;;  %v8716_v62 = vld [vmem:[%s9064_s9 + $0x4] ss:$0 sm:$0xff] }
 0x659   : > { %3803 = vmatmul.bf16.gmra.mxu0 %v3505_v50  ;;  %v3318_v55 = vadd.f32 %v3317_v13, %v3229_v12 }
 0x65b   : > { %v3407_v58 = vadd.f32 %v3406_v36, %v3318_v55 }
 0x65c   : > { %v3141_v37 = vpop.f32.mrf.mxu3 }
 0x65d   : > { %v3142_v52 = vadd.f32 %v3141_v37, %v8526_v30  ;;  %v3472_v2 = vmax.f32 %v3407_v58, 0.0  ;;  %v3751_v30 = vpop.f32.mrf.mxu0 }
 0x65f   : > { %v3231_v10 = vadd.f32 %v8678_v35, %v3142_v52 }
 0x661   : > { %v3320_v48 = vadd.f32 %v3319_v41, %v3231_v10  ;;  %3684 = vmatmul.bf16.gmra.mxu3 %v9320_v0 }
 0x663   : > { %v3409_v38 = vadd.f32 %v3408_v34, %v3320_v48 }
 0x664   : > { %v3645_v32 = vpop.f32.mrf.mxu3 }
 0x665   : > { %v3474_v11 = vmax.f32 %v3409_v38, 0.0  ;;  %v3646_v5 = vadd.f32 %v3645_v32, %v8716_v62  ;;  %v3754_v42 = vpop.f32.mrf.mxu0 }
 0x667   : > { %v3507_v20 = vpack.c.bf16 %v3474_v11, %v3472_v2  ;;  %v3735_v22 = vadd.f32 %v8683_v1, %v3646_v5 }
 0x669   : > { %3808 = vmatmul.bf16.gmra.mxu0 %v3507_v20  ;;  %v3814_v26 = vmax.f32 %v3735_v22, 0.0 }
 0x66c   : > { %v3647_v35 = vpop.f32.mrf.mxu3 }
 0x66d   : > { %v3648_v43 = vadd.f32 %v3647_v35, %v8716_v62 }
 0x66f   : > { %v3737_v14 = vadd.f32 %v8687_v16, %v3648_v43 }
 0x671   : > { %v3815_v59 = vmax.f32 %v3737_v14, 0.0  ;;  %3689 = vmatmul.bf16.gmra.mxu3 %v8364_v28  ;;  %v3756_v28 = vpop.f32.mrf.mxu0 }
 0x673   : > { %v3847_v54 = vpack.c.bf16 %v3815_v59, %v3814_v26 }
 0x674   : > { %v3650_v53 = vpop.f32.mrf.mxu3 }
 0x675   : > { %5829 = vmatmul.msk.bf16.vlgmr.msrb.gmra.mxu1 %vm3895_vm1, %v3847_v54  ;;  %v3651_v9 = vadd.f32 %v3650_v53, %v8716_v62 }
 0x677   : > { %v3740_v24 = vadd.f32 %v8693_v29, %v3651_v9 }
 0x679   : > { %v3816_v16 = vmax.f32 %v3740_v24, 0.0  ;;  %v3759_v18 = vpop.f32.mrf.mxu0 }
 0x67c   : > { %v3652_v47 = vpop.f32.mrf.mxu3 }
 0x67d   : > { %v3653_v1 = vadd.f32 %v3652_v47, %v8716_v62 }
 0x67f   : > { %v3742_v25 = vadd.f32 %v8698_v56, %v3653_v1 }
 0x681   : > { %v3817_v8 = vmax.f32 %v3742_v25, 0.0  ;;  %3694 = vmatmul.bf16.gmra.mxu3 %v8393_v23  ;;  %v3761_v4 = vpop.f32.mrf.mxu0 }
 0x683   : > { %v3848_v15 = vpack.c.bf16 %v3817_v8, %v3816_v16 }
 0x684   : > { %v3655_v44 = vpop.f32.mrf.mxu3 }
 0x685   : > { %5830 = vmatmul.msk.bf16.gmra.mxu1 %vm3895_vm1, %v3848_v15  ;;  %v3656_v3 = vadd.f32 %v3655_v44, %v8716_v62 }
 0x687   : > { %v3745_v60 = vadd.f32 %v8703_v46, %v3656_v3 }
 0x689   : > { %v3818_v39 = vmax.f32 %v3745_v60, 0.0  ;;  %v3764_v46 = vpop.f32.mrf.mxu0 }
 0x68c   : > { %v3657_v17 = vpop.f32.mrf.mxu3 }
 0x68d   : > { %v3658_v29 = vadd.f32 %v3657_v17, %v8716_v62 }
 0x68f   : > { %v3747_v21 = vadd.f32 %v3746_v45, %v3658_v29 }
 0x691   : > { %v3819_v56 = vmax.f32 %v3747_v21, 0.0  ;;  %3699 = vmatmul.bf16.gmra.mxu3 %v8420_v7  ;;  %v3766_v12 = vpop.f32.mrf.mxu0 }
 0x693   : > { %v3849_v49 = vpack.c.bf16 %v3819_v56, %v3818_v39 }
 0x694   : > { %v3660_v23 = vpop.f32.mrf.mxu3 }
 0x695   : > { %5831 = vmatmul.msk.bf16.gmra.mxu1 %vm3895_vm1, %v3849_v49  ;;  %v3661_v19 = vadd.f32 %v3660_v23, %v8716_v62 }
 0x697   : > { %v3750_v6 = vadd.f32 %v3749_v61, %v3661_v19 }
 0x699   : > { %v3820_v13 = vmax.f32 %v3750_v6, 0.0  ;;  %v3769_v0 = vpop.f32.mrf.mxu0 }
 0x69c   : > { %v3662_v33 = vpop.f32.mrf.mxu3 }
 0x69d   : > { %v3663_v57 = vadd.f32 %v3662_v33, %v8716_v62  ;;  %v8760_v33 = vld [vmem:[%s9064_s9 + $0x5] ss:$0 sm:$0xff] }
 0x69f   : > { %v3752_v40 = vadd.f32 %v3751_v30, %v3663_v57 }
 0x6a1   : > { %v3821_v50 = vmax.f32 %v3752_v40, 0.0  ;;  %3704 = vmatmul.bf16.gmra.mxu3 %v8447_v51  ;;  %v3771_v2 = vpop.f32.mrf.mxu0 }
 0x6a3   : > { %v3850_v45 = vpack.c.bf16 %v3821_v50, %v3820_v13 }
 0x6a4   : > { %v3665_v36 = vpop.f32.mrf.mxu3 }
 0x6a5   : > { %5832 = vmatmul.msk.bf16.gmra.mxu1 %vm3895_vm1, %v3850_v45  ;;  %v3666_v7 = vadd.f32 %v3665_v36, %v8716_v62 }
 0x6a7   : > { %v3755_v55 = vadd.f32 %v3754_v42, %v3666_v7 }
 0x6a9   : > { %v3822_v10 = vmax.f32 %v3755_v55, 0.0 }
 0x6ac   : > { %v3667_v37 = vpop.f32.mrf.mxu3 }
 0x6ad   : > { %v3668_v52 = vadd.f32 %v3667_v37, %v8716_v62 }
 0x6af   : > { %v3757_v61 = vadd.f32 %v3756_v28, %v3668_v52 }
 0x6b1   : > { %v3823_v41 = vmax.f32 %v3757_v61, 0.0  ;;  %3709 = vmatmul.bf16.gmra.mxu3 %v8474_v27  ;;  %v3774_v27 = vpop.f32.mrf.mxu0 }
 0x6b3   : > { %v3851_v48 = vpack.c.bf16 %v3823_v41, %v3822_v10 }
 0x6b4   : > { %v3670_v58 = vpop.f32.mrf.mxu3 }
 0x6b5   : > { %5833 = vmatmul.msk.bf16.gmra.mxu1 %vm3895_vm1, %v3851_v48  ;;  %v3671_v51 = vadd.f32 %v3670_v58, %v8716_v62 }
 0x6b7   : > { %v3760_v38 = vadd.f32 %v3759_v18, %v3671_v51 }
 0x6b9   : > { %v3824_v20 = vmax.f32 %v3760_v38, 0.0  ;;  %v3776_v42 = vpop.f32.mrf.mxu0 }
 0x6bc   : > { %v3672_v34 = vpop.f32.mrf.mxu3 }
 0x6bd   : > { %v3673_v32 = vadd.f32 %v3672_v34, %v8716_v62 }
 0x6bf   : > { %v3762_v11 = vadd.f32 %v3761_v4, %v3673_v32 }
 0x6c1   : > { %v3825_v30 = vmax.f32 %v3762_v11, 0.0  ;;  %3714 = vmatmul.bf16.gmra.mxu3 %v8508_v63  ;;  %v3779_v24 = vpop.f32.mrf.mxu0 }
 0x6c3   : > { %v3852_v5 = vpack.c.bf16 %v3825_v30, %v3824_v20 }
 0x6c4   : > { %v3675_v35 = vpop.f32.mrf.mxu3 }
 0x6c5   : > { %5834 = vmatmul.msk.bf16.gmra.mxu1 %vm3895_vm1, %v3852_v5  ;;  %v3676_v22 = vadd.f32 %v3675_v35, %v8716_v62 }
 0x6c7   : > { %v3765_v14 = vadd.f32 %v3764_v46, %v3676_v22 }
 0x6c9   : > { %v3826_v54 = vmax.f32 %v3765_v14, 0.0 }
 0x6cc   : > { %v3677_v43 = vpop.f32.mrf.mxu3 }
 0x6cd   : > { %v3678_v26 = vadd.f32 %v3677_v43, %v8716_v62 }
 0x6cf   : > { %v3767_v59 = vadd.f32 %v3766_v12, %v3678_v26 }
 0x6d1   : > { %v3827_v53 = vmax.f32 %v3767_v59, 0.0  ;;  %3719 = vmatmul.bf16.gmra.mxu3 %v8544_v31  ;;  %v3781_v31 = vpop.f32.mrf.mxu0 }
 0x6d3   : > { %v3853_v9 = vpack.c.bf16 %v3827_v53, %v3826_v54 }
 0x6d4   : > { %v3680_v47 = vpop.f32.mrf.mxu3 }
 0x6d5   : > { %5835 = vmatmul.msk.bf16.gmra.mxu1 %vm3895_vm1, %v3853_v9  ;;  %v3681_v63 = vadd.f32 %v3680_v47, %v8716_v62 }
 0x6d7   : > { %v3770_v25 = vadd.f32 %v3769_v0, %v3681_v63 }
 0x6d9   : > { %v3828_v28 = vmax.f32 %v3770_v25, 0.0  ;;  %v3784_v39 = vpop.f32.mrf.mxu0 }
 0x6dc   : > { %v3682_v1 = vpop.f32.mrf.mxu3 }
 0x6dd   : > { %v3683_v16 = vadd.f32 %v3682_v1, %v8716_v62 }
 0x6df   : > { %v3772_v8 = vadd.f32 %v3771_v2, %v3683_v16 }
 0x6e1   : > { %v3829_v15 = vmax.f32 %v3772_v8, 0.0  ;;  %v3786_v40 = vpop.f32.mrf.mxu0 }
 0x6e3   : > { %v3854_v44 = vpack.c.bf16 %v3829_v15, %v3828_v28 }
 0x6e4   : > { %v3685_v3 = vpop.f32.mrf.mxu3 }
 0x6e5   : > { %5836 = vmatmul.msk.bf16.gmra.mxu1 %vm3895_vm1, %v3854_v44  ;;  %v3686_v18 = vadd.f32 %v3685_v3, %v8716_v62 }
 0x6e7   : > { %v3775_v60 = vadd.f32 %v3774_v27, %v3686_v18 }
 0x6e9   : > { %v3830_v56 = vmax.f32 %v3775_v60, 0.0  ;;  %v3789_v48 = vpop.f32.mrf.mxu0 }
 0x6ec   : > { %v3687_v17 = vpop.f32.mrf.mxu3 }
 0x6ed   : > { %v3688_v29 = vadd.f32 %v3687_v17, %v8716_v62 }
 0x6ef   : > { %v3777_v21 = vadd.f32 %v3776_v42, %v3688_v29 }
 0x6f1   : > { %v3831_v49 = vmax.f32 %v3777_v21, 0.0  ;;  %v3791_v5 = vpop.f32.mrf.mxu0 }
 0x6f2   : > { %v3953_v23 = vpop.f32.mrf.mxu1 }
 0x6f3   : > { %v3855_v4 = vpack.c.bf16 %v3831_v49, %v3830_v56  ;;  %v3954_v6 = vadd.f32 %v3953_v23, %v8760_v33 }
 0x6f4   : > { %v3690_v19 = vpop.f32.mrf.mxu3 }
 0x6f5   : > { %5837 = vmatmul.msk.bf16.gmra.mxu1 %vm3895_vm1, %v3855_v4  ;;  %v3691_v57 = vadd.f32 %v3690_v19, %v8716_v62  ;;  %v4033_v45 = vmax.f32 %v3954_v6, 0.0 }
 0x6f7   : > { %v3780_v36 = vadd.f32 %v3779_v24, %v3691_v57 }
 0x6f9   : > { %v3832_v52 = vmax.f32 %v3780_v36, 0.0  ;;  %v3794_v54 = vpop.f32.mrf.mxu0 }
 0x6fa   : > { %v3955_v46 = vpop.f32.mrf.mxu1 }
 0x6fb   : > { %v3956_v13 = vadd.f32 %v3955_v46, %v8760_v33 }
 0x6fc   : > { %v3692_v50 = vpop.f32.mrf.mxu3 }
 0x6fd   : > { %v4034_v7 = vmax.f32 %v3956_v13, 0.0  ;;  %v3693_v12 = vadd.f32 %v3692_v50, %v8716_v62 }
 0x6ff   : > { %v4066_v37 = vpack.c.bf16 %v4034_v7, %v4033_v45  ;;  %v3782_v55 = vadd.f32 %v3781_v31, %v3693_v12 }
 0x701   : > { %v3833_v61 = vmax.f32 %v3782_v55, 0.0  ;;  %5849 = vmatmul.msk.bf16.vlgmr.msrb.gmra.mxu2 %vm4090_vm2, %v4066_v37  ;;  %v3796_v3 = vpop.f32.mrf.mxu0 }
 0x702   : > { %v3958_v10 = vpop.f32.mrf.mxu1 }
 0x703   : > { %v3856_v41 = vpack.c.bf16 %v3833_v61, %v3832_v52  ;;  %v3959_v58 = vadd.f32 %v3958_v10, %v8760_v33 }
 0x704   : > { %v3695_v0 = vpop.f32.mrf.mxu3 }
 0x705   : > { %5838 = vmatmul.msk.bf16.gmra.mxu1 %vm3895_vm1, %v3856_v41  ;;  %v3696_v51 = vadd.f32 %v3695_v0, %v8716_v62  ;;  %v4035_v2 = vmax.f32 %v3959_v58, 0.0 }
 0x707   : > { %v3785_v11 = vadd.f32 %v3784_v39, %v3696_v51 }
 0x709   : > { %v3834_v22 = vmax.f32 %v3785_v11, 0.0  ;;  %v3799_v56 = vpop.f32.mrf.mxu0 }
 0x70a   : > { %v3960_v34 = vpop.f32.mrf.mxu1 }
 0x70b   : > { %v3961_v38 = vadd.f32 %v3960_v34, %v8760_v33 }
 0x70c   : > { %v3697_v32 = vpop.f32.mrf.mxu3 }
 0x70d   : > { %v4036_v20 = vmax.f32 %v3961_v38, 0.0  ;;  %v3698_v30 = vadd.f32 %v3697_v32, %v8716_v62 }
 0x70f   : > { %v4067_v35 = vpack.c.bf16 %v4036_v20, %v4035_v2  ;;  %v3787_v27 = vadd.f32 %v3786_v40, %v3698_v30 }
 0x711   : > { %v3835_v43 = vmax.f32 %v3787_v27, 0.0  ;;  %5850 = vmatmul.msk.bf16.gmra.mxu2 %vm4090_vm2, %v4067_v35  ;;  %v3801_v7 = vpop.f32.mrf.mxu0 }
 0x712   : > { %v3963_v14 = vpop.f32.mrf.mxu1 }
 0x713   : > { %v3857_v26 = vpack.c.bf16 %v3835_v43, %v3834_v22  ;;  %v3964_v53 = vadd.f32 %v3963_v14, %v8760_v33 }
 0x714   : > { %v3700_v59 = vpop.f32.mrf.mxu3 }
 0x715   : > { %5839 = vmatmul.msk.bf16.gmra.mxu1 %vm3895_vm1, %v3857_v26  ;;  %v3701_v42 = vadd.f32 %v3700_v59, %v8716_v62  ;;  %v4037_v24 = vmax.f32 %v3964_v53, 0.0 }
 0x717   : > { %v3790_v1 = vadd.f32 %v3789_v48, %v3701_v42 }
 0x719   : > { %v3836_v15 = vmax.f32 %v3790_v1, 0.0  ;;  %v3804_v34 = vpop.f32.mrf.mxu0 }
 0x71a   : > { %v3965_v9 = vpop.f32.mrf.mxu1 }
 0x71b   : > { %v3966_v47 = vadd.f32 %v3965_v9, %v8760_v33 }
 0x71c   : > { %v3702_v63 = vpop.f32.mrf.mxu3 }
 0x71d   : > { %v4038_v25 = vmax.f32 %v3966_v47, 0.0  ;;  %v3703_v16 = vadd.f32 %v3702_v63, %v8716_v62 }
 0x71f   : > { %v4068_v8 = vpack.c.bf16 %v4038_v25, %v4037_v24  ;;  %v3792_v28 = vadd.f32 %v3791_v5, %v3703_v16 }
 0x721   : > { %v3837_v44 = vmax.f32 %v3792_v28, 0.0  ;;  %5851 = vmatmul.msk.bf16.gmra.mxu2 %vm4090_vm2, %v4068_v8  ;;  %v3806_v35 = vpop.f32.mrf.mxu0 }
 0x722   : > { %v3968_v31 = vpop.f32.mrf.mxu1 }
 0x723   : > { %v3858_v18 = vpack.c.bf16 %v3837_v44, %v3836_v15  ;;  %v3969_v60 = vadd.f32 %v3968_v31, %v8760_v33 }
 0x724   : > { %v3705_v17 = vpop.f32.mrf.mxu3 }
 0x725   : > { %5840 = vmatmul.msk.bf16.gmra.mxu1 %vm3895_vm1, %v3858_v18  ;;  %v3706_v29 = vadd.f32 %v3705_v17, %v8716_v62  ;;  %v4039_v23 = vmax.f32 %v3969_v60, 0.0 }
 0x727   : > { %v3795_v4 = vadd.f32 %v3794_v54, %v3706_v29 }
 0x729   : > { %v3838_v46 = vmax.f32 %v3795_v4, 0.0  ;;  %v3809_v1 = vpop.f32.mrf.mxu0 }
 0x72a   : > { %v3970_v21 = vpop.f32.mrf.mxu1 }
 0x72b   : > { %v3971_v39 = vadd.f32 %v3970_v21, %v8760_v33 }
 0x72c   : > { %v3707_v49 = vpop.f32.mrf.mxu3 }
 0x72d   : > { %v4040_v19 = vmax.f32 %v3971_v39, 0.0  ;;  %v3708_v6 = vadd.f32 %v3707_v49, %v8716_v62 }
 0x72f   : > { %v4069_v57 = vpack.c.bf16 %v4040_v19, %v4039_v23  ;;  %v3797_v40 = vadd.f32 %v3796_v3, %v3708_v6 }
 0x731   : > { %v3839_v13 = vmax.f32 %v3797_v40, 0.0  ;;  %5852 = vmatmul.msk.bf16.gmra.mxu2 %vm4090_vm2, %v4069_v57  ;;  %v3811_v60 = vpop.f32.mrf.mxu0 }
 0x732   : > { %v3973_v50 = vpop.f32.mrf.mxu1 }
 0x733   : > { %v3859_v45 = vpack.c.bf16 %v3839_v13, %v3838_v46  ;;  %v3974_v12 = vadd.f32 %v3973_v50, %v8760_v33 }
 0x734   : > { %v3710_v36 = vpop.f32.mrf.mxu3 }
 0x735   : > { %5841 = vmatmul.msk.bf16.gmra.mxu1 %vm3895_vm1, %v3859_v45  ;;  %v3711_v37 = vadd.f32 %v3710_v36, %v8716_v62  ;;  %v4041_v10 = vmax.f32 %v3974_v12, 0.0 }
 0x737   : > { %v3800_v41 = vadd.f32 %v3799_v56, %v3711_v37 }
 0x739   : > { %v3840_v38 = vmax.f32 %v3800_v41, 0.0 }
 0x73a   : > { %v3975_v55 = vpop.f32.mrf.mxu1 }
 0x73b   : > { %v3976_v52 = vadd.f32 %v3975_v55, %v8760_v33  ;;  %v8813_v55 = vld [vmem:[%s9064_s9 + $0x6] ss:$0 sm:$0xff] }
 0x73c   : > { %v3712_v61 = vpop.f32.mrf.mxu3 }
 0x73d   : > { %v4042_v48 = vmax.f32 %v3976_v52, 0.0  ;;  %v3713_v0 = vadd.f32 %v3712_v61, %v8716_v62 }
 0x73f   : > { %v4070_v58 = vpack.c.bf16 %v4042_v48, %v4041_v10  ;;  %v3802_v51 = vadd.f32 %v3801_v7, %v3713_v0  ;;  %v8819_v10 = vld [vmem:[%s9063_s8] ss:$0 sm:$0xff] }
 0x741   : > { %v3841_v32 = vmax.f32 %v3802_v51, 0.0  ;;  %5853 = vmatmul.msk.bf16.gmra.mxu2 %vm4090_vm2, %v4070_v58 }
 0x742   : > { %v3978_v2 = vpop.f32.mrf.mxu1 }
 0x743   : > { %v3860_v11 = vpack.c.bf16 %v3841_v32, %v3840_v38  ;;  %v3979_v30 = vadd.f32 %v3978_v2, %v8760_v33 }
 0x744   : > { %v3715_v20 = vpop.f32.mrf.mxu3 }
 0x745   : > { %5842 = vmatmul.msk.bf16.gmra.mxu1 %vm3895_vm1, %v3860_v11  ;;  %v3716_v5 = vadd.f32 %v3715_v20, %v8716_v62  ;;  %v4043_v14 = vmax.f32 %v3979_v30, 0.0 }
 0x747   : > { %v3805_v26 = vadd.f32 %v3804_v34, %v3716_v5 }
 0x749   : > { %v3842_v9 = vmax.f32 %v3805_v26, 0.0 }
 0x74a   : > { %v3980_v27 = vpop.f32.mrf.mxu1 }
 0x74b   : > { %v3981_v22 = vadd.f32 %v3980_v27, %v8760_v33 }
 0x74c   : > { %v3717_v43 = vpop.f32.mrf.mxu3 }
 0x74d   : > { %v4044_v59 = vmax.f32 %v3981_v22, 0.0  ;;  %v3718_v54 = vadd.f32 %v3717_v43, %v8716_v62 }
 0x74f   : > { %v4071_v53 = vpack.c.bf16 %v4044_v59, %v4043_v14  ;;  %v3807_v42 = vadd.f32 %v3806_v35, %v3718_v54 }
 0x751   : > { %v3843_v47 = vmax.f32 %v3807_v42, 0.0  ;;  %5854 = vmatmul.msk.bf16.gmra.mxu2 %vm4090_vm2, %v4071_v53 }
 0x752   : > { %v3983_v63 = vpop.f32.mrf.mxu1 }
 0x753   : > { %v3861_v24 = vpack.c.bf16 %v3843_v47, %v3842_v9  ;;  %v3984_v16 = vadd.f32 %v3983_v63, %v8760_v33 }
 0x754   : > { %v3720_v25 = vpop.f32.mrf.mxu3 }
 0x755   : > { %5843 = vmatmul.msk.bf16.gmra.mxu1 %vm3895_vm1, %v3861_v24  ;;  %v3721_v8 = vadd.f32 %v3720_v25, %v8716_v62  ;;  %v4045_v3 = vmax.f32 %v3984_v16, 0.0 }
 0x757   : > { %v3810_v31 = vadd.f32 %v3809_v1, %v3721_v8 }
 0x759   : > { %v3844_v39 = vmax.f32 %v3810_v31, 0.0 }
 0x75a   : > { %v3985_v28 = vpop.f32.mrf.mxu1 }
 0x75b   : > { %v3986_v15 = vadd.f32 %v3985_v28, %v8760_v33 }
 0x75c   : > { %v3722_v44 = vpop.f32.mrf.mxu3 }
 0x75d   : > { %v4046_v18 = vmax.f32 %v3986_v15, 0.0  ;;  %v3723_v17 = vadd.f32 %v3722_v44, %v8716_v62 }
 0x75f   : > { %v4072_v29 = vpack.c.bf16 %v4046_v18, %v4045_v3  ;;  %v3812_v21 = vadd.f32 %v3811_v60, %v3723_v17 }
 0x761   : > { %v3845_v56 = vmax.f32 %v3812_v21, 0.0  ;;  %5855 = vmatmul.msk.bf16.gmra.mxu2 %vm4090_vm2, %v4072_v29 }
 0x762   : > { %v3988_v49 = vpop.f32.mrf.mxu1 }
 0x763   : > { %v3862_v23 = vpack.c.bf16 %v3845_v56, %v3844_v39  ;;  %v3989_v4 = vadd.f32 %v3988_v49, %v8760_v33 }
 0x765   : > { %5844 = vmatmul.msk.bf16.gmra.mxu1 %vm3895_vm1, %v3862_v23  ;;  %v4047_v57 = vmax.f32 %v3989_v4, 0.0 }
 0x76a   : > { %v3990_v19 = vpop.f32.mrf.mxu1 }
 0x76b   : > { %v3991_v6 = vadd.f32 %v3990_v19, %v8760_v33 }
 0x76d   : > { %v4048_v40 = vmax.f32 %v3991_v6, 0.0 }
 0x76f   : > { %v4073_v46 = vpack.c.bf16 %v4048_v40, %v4047_v57 }
 0x771   : > { %5856 = vmatmul.msk.bf16.gmra.mxu2 %vm4090_vm2, %v4073_v46 }
 0x772   : > { %v3993_v62 = vpop.f32.mrf.mxu1 }
 0x773   : > { %v3994_v13 = vadd.f32 %v3993_v62, %v8760_v33 }
 0x775   : > { %v4049_v36 = vmax.f32 %v3994_v13, 0.0 }
 0x77a   : > { %v3995_v50 = vpop.f32.mrf.mxu1 }
 0x77b   : > { %v3996_v45 = vadd.f32 %v3995_v50, %v8760_v33 }
 0x77d   : > { %v4050_v7 = vmax.f32 %v3996_v45, 0.0 }
 0x77f   : > { %v4074_v12 = vpack.c.bf16 %v4050_v7, %v4049_v36 }
 0x781   : > { %5857 = vmatmul.msk.bf16.gmra.mxu2 %vm4090_vm2, %v4074_v12 }
 0x782   : > { %v3998_v37 = vpop.f32.mrf.mxu1 }
 0x783   : > { %v3999_v48 = vadd.f32 %v3998_v37, %v8760_v33 }
 0x784   : > { %v4148_v52 = vpop.f32.mrf.mxu2 }
 0x785   : > { %v4149_v61 = vadd.f32 %v4148_v52, %v8813_v55  ;;  %v4051_v32 = vmax.f32 %v3999_v48, 0.0 }
 0x787   : > { %v4228_v41 = vmax.f32 %v4149_v61, 0.0 }
 0x789   : > { %v4265_v0 = vmul.f32 %v8819_v10, %v4228_v41 }
 0x78a   : > { %v4000_v58 = vpop.f32.mrf.mxu1 }
 0x78b   : > { %v4001_v51 = vadd.f32 %v4000_v58, %v8760_v33  ;;  %v4298_v34 = vsel %vm4297_vm3, %v4265_v0, 0.0 }
 0x78c   : > { %v4150_v38 = vpop.f32.mrf.mxu2  ;;  %4299 = vadd.xlane.f32.xlu0 %v4298_v34 }
 0x78d   : > { %v4052_v2 = vmax.f32 %v4001_v51, 0.0  ;;  %v4151_v11 = vadd.f32 %v4150_v38, %v8813_v55 }
 0x78f   : > { %v4075_v20 = vpack.c.bf16 %v4052_v2, %v4051_v32  ;;  %v4229_v30 = vmax.f32 %v4151_v11, 0.0 }
 0x791   : > { %5858 = vmatmul.msk.bf16.gmra.mxu2 %vm4090_vm2, %v4075_v20  ;;  %v4266_v5 = vmul.f32 %v8819_v10, %v4229_v30 }
 0x792   : > { %v4003_v35 = vpop.f32.mrf.mxu1 }
 0x793   : > { %v4301_v27 = vsel %vm4297_vm3, %v4266_v5, 0.0  ;;  %v4004_v26 = vadd.f32 %v4003_v35, %v8760_v33 }
 0x794   : > { %v4153_v22 = vpop.f32.mrf.mxu2  ;;  %4302 = vadd.xlane.f32.xlu0 %v4301_v27 }
 0x795   : > { %v4154_v43 = vadd.f32 %v4153_v22, %v8813_v55  ;;  %v4053_v47 = vmax.f32 %v4004_v26, 0.0 }
 0x797   : > { %v4230_v14 = vmax.f32 %v4154_v43, 0.0 }
 0x799   : > { %v4267_v59 = vmul.f32 %v8819_v10, %v4230_v14 }
 0x79a   : > { %v4005_v54 = vpop.f32.mrf.mxu1 }
 0x79b   : > { %v4006_v53 = vadd.f32 %v4005_v54, %v8760_v33  ;;  %v4304_v42 = vsel %vm4297_vm3, %v4267_v59, 0.0 }
 0x79c   : > { %v4155_v9 = vpop.f32.mrf.mxu2  ;;  %4305 = vadd.xlane.f32.xlu1 %v4304_v42 }
 0x79d   : > { %v4054_v63 = vmax.f32 %v4006_v53, 0.0  ;;  %v4156_v24 = vadd.f32 %v4155_v9, %v8813_v55 }
 0x79f   : > { %v4076_v1 = vpack.c.bf16 %v4054_v63, %v4053_v47  ;;  %v4231_v25 = vmax.f32 %v4156_v24, 0.0 }
 0x7a1   : > { %5859 = vmatmul.msk.bf16.gmra.mxu2 %vm4090_vm2, %v4076_v1  ;;  %v4268_v16 = vmul.f32 %v8819_v10, %v4231_v25 }
 0x7a2   : > { %v4008_v8 = vpop.f32.mrf.mxu1 }
 0x7a3   : > { %v4307_v28 = vsel %vm4297_vm3, %v4268_v16, 0.0  ;;  %v4009_v31 = vadd.f32 %v4008_v8, %v8760_v33 }
 0x7a4   : > { %v4158_v15 = vpop.f32.mrf.mxu2  ;;  %4308 = vadd.xlane.f32.xlu1 %v4307_v28 }
 0x7a5   : > { %v4159_v44 = vadd.f32 %v4158_v15, %v8813_v55  ;;  %v4055_v39 = vmax.f32 %v4009_v31, 0.0 }
 0x7a7   : > { %v4232_v3 = vmax.f32 %v4159_v44, 0.0 }
 0x7a9   : > { %v4269_v18 = vmul.f32 %v8819_v10, %v4232_v3 }
 0x7aa   : > { %v4010_v17 = vpop.f32.mrf.mxu1 }
 0x7ab   : > { %v4011_v60 = vadd.f32 %v4010_v17, %v8760_v33  ;;  %v4310_v29 = vsel %vm4297_vm3, %v4269_v18, 0.0 }
 0x7ac   : > { %v4160_v21 = vpop.f32.mrf.mxu2  ;;  %4311 = vadd.xlane.f32.xlu2 %v4310_v29 }
 0x7ad   : > { %v4056_v56 = vmax.f32 %v4011_v60, 0.0  ;;  %v4161_v49 = vadd.f32 %v4160_v21, %v8813_v55 }
 0x7af   : > { %v4077_v23 = vpack.c.bf16 %v4056_v56, %v4055_v39  ;;  %v4233_v4 = vmax.f32 %v4161_v49, 0.0 }
 0x7b1   : > { %5860 = vmatmul.msk.bf16.gmra.mxu2 %vm4090_vm2, %v4077_v23  ;;  %v4270_v19 = vmul.f32 %v8819_v10, %v4233_v4 }
 0x7b2   : > { %v4013_v6 = vpop.f32.mrf.mxu1 }
 0x7b3   : > { %v4313_v57 = vsel %vm4297_vm3, %v4270_v19, 0.0  ;;  %v4014_v13 = vadd.f32 %v4013_v6, %v8760_v33 }
 0x7b4   : > { %v4163_v40 = vpop.f32.mrf.mxu2  ;;  %4314 = vadd.xlane.f32.xlu2 %v4313_v57 }
 0x7b5   : > { %v4164_v46 = vadd.f32 %v4163_v40, %v8813_v55  ;;  %v4057_v37 = vmax.f32 %v4014_v13, 0.0 }
 0x7b7   : > { %v4234_v62 = vmax.f32 %v4164_v46, 0.0 }
 0x7b9   : > { %v4271_v50 = vmul.f32 %v8819_v10, %v4234_v62 }
 0x7ba   : > { %v4015_v45 = vpop.f32.mrf.mxu1 }
 0x7bb   : > { %v4016_v36 = vadd.f32 %v4015_v45, %v8760_v33  ;;  %v4316_v7 = vsel %vm4297_vm3, %v4271_v50, 0.0 }
 0x7bc   : > { %v4165_v12 = vpop.f32.mrf.mxu2  ;;  %4317 = vadd.xlane.f32.xlu0 %v4316_v7 }
 0x7bd   : > { %v4058_v52 = vmax.f32 %v4016_v36, 0.0  ;;  %v4166_v61 = vadd.f32 %v4165_v12, %v8813_v55 }
 0x7bf   : > { %v4078_v41 = vpack.c.bf16 %v4058_v52, %v4057_v37  ;;  %v4235_v48 = vmax.f32 %v4166_v61, 0.0 }
 0x7c1   : > { %5861 = vmatmul.msk.bf16.gmra.mxu2 %vm4090_vm2, %v4078_v41  ;;  %v4272_v0 = vmul.f32 %v8819_v10, %v4235_v48  ;;  %v8890_v41 = vld [vmem:[%s9064_s9 + $0x7] ss:$0 sm:$0xff] }
 0x7c2   : > { %v4018_v58 = vpop.f32.mrf.mxu1 }
 0x7c3   : > { %v4319_v51 = vsel %vm4297_vm3, %v4272_v0, 0.0  ;;  %v4019_v2 = vadd.f32 %v4018_v58, %v8760_v33 }
 0x7c4   : > { %v4168_v34 = vpop.f32.mrf.mxu2  ;;  %4320 = vadd.xlane.f32.xlu1 %v4319_v51 }
 0x7c5   : > { %v4169_v38 = vadd.f32 %v4168_v34, %v8813_v55  ;;  %v4059_v27 = vmax.f32 %v4019_v2, 0.0 }
 0x7c7   : > { %v4236_v32 = vmax.f32 %v4169_v38, 0.0 }
 0x7c9   : > { %v4273_v11 = vmul.f32 %v8819_v10, %v4236_v32 }
 0x7ca   : > { %v4020_v20 = vpop.f32.mrf.mxu1 }
 0x7cb   : > { %v4021_v30 = vadd.f32 %v4020_v20, %v8760_v33  ;;  %v4322_v5 = vsel %vm4297_vm3, %v4273_v11, 0.0 }
 0x7cc   : > { %v4170_v35 = vpop.f32.mrf.mxu2  ;;  %4323 = vadd.xlane.f32.xlu2 %v4322_v5 }
 0x7cd   : > { %v4060_v22 = vmax.f32 %v4021_v30, 0.0  ;;  %v4171_v43 = vadd.f32 %v4170_v35, %v8813_v55 }
 0x7cf   : > { %v4079_v14 = vpack.c.bf16 %v4060_v22, %v4059_v27  ;;  %v4237_v26 = vmax.f32 %v4171_v43, 0.0 }
 0x7d1   : > { %5862 = vmatmul.msk.bf16.gmra.mxu2 %vm4090_vm2, %v4079_v14  ;;  %v4274_v59 = vmul.f32 %v8819_v10, %v4237_v26 }
 0x7d2   : > { %v4023_v54 = vpop.f32.mrf.mxu1 }
 0x7d3   : > { %v4325_v53 = vsel %vm4297_vm3, %v4274_v59, 0.0  ;;  %v4024_v63 = vadd.f32 %v4023_v54, %v8760_v33 }
 0x7d4   : > { %v4173_v42 = vpop.f32.mrf.mxu2  ;;  %4326 = vadd.xlane.f32.xlu0 %v4325_v53 }
 0x7d5   : > { %v4174_v9 = vadd.f32 %v4173_v42, %v8813_v55  ;;  %v4061_v28 = vmax.f32 %v4024_v63, 0.0 }
 0x7d7   : > { %v4238_v47 = vmax.f32 %v4174_v9, 0.0 }
 0x7d9   : > { %v4275_v24 = vmul.f32 %v8819_v10, %v4238_v47 }
 0x7da   : > { %v4025_v1 = vpop.f32.mrf.mxu1 }
 0x7db   : > { %v4026_v25 = vadd.f32 %v4025_v1, %v8760_v33  ;;  %v4328_v16 = vsel %vm4297_vm3, %v4275_v24, 0.0 }
 0x7dc   : > { %v4175_v8 = vpop.f32.mrf.mxu2  ;;  %4329 = vadd.xlane.f32.xlu1 %v4328_v16 }
 0x7dd   : > { %v4062_v15 = vmax.f32 %v4026_v25, 0.0  ;;  %v4176_v44 = vadd.f32 %v4175_v8, %v8813_v55 }
 0x7df   : > { %v4080_v3 = vpack.c.bf16 %v4062_v15, %v4061_v28  ;;  %v4239_v31 = vmax.f32 %v4176_v44, 0.0 }
 0x7e1   : > { %5863 = vmatmul.msk.bf16.gmra.mxu2 %vm4090_vm2, %v4080_v3  ;;  %v4276_v18 = vmul.f32 %v8819_v10, %v4239_v31 }
 0x7e2   : > { %v4028_v17 = vpop.f32.mrf.mxu1 }
 0x7e3   : > { %v4331_v60 = vsel %vm4297_vm3, %v4276_v18, 0.0  ;;  %v4029_v56 = vadd.f32 %v4028_v17, %v8760_v33 }
 0x7e4   : > { %v4178_v29 = vpop.f32.mrf.mxu2  ;;  %4332 = vadd.xlane.f32.xlu2 %v4331_v60 }
 0x7e5   : > { %v4179_v21 = vadd.f32 %v4178_v29, %v8813_v55  ;;  %v4063_v57 = vmax.f32 %v4029_v56, 0.0 }
 0x7e7   : > { %v4240_v39 = vmax.f32 %v4179_v21, 0.0 }
 0x7e9   : > { %v4277_v49 = vmul.f32 %v8819_v10, %v4240_v39 }
 0x7ea   : > { %v4030_v23 = vpop.f32.mrf.mxu1 }
 0x7eb   : > { %v4031_v4 = vadd.f32 %v4030_v23, %v8760_v33  ;;  %v4334_v19 = vsel %vm4297_vm3, %v4277_v49, 0.0 }
 0x7ec   : > { %v4180_v6 = vpop.f32.mrf.mxu2  ;;  %4335 = vadd.xlane.f32.xlu0 %v4334_v19 }
 0x7ed   : > { %v4064_v40 = vmax.f32 %v4031_v4, 0.0  ;;  %v4181_v46 = vadd.f32 %v4180_v6, %v8813_v55 }
 0x7ef   : > { %v4081_v62 = vpack.c.bf16 %v4064_v40, %v4063_v57  ;;  %v4241_v13 = vmax.f32 %v4181_v46, 0.0 }
 0x7f1   : > { %5864 = vmatmul.msk.bf16.gmra.mxu2 %vm4090_vm2, %v4081_v62  ;;  %v4278_v50 = vmul.f32 %v8819_v10, %v4241_v13 }
 0x7f3   : > { %v4337_v45 = vsel %vm4297_vm3, %v4278_v50, 0.0 }
 0x7f4   : > { %v4183_v36 = vpop.f32.mrf.mxu2  ;;  %4338 = vadd.xlane.f32.xlu1 %v4337_v45 }
 0x7f5   : > { %v4184_v33 = vadd.f32 %v4183_v36, %v8813_v55 }
 0x7f7   : > { %v4242_v7 = vmax.f32 %v4184_v33, 0.0 }
 0x7f9   : > { %v4279_v12 = vmul.f32 %v8819_v10, %v4242_v7 }
 0x7fb   : > { %v4340_v37 = vsel %vm4297_vm3, %v4279_v12, 0.0 }
 0x7fc   : > { %v4185_v52 = vpop.f32.mrf.mxu2  ;;  %4341 = vadd.xlane.f32.xlu2 %v4340_v37 }
 0x7fd   : > { %v4186_v61 = vadd.f32 %v4185_v52, %v8813_v55 }
 0x7ff   : > { %v4243_v48 = vmax.f32 %v4186_v61, 0.0  ;;  %v4300_v0 = vpop.xlane.xlu0 %4299 }
 0x800   : > { %v4394_v58 = vadd.f32 %v4300_v0, %v8890_v41 }
 0x801   : > { %v4280_v51 = vmul.f32 %v8819_v10, %v4243_v48 }
 0x802   : > { %v5865_v34 = vmul.f32 -1.442695, %v4394_v58 }
 0x803   : > { %v4343_v38 = vsel %vm4297_vm3, %v4280_v51, 0.0 }
 0x804   : > { %6106 = vpow2.f32 %v5865_v34  ;;  %v4188_v32 = vpop.f32.mrf.mxu2  ;;  %4344 = vadd.xlane.f32.xlu0 %v4343_v38 }
 0x805   : > { %v4189_v2 = vadd.f32 %v4188_v32, %v8813_v55 }
 0x807   : > { %v4244_v11 = vmax.f32 %v4189_v2, 0.0  ;;  %v4303_v20 = vpop.xlane.xlu0 %4302 }
 0x808   : > { %v4395_v30 = vadd.f32 %v4303_v20, %v8890_v41 }
 0x809   : > { %v4281_v5 = vmul.f32 %v8819_v10, %v4244_v11 }
 0x80a   : > { %v6107_v35 = vpop.eup %6106  ;;  %v5866_v27 = vmul.f32 -1.442695, %v4395_v30 }
 0x80b   : > { %v4522_v22 = vadd.f32 1.0, %v6107_v35  ;;  %v4346_v43 = vsel %vm4297_vm3, %v4281_v5, 0.0 }
 0x80c   : > { %6108 = vpow2.f32 %v5866_v27  ;;  %v4190_v14 = vpop.f32.mrf.mxu2  ;;  %4347 = vadd.xlane.f32.xlu1 %v4346_v43 }
 0x80d   : > { %6110 = vrcp.f32 %v4522_v22  ;;  %v4191_v26 = vadd.f32 %v4190_v14, %v8813_v55  ;;  %v4563_v15 = vand.u32 2147483647, %v4522_v22  ;;  %v4565_v44 = vand.u32 2147483648, %v4522_v22 }
 0x80e   : > { %vm4559_vm5 = vweird.f32 %v4522_v22 }
 0x80f   : > { %v4306_v59 = vpop.xlane.xlu1 %4305  ;;  %v4245_v54 = vmax.f32 %v4191_v26, 0.0  ;;  %v4566_v49 = vor.u32 1.1754944e-38, %v4565_v44  ;;  %vm4564_vm8 = vcmp.eq.f32.partialorder %v4563_v15, 8.507059e+37 }
 0x810   : > { %v4396_v53 = vadd.f32 %v4306_v59, %v8890_v41 }
 0x811   : > { %v4282_v47 = vmul.f32 %v8819_v10, %v4245_v54 }
 0x812   : > { %v6109_v42 = vpop.eup %6108  ;;  %v5867_v9 = vmul.f32 -1.442695, %v4396_v53 }
 0x813   : > { %v6111_v63 = vpop.eup %6110  ;;  %v4523_v24 = vadd.f32 1.0, %v6109_v42  ;;  %v4349_v16 = vsel %vm4297_vm3, %v4282_v47, 0.0 }
 0x814   : > { %v4555_v1 = vmul.f32 %v6111_v63, %v4522_v22  ;;  %6112 = vpow2.f32 %v5867_v9  ;;  %v4193_v25 = vpop.f32.mrf.mxu2  ;;  %4350 = vadd.xlane.f32.xlu2 %v4349_v16  ;;  %vm4560_vm4 = vweird.f32 %v6111_v63 }
 0x815   : > { %6114 = vrcp.f32 %v4523_v24  ;;  %v4194_v28 = vadd.f32 %v4193_v25, %v8813_v55  ;;  %vm4561_vm7 = vmor %vm4559_vm5, %vm4560_vm4  ;;  %v4578_v13 = vand.u32 2147483647, %v4523_v24  ;;  %v4580_v50 = vand.u32 2147483648, %v4523_v24 }
 0x816   : > { %v4556_v8 = vsub.f32 1.0, %v4555_v1  ;;  %vm4574_vm10 = vweird.f32 %v4523_v24 }
 0x817   : > { %v4309_v3 = vpop.xlane.xlu1 %4308  ;;  %v4246_v18 = vmax.f32 %v4194_v28, 0.0  ;;  %v4581_v0 = vor.u32 1.1754944e-38, %v4580_v50  ;;  %vm4579_vm12 = vcmp.eq.f32.partialorder %v4578_v13, 8.507059e+37 }
 0x818   : > { %v4557_v31 = vmul.f32 %v6111_v63, %v4556_v8  ;;  %v4397_v17 = vadd.f32 %v4309_v3, %v8890_v41 }
 0x819   : > { %v4283_v39 = vmul.f32 %v8819_v10, %v4246_v18 }
 0x81a   : > { %v6113_v60 = vpop.eup %6112  ;;  %v4558_v29 = vadd.f32 %v6111_v63, %v4557_v31  ;;  %v5868_v21 = vmul.f32 -1.442695, %v4397_v17 }
 0x81b   : > { %v6115_v56 = vpop.eup %6114  ;;  %v4524_v23 = vadd.f32 1.0, %v6113_v60  ;;  %v4352_v62 = vsel %vm4297_vm3, %v4283_v39, 0.0 }
 0x81c   : > { %v4562_v4 = vsel %vm4561_vm7, %v6111_v63, %v4558_v29  ;;  %v4570_v19 = vmul.f32 %v6115_v56, %v4523_v24  ;;  %6116 = vpow2.f32 %v5868_v21  ;;  %v4195_v6 = vpop.f32.mrf.mxu2  ;;  %4353 = vadd.xlane.f32.xlu0 %v4352_v62  ;;  %vm4575_vm9 = vweird.f32 %v6115_v56 }
 0x81d   : > { %v4567_v57 = vsel %vm4564_vm8, %v4566_v49, %v4562_v4  ;;  %6118 = vrcp.f32 %v4524_v23  ;;  %v4196_v46 = vadd.f32 %v4195_v6, %v8813_v55  ;;  %vm4576_vm11 = vmor %vm4574_vm10, %vm4575_vm9  ;;  %v4593_v30 = vand.u32 2147483647, %v4524_v23 }
 0x81e   : > { %5035 = vst.msk [vmem:[%s8911_s28] sm:$0xff] %vm5034_vm6, %v4567_v57  ;;  %v4571_v40 = vsub.f32 1.0, %v4570_v19  ;;  %v4595_v5 = vand.u32 2147483648, %v4524_v23  ;;  %vm4589_vm14 = vweird.f32 %v4524_v23 }
 0x81f   : > { %v4312_v45 = vpop.xlane.xlu2 %4311  ;;  %v4247_v33 = vmax.f32 %v4196_v46, 0.0  ;;  %vm4594_vm0 = vcmp.eq.f32.partialorder %v4593_v30, 8.507059e+37 }
 0x820   : > { %v4572_v36 = vmul.f32 %v6115_v56, %v4571_v40  ;;  %v4398_v7 = vadd.f32 %v4312_v45, %v8890_v41  ;;  %v4596_v42 = vor.u32 1.1754944e-38, %v4595_v5 }
 0x821   : > { %v4284_v61 = vmul.f32 %v8819_v10, %v4247_v33 }
 0x822   : > { %v6117_v12 = vpop.eup %6116  ;;  %v4573_v37 = vadd.f32 %v6115_v56, %v4572_v36  ;;  %v5869_v52 = vmul.f32 -1.442695, %v4398_v7 }
 0x823   : > { %v6119_v48 = vpop.eup %6118  ;;  %v4525_v58 = vadd.f32 1.0, %v6117_v12  ;;  %v4355_v20 = vsel %vm4297_vm3, %v4284_v61, 0.0 }
 0x824   : > { %v4577_v51 = vsel %vm4576_vm11, %v6115_v56, %v4573_v37  ;;  %v4585_v34 = vmul.f32 %v6119_v48, %v4524_v23  ;;  %6120 = vpow2.f32 %v5869_v52  ;;  %v4198_v38 = vpop.f32.mrf.mxu2  ;;  %4356 = vadd.xlane.f32.xlu1 %v4355_v20  ;;  %vm4590_vm13 = vweird.f32 %v6119_v48 }
 0x825   : > { %v4582_v32 = vsel %vm4579_vm12, %v4581_v0, %v4577_v51  ;;  %6122 = vrcp.f32 %v4525_v58  ;;  %v4199_v11 = vadd.f32 %v4198_v38, %v8813_v55  ;;  %vm4591_vm15 = vmor %vm4589_vm14, %vm4590_vm13  ;;  %v4608_v28 = vand.u32 2147483647, %v4525_v58 }
 0x826   : > { %5036 = vst.msk [vmem:[%s8911_s28 + $0x8] sm:$0xff] %vm5034_vm6, %v4582_v32  ;;  %v4586_v2 = vsub.f32 1.0, %v4585_v34  ;;  %v4610_v15 = vand.u32 2147483648, %v4525_v58  ;;  %vm4604_vm2 = vweird.f32 %v4525_v58 }
 0x827   : > { %v4315_v35 = vpop.xlane.xlu2 %4314  ;;  %v4248_v22 = vmax.f32 %v4199_v11, 0.0  ;;  %vm4609_vm5 = vcmp.eq.f32.partialorder %v4608_v28, 8.507059e+37 }
 0x828   : > { %v4587_v27 = vmul.f32 %v6119_v48, %v4586_v2  ;;  %v4399_v43 = vadd.f32 %v4315_v35, %v8890_v41  ;;  %v4611_v56 = vor.u32 1.1754944e-38, %v4610_v15 }
 0x829   : > { %v4285_v54 = vmul.f32 %v8819_v10, %v4248_v22 }
 0x82a   : > { %v6121_v14 = vpop.eup %6120  ;;  %v4588_v26 = vadd.f32 %v6119_v48, %v4587_v27  ;;  %v5870_v59 = vmul.f32 -1.442695, %v4399_v43 }
 0x82b   : > { %v6123_v53 = vpop.eup %6122  ;;  %v4526_v9 = vadd.f32 1.0, %v6121_v14  ;;  %v4358_v8 = vsel %vm4297_vm3, %v4285_v54, 0.0 }
 0x82c   : > { %v4592_v47 = vsel %vm4591_vm15, %v6119_v48, %v4588_v26  ;;  %v4600_v63 = vmul.f32 %v6123_v53, %v4525_v58  ;;  %6124 = vpow2.f32 %v5870_v59  ;;  %v4200_v24 = vpop.f32.mrf.mxu2  ;;  %4359 = vadd.xlane.f32.xlu2 %v4358_v8  ;;  %vm4605_vm1 = vweird.f32 %v6123_v53 }
 0x82d   : > { %v4597_v1 = vsel %vm4594_vm0, %v4596_v42, %v4592_v47  ;;  %6126 = vrcp.f32 %v4526_v9  ;;  %v4201_v16 = vadd.f32 %v4200_v24, %v8813_v55  ;;  %vm4606_vm4 = vmor %vm4604_vm2, %vm4605_vm1  ;;  %v4623_v62 = vand.u32 2147483647, %v4526_v9 }
 0x82e   : > { %5037 = vst.msk [vmem:[%s8911_s28 + $0x10] sm:$0xff] %vm5034_vm6, %v4597_v1  ;;  %v4601_v25 = vsub.f32 1.0, %v4600_v63  ;;  %v4625_v13 = vand.u32 2147483648, %v4526_v9  ;;  %vm4619_vm8 = vweird.f32 %v4526_v9 }
 0x82f   : > { %v4318_v44 = vpop.xlane.xlu0 %4317  ;;  %v4249_v31 = vmax.f32 %v4201_v16, 0.0  ;;  %vm4624_vm10 = vcmp.eq.f32.partialorder %v4623_v62, 8.507059e+37 }
 0x830   : > { %v4602_v3 = vmul.f32 %v6123_v53, %v4601_v25  ;;  %v4400_v18 = vadd.f32 %v4318_v44, %v8890_v41  ;;  %v4626_v48 = vor.u32 1.1754944e-38, %v4625_v13 }
 0x831   : > { %v4286_v21 = vmul.f32 %v8819_v10, %v4249_v31 }
 0x832   : > { %v6125_v17 = vpop.eup %6124  ;;  %v4603_v60 = vadd.f32 %v6123_v53, %v4602_v3  ;;  %v5871_v29 = vmul.f32 -1.442695, %v4400_v18 }
 0x833   : > { %v6127_v39 = vpop.eup %6126  ;;  %v4527_v49 = vadd.f32 1.0, %v6125_v17  ;;  %v4361_v46 = vsel %vm4297_vm3, %v4286_v21, 0.0 }
 0x834   : > { %v4607_v23 = vsel %vm4606_vm4, %v6123_v53, %v4603_v60  ;;  %v4615_v4 = vmul.f32 %v6127_v39, %v4526_v9  ;;  %6128 = vpow2.f32 %v5871_v29  ;;  %v4203_v19 = vpop.f32.mrf.mxu2  ;;  %4362 = vadd.xlane.f32.xlu0 %v4361_v46  ;;  %vm4620_vm7 = vweird.f32 %v6127_v39 }
 0x835   : > { %v4612_v6 = vsel %vm4609_vm5, %v4611_v56, %v4607_v23  ;;  %6130 = vrcp.f32 %v4527_v49  ;;  %v4204_v40 = vadd.f32 %v4203_v19, %v8813_v55  ;;  %vm4621_vm9 = vmor %vm4619_vm8, %vm4620_vm7  ;;  %v4638_v20 = vand.u32 2147483647, %v4527_v49 }
 0x836   : > { %5038 = vst.msk [vmem:[%s8911_s28 + $0x18] sm:$0xff] %vm5034_vm6, %v4612_v6  ;;  %v4616_v57 = vsub.f32 1.0, %v4615_v4  ;;  %v4640_v30 = vand.u32 2147483648, %v4527_v49  ;;  %vm4634_vm12 = vweird.f32 %v4527_v49 }
 0x837   : > { %v4321_v50 = vpop.xlane.xlu1 %4320  ;;  %v4250_v36 = vmax.f32 %v4204_v40, 0.0  ;;  %vm4639_vm14 = vcmp.eq.f32.partialorder %v4638_v20, 8.507059e+37 }
 0x838   : > { %v4617_v45 = vmul.f32 %v6127_v39, %v4616_v57  ;;  %v4401_v33 = vadd.f32 %v4321_v50, %v8890_v41  ;;  %v4641_v53 = vor.u32 1.1754944e-38, %v4640_v30 }
 0x839   : > { %v4287_v52 = vmul.f32 %v8819_v10, %v4250_v36 }
 0x83a   : > { %v6129_v7 = vpop.eup %6128  ;;  %v4618_v12 = vadd.f32 %v6127_v39, %v4617_v45  ;;  %v5872_v37 = vmul.f32 -1.442695, %v4401_v33 }
 0x83b   : > { %v6131_v61 = vpop.eup %6130  ;;  %v4528_v0 = vadd.f32 1.0, %v6129_v7  ;;  %v4364_v11 = vsel %vm4297_vm3, %v4287_v52, 0.0 }
 0x83c   : > { %v4622_v58 = vsel %vm4621_vm9, %v6127_v39, %v4618_v12  ;;  %v4630_v51 = vmul.f32 %v6131_v61, %v4527_v49  ;;  %6132 = vpow2.f32 %v5872_v37  ;;  %v4205_v34 = vpop.f32.mrf.mxu2  ;;  %4365 = vadd.xlane.f32.xlu1 %v4364_v11  ;;  %vm4635_vm11 = vweird.f32 %v6131_v61 }
 0x83d   : > { %v4627_v38 = vsel %vm4624_vm10, %v4626_v48, %v4622_v58  ;;  %6134 = vrcp.f32 %v4528_v0  ;;  %v4206_v2 = vadd.f32 %v4205_v34, %v8813_v55  ;;  %vm4636_vm13 = vmor %vm4634_vm12, %vm4635_vm11  ;;  %v4653_v8 = vand.u32 2147483647, %v4528_v0 }
 0x83e   : > { %5039 = vst.msk [vmem:[%s8911_s28 + $0x20] sm:$0xff] %vm5034_vm6, %v4627_v38  ;;  %v4631_v32 = vsub.f32 1.0, %v4630_v51  ;;  %v4655_v28 = vand.u32 2147483648, %v4528_v0  ;;  %vm4649_vm0 = vweird.f32 %v4528_v0 }
 0x83f   : > { %v4324_v5 = vpop.xlane.xlu2 %4323  ;;  %v4251_v27 = vmax.f32 %v4206_v2, 0.0  ;;  %vm4654_vm2 = vcmp.eq.f32.partialorder %v4653_v8, 8.507059e+37 }
 0x840   : > { %v4632_v35 = vmul.f32 %v6131_v61, %v4631_v32  ;;  %v4402_v22 = vadd.f32 %v4324_v5, %v8890_v41  ;;  %v4656_v39 = vor.u32 1.1754944e-38, %v4655_v28 }
 0x841   : > { %v4288_v59 = vmul.f32 %v8819_v10, %v4251_v27 }
 0x842   : > { %v6133_v43 = vpop.eup %6132  ;;  %v4633_v14 = vadd.f32 %v6131_v61, %v4632_v35  ;;  %v5873_v26 = vmul.f32 -1.442695, %v4402_v22 }
 0x843   : > { %v6135_v54 = vpop.eup %6134  ;;  %v4529_v42 = vadd.f32 1.0, %v6133_v43  ;;  %v4367_v16 = vsel %vm4297_vm3, %v4288_v59, 0.0 }
 0x844   : > { %v4637_v9 = vsel %vm4636_vm13, %v6131_v61, %v4633_v14  ;;  %v4645_v47 = vmul.f32 %v6135_v54, %v4528_v0  ;;  %6136 = vpow2.f32 %v5873_v26  ;;  %v4208_v63 = vpop.f32.mrf.mxu2  ;;  %4368 = vadd.xlane.f32.xlu2 %v4367_v16  ;;  %vm4650_vm15 = vweird.f32 %v6135_v54 }
 0x845   : > { %v4642_v24 = vsel %vm4639_vm14, %v4641_v53, %v4637_v9  ;;  %6138 = vrcp.f32 %v4529_v42  ;;  %v4209_v25 = vadd.f32 %v4208_v63, %v8813_v55  ;;  %vm4651_vm1 = vmor %vm4649_vm0, %vm4650_vm15  ;;  %v4668_v46 = vand.u32 2147483647, %v4529_v42 }
 0x846   : > { %5040 = vst.msk [vmem:[%s8911_s28 + $0x28] sm:$0xff] %vm5034_vm6, %v4642_v24  ;;  %v4646_v1 = vsub.f32 1.0, %v4645_v47  ;;  %v4670_v62 = vand.u32 2147483648, %v4529_v42  ;;  %vm4664_vm5 = vweird.f32 %v4529_v42 }
 0x847   : > { %v4327_v15 = vpop.xlane.xlu0 %4326  ;;  %v4252_v3 = vmax.f32 %v4209_v25, 0.0  ;;  %vm4669_vm8 = vcmp.eq.f32.partialorder %v4668_v46, 8.507059e+37 }
 0x848   : > { %v4647_v44 = vmul.f32 %v6135_v54, %v4646_v1  ;;  %v4403_v31 = vadd.f32 %v4327_v15, %v8890_v41  ;;  %v4671_v61 = vor.u32 1.1754944e-38, %v4670_v62 }
 0x849   : > { %v4289_v29 = vmul.f32 %v8819_v10, %v4252_v3 }
 0x84a   : > { %v6137_v18 = vpop.eup %6136  ;;  %v4648_v17 = vadd.f32 %v6135_v54, %v4647_v44  ;;  %v5874_v60 = vmul.f32 -1.442695, %v4403_v31 }
 0x84b   : > { %v6139_v21 = vpop.eup %6138  ;;  %v4530_v56 = vadd.f32 1.0, %v6137_v18  ;;  %v4370_v40 = vsel %vm4297_vm3, %v4289_v29, 0.0 }
 0x84c   : > { %v4652_v49 = vsel %vm4651_vm1, %v6135_v54, %v4648_v17  ;;  %v4660_v23 = vmul.f32 %v6139_v21, %v4529_v42  ;;  %6140 = vpow2.f32 %v5874_v60  ;;  %v4210_v4 = vpop.f32.mrf.mxu2  ;;  %4371 = vadd.xlane.f32.xlu0 %v4370_v40  ;;  %vm4665_vm4 = vweird.f32 %v6139_v21 }
 0x84d   : > { %v4657_v19 = vsel %vm4654_vm2, %v4656_v39, %v4652_v49  ;;  %6142 = vrcp.f32 %v4530_v56  ;;  %v4211_v57 = vadd.f32 %v4210_v4, %v8813_v55  ;;  %vm4666_vm7 = vmor %vm4664_vm5, %vm4665_vm4  ;;  %v4683_v11 = vand.u32 2147483647, %v4530_v56 }
 0x84e   : > { %5041 = vst.msk [vmem:[%s8911_s28 + $0x30] sm:$0xff] %vm5034_vm6, %v4657_v19  ;;  %v4661_v6 = vsub.f32 1.0, %v4660_v23  ;;  %v4685_v20 = vand.u32 2147483648, %v4530_v56  ;;  %vm4679_vm10 = vweird.f32 %v4530_v56 }
 0x84f   : > { %v4330_v13 = vpop.xlane.xlu1 %4329  ;;  %v4253_v45 = vmax.f32 %v4211_v57, 0.0  ;;  %vm4684_vm12 = vcmp.eq.f32.partialorder %v4683_v11, 8.507059e+37 }
 0x850   : > { %v4662_v50 = vmul.f32 %v6139_v21, %v4661_v6  ;;  %v4404_v36 = vadd.f32 %v4330_v13, %v8890_v41  ;;  %v4686_v54 = vor.u32 1.1754944e-38, %v4685_v20 }
 0x851   : > { %v4290_v37 = vmul.f32 %v8819_v10, %v4253_v45 }
 0x852   : > { %v6141_v33 = vpop.eup %6140  ;;  %v4663_v7 = vadd.f32 %v6139_v21, %v4662_v50  ;;  %v5875_v12 = vmul.f32 -1.442695, %v4404_v36 }
 0x853   : > { %v6143_v52 = vpop.eup %6142  ;;  %v4531_v48 = vadd.f32 1.0, %v6141_v33  ;;  %v4373_v2 = vsel %vm4297_vm3, %v4290_v37, 0.0 }
 0x854   : > { %v4667_v0 = vsel %vm4666_vm7, %v6139_v21, %v4663_v7  ;;  %v4675_v58 = vmul.f32 %v6143_v52, %v4530_v56  ;;  %6144 = vpow2.f32 %v5875_v12  ;;  %v4213_v51 = vpop.f32.mrf.mxu2  ;;  %4374 = vadd.xlane.f32.xlu1 %v4373_v2  ;;  %vm4680_vm9 = vweird.f32 %v6143_v52 }
 0x855   : > { %v4672_v34 = vsel %vm4669_vm8, %v4671_v61, %v4667_v0  ;;  %6146 = vrcp.f32 %v4531_v48  ;;  %v4214_v32 = vadd.f32 %v4213_v51, %v8813_v55  ;;  %vm4681_vm11 = vmor %vm4679_vm10, %vm4680_vm9  ;;  %v4698_v16 = vand.u32 2147483647, %v4531_v48 }
 0x856   : > { %5042 = vst.msk [vmem:[%s8911_s28 + $0x38] sm:$0xff] %vm5034_vm6, %v4672_v34  ;;  %v4676_v38 = vsub.f32 1.0, %v4675_v58  ;;  %v4700_v8 = vand.u32 2147483648, %v4531_v48  ;;  %vm4694_vm14 = vweird.f32 %v4531_v48 }
 0x857   : > { %v4333_v30 = vpop.xlane.xlu2 %4332  ;;  %v4254_v35 = vmax.f32 %v4214_v32, 0.0  ;;  %vm4699_vm0 = vcmp.eq.f32.partialorder %v4698_v16, 8.507059e+37 }
 0x858   : > { %v4677_v5 = vmul.f32 %v6143_v52, %v4676_v38  ;;  %v4405_v27 = vadd.f32 %v4333_v30, %v8890_v41  ;;  %v4701_v21 = vor.u32 1.1754944e-38, %v4700_v8 }
 0x859   : > { %v4291_v26 = vmul.f32 %v8819_v10, %v4254_v35 }
 0x85a   : > { %v6145_v22 = vpop.eup %6144  ;;  %v4678_v43 = vadd.f32 %v6143_v52, %v4677_v5  ;;  %v5876_v14 = vmul.f32 -1.442695, %v4405_v27 }
 0x85b   : > { %v6147_v59 = vpop.eup %6146  ;;  %v4532_v53 = vadd.f32 1.0, %v6145_v22  ;;  %v4376_v25 = vsel %vm4297_vm3, %v4291_v26, 0.0 }
 0x85c   : > { %v4682_v42 = vsel %vm4681_vm11, %v6143_v52, %v4678_v43  ;;  %v4690_v9 = vmul.f32 %v6147_v59, %v4531_v48  ;;  %6148 = vpow2.f32 %v5876_v14  ;;  %v4215_v47 = vpop.f32.mrf.mxu2  ;;  %4377 = vadd.xlane.f32.xlu2 %v4376_v25  ;;  %vm4695_vm13 = vweird.f32 %v6147_v59 }
 0x85d   : > { %v4687_v63 = vsel %vm4684_vm12, %v4686_v54, %v4682_v42  ;;  %6150 = vrcp.f32 %v4532_v53  ;;  %v4216_v1 = vadd.f32 %v4215_v47, %v8813_v55  ;;  %vm4696_vm15 = vmor %vm4694_vm14, %vm4695_vm13  ;;  %v4713_v40 = vand.u32 2147483647, %v4532_v53 }
 0x85e   : > { %5043 = vst.msk [vmem:[%s8911_s28 + $0x40] sm:$0xff] %vm5034_vm6, %v4687_v63  ;;  %v4691_v24 = vsub.f32 1.0, %v4690_v9  ;;  %v4715_v46 = vand.u32 2147483648, %v4532_v53  ;;  %vm4709_vm2 = vweird.f32 %v4532_v53  ;;  %v6235_v63 = vld [vmem:[%s9064_s9 + $0x6] ss:$0 sm:$0xff] }
 0x85f   : > { %v4336_v28 = vpop.xlane.xlu0 %4335  ;;  %v4255_v44 = vmax.f32 %v4216_v1, 0.0  ;;  %vm4714_vm5 = vcmp.eq.f32.partialorder %v4713_v40, 8.507059e+37 }
 0x860   : > { %v4692_v15 = vmul.f32 %v6147_v59, %v4691_v24  ;;  %v4406_v3 = vadd.f32 %v4336_v28, %v8890_v41  ;;  %v4716_v52 = vor.u32 1.1754944e-38, %v4715_v46 }
 0x861   : > { %v4292_v60 = vmul.f32 %v8819_v10, %v4255_v44 }
 0x862   : > { %v6149_v31 = vpop.eup %6148  ;;  %v4693_v18 = vadd.f32 %v6147_v59, %v4692_v15  ;;  %v5877_v17 = vmul.f32 -1.442695, %v4406_v3 }
 0x863   : > { %v6151_v29 = vpop.eup %6150  ;;  %v4533_v39 = vadd.f32 1.0, %v6149_v31  ;;  %v4379_v57 = vsel %vm4297_vm3, %v4292_v60, 0.0 }
 0x864   : > { %v4697_v56 = vsel %vm4696_vm15, %v6147_v59, %v4693_v18  ;;  %v4705_v49 = vmul.f32 %v6151_v29, %v4532_v53  ;;  %6152 = vpow2.f32 %v5877_v17  ;;  %v4218_v23 = vpop.f32.mrf.mxu2  ;;  %4380 = vadd.xlane.f32.xlu0 %v4379_v57  ;;  %vm4710_vm1 = vweird.f32 %v6151_v29  ;;  %v6236_v18 = vld [vmem:[%s9063_s8] ss:$0 sm:$0xff] }
 0x865   : > { %v4702_v4 = vsel %vm4699_vm0, %v4701_v21, %v4697_v56  ;;  %6154 = vrcp.f32 %v4533_v39  ;;  %v4219_v6 = vadd.f32 %v4218_v23, %v8813_v55  ;;  %vm4711_vm4 = vmor %vm4709_vm2, %vm4710_vm1  ;;  %v4728_v2 = vand.u32 2147483647, %v4533_v39 }
 0x866   : > { %5044 = vst.msk [vmem:[%s8911_s28 + $0x48] sm:$0xff] %vm5034_vm6, %v4702_v4  ;;  %v4706_v19 = vsub.f32 1.0, %v4705_v49  ;;  %v4730_v11 = vand.u32 2147483648, %v4533_v39  ;;  %vm4724_vm8 = vweird.f32 %v4533_v39 }
 0x867   : > { %v4339_v62 = vpop.xlane.xlu1 %4338  ;;  %v4256_v50 = vmax.f32 %v4219_v6, 0.0  ;;  %vm4729_vm10 = vcmp.eq.f32.partialorder %v4728_v2, 8.507059e+37 }
 0x868   : > { %v4707_v13 = vmul.f32 %v6151_v29, %v4706_v19  ;;  %v4407_v45 = vadd.f32 %v4339_v62, %v8890_v41 }
 0x869   : > { %v4293_v12 = vmul.f32 %v8819_v10, %v4256_v50 }
 0x86a   : > { %v6153_v36 = vpop.eup %6152  ;;  %v4708_v33 = vadd.f32 %v6151_v29, %v4707_v13  ;;  %v5878_v7 = vmul.f32 -1.442695, %v4407_v45 }
 0x86b   : > { %v6155_v37 = vpop.eup %6154  ;;  %v4534_v61 = vadd.f32 1.0, %v6153_v36  ;;  %v4382_v32 = vsel %vm4297_vm3, %v4293_v12, 0.0 }
 0x86c   : > { %v4712_v48 = vsel %vm4711_vm4, %v6151_v29, %v4708_v33  ;;  %v4720_v0 = vmul.f32 %v6155_v37, %v4533_v39  ;;  %6156 = vpow2.f32 %v5878_v7  ;;  %v4220_v58 = vpop.f32.mrf.mxu2  ;;  %4383 = vadd.xlane.f32.xlu1 %v4382_v32  ;;  %vm4725_vm7 = vweird.f32 %v6155_v37 }
 0x86d   : > { %v4717_v51 = vsel %vm4714_vm5, %v4716_v52, %v4712_v48  ;;  %6158 = vrcp.f32 %v4534_v61  ;;  %v4221_v38 = vadd.f32 %v4220_v58, %v8813_v55  ;;  %vm4726_vm9 = vmor %vm4724_vm8, %vm4725_vm7  ;;  %v4731_v55 = vor.u32 1.1754944e-38, %v4730_v11 }
 0x86e   : > { %5045 = vst.msk [vmem:[%s8911_s28 + $0x50] sm:$0xff] %vm5034_vm6, %v4717_v51  ;;  %v4721_v34 = vsub.f32 1.0, %v4720_v0  ;;  %v4743_v1 = vand.u32 2147483647, %v4534_v61  ;;  %v4745_v25 = vand.u32 2147483648, %v4534_v61  ;;  %vm4739_vm12 = vweird.f32 %v4534_v61 }
 0x86f   : > { %v4342_v20 = vpop.xlane.xlu2 %4341  ;;  %v4257_v5 = vmax.f32 %v4221_v38, 0.0 }
 0x870   : > { %v4722_v30 = vmul.f32 %v6155_v37, %v4721_v34  ;;  %v4408_v35 = vadd.f32 %v4342_v20, %v8890_v41  ;;  %v4746_v29 = vor.u32 1.1754944e-38, %v4745_v25  ;;  %vm4744_vm14 = vcmp.eq.f32.partialorder %v4743_v1, 8.507059e+37 }
 0x871   : > { %v4294_v14 = vmul.f32 %v8819_v10, %v4257_v5 }
 0x872   : > { %v6157_v27 = vpop.eup %6156  ;;  %v4723_v22 = vadd.f32 %v6155_v37, %v4722_v30  ;;  %v5879_v43 = vmul.f32 -1.442695, %v4408_v35 }
 0x873   : > { %v6159_v26 = vpop.eup %6158  ;;  %v4535_v59 = vadd.f32 1.0, %v6157_v27  ;;  %v4385_v10 = vsel %vm4297_vm3, %v4294_v14, 0.0 }
 0x874   : > { %v4727_v54 = vsel %vm4726_vm9, %v6155_v37, %v4723_v22  ;;  %v4735_v53 = vmul.f32 %v6159_v26, %v4534_v61  ;;  %6160 = vpow2.f32 %v5879_v43  ;;  %v4223_v42 = vpop.f32.mrf.mxu2  ;;  %4386 = vadd.xlane.f32.xlu2 %v4385_v10  ;;  %vm4740_vm11 = vweird.f32 %v6159_v26 }
 0x875   : > { %v4732_v9 = vsel %vm4729_vm10, %v4731_v55, %v4727_v54  ;;  %6162 = vrcp.f32 %v4535_v59  ;;  %v4224_v24 = vadd.f32 %v6235_v63, %v4223_v42  ;;  %vm4741_vm13 = vmor %vm4739_vm12, %vm4740_vm11  ;;  %v4758_v57 = vand.u32 2147483647, %v4535_v59 }
 0x876   : > { %5046 = vst.msk [vmem:[%s8911_s28 + $0x58] sm:$0xff] %vm5034_vm6, %v4732_v9  ;;  %v4736_v47 = vsub.f32 1.0, %v4735_v53  ;;  %v4760_v40 = vand.u32 2147483648, %v4535_v59  ;;  %vm4754_vm0 = vweird.f32 %v4535_v59 }
 0x877   : > { %v4345_v16 = vpop.xlane.xlu0 %4344  ;;  %v4258_v28 = vmax.f32 %v4224_v24, 0.0  ;;  %vm4759_vm2 = vcmp.eq.f32.partialorder %v4758_v57, 8.507059e+37 }
 0x878   : > { %v4737_v8 = vmul.f32 %v6159_v26, %v4736_v47  ;;  %v4409_v15 = vadd.f32 %v4345_v16, %v8890_v41  ;;  %v4761_v37 = vor.u32 1.1754944e-38, %v4760_v40 }
 0x879   : > { %v4295_v17 = vmul.f32 %v6236_v18, %v4258_v28 }
 0x87a   : > { %v6161_v44 = vpop.eup %6160  ;;  %v4738_v3 = vadd.f32 %v6159_v26, %v4737_v8  ;;  %v5880_v31 = vmul.f32 -1.442695, %v4409_v15 }
 0x87b   : > { %v6163_v60 = vpop.eup %6162  ;;  %v4536_v21 = vadd.f32 1.0, %v6161_v44  ;;  %v4388_v6 = vsel %vm4297_vm3, %v4295_v17, 0.0 }
 0x87c   : > { %v4742_v39 = vsel %vm4741_vm13, %v6159_v26, %v4738_v3  ;;  %v4750_v56 = vmul.f32 %v6163_v60, %v4535_v59  ;;  %6164 = vpow2.f32 %v5880_v31  ;;  %v4225_v49 = vpop.f32.mrf.mxu2  ;;  %4389 = vadd.xlane.f32.xlu0 %v4388_v6  ;;  %vm4755_vm15 = vweird.f32 %v6163_v60 }
 0x87d   : > { %v4747_v23 = vsel %vm4744_vm14, %v4746_v29, %v4742_v39  ;;  %6166 = vrcp.f32 %v4536_v21  ;;  %v4226_v19 = vadd.f32 %v6235_v63, %v4225_v49  ;;  %vm4756_vm1 = vmor %vm4754_vm0, %vm4755_vm15  ;;  %v4775_v34 = vand.u32 2147483648, %v4536_v21 }
 0x87e   : > { %5047 = vst.msk [vmem:[%s8911_s28 + $0x60] sm:$0xff] %vm5034_vm6, %v4747_v23  ;;  %v4751_v4 = vsub.f32 1.0, %v4750_v56  ;;  %v4773_v32 = vand.u32 2147483647, %v4536_v21  ;;  %vm4769_vm5 = vweird.f32 %v4536_v21 }
 0x87f   : > { %v4348_v46 = vpop.xlane.xlu1 %4347  ;;  %v4259_v13 = vmax.f32 %v4226_v19, 0.0  ;;  %v4776_v35 = vor.u32 1.1754944e-38, %v4775_v34 }
 0x880   : > { %v4752_v62 = vmul.f32 %v6163_v60, %v4751_v4  ;;  %v4410_v50 = vadd.f32 %v4348_v46, %v8890_v41  ;;  %vm4774_vm8 = vcmp.eq.f32.partialorder %v4773_v32, 8.507059e+37 }
 0x881   : > { %v4296_v7 = vmul.f32 %v6236_v18, %v4259_v13 }
 0x882   : > { %v6165_v45 = vpop.eup %6164  ;;  %v4753_v36 = vadd.f32 %v6163_v60, %v4752_v62  ;;  %v5881_v33 = vmul.f32 -1.442695, %v4410_v50 }
 0x883   : > { %v6167_v12 = vpop.eup %6166  ;;  %v4537_v52 = vadd.f32 1.0, %v6165_v45  ;;  %v4391_v51 = vsel %vm4297_vm3, %v4296_v7, 0.0 }
 0x884   : > { %v4757_v61 = vsel %vm4756_vm1, %v6163_v60, %v4753_v36  ;;  %v4765_v48 = vmul.f32 %v6167_v12, %v4536_v21  ;;  %6168 = vpow2.f32 %v5881_v33  ;;  %4392 = vadd.xlane.f32.xlu1 %v4391_v51  ;;  %vm4770_vm4 = vweird.f32 %v6167_v12 }
 0x885   : > { %v4762_v0 = vsel %vm4759_vm2, %v4761_v37, %v4757_v61  ;;  %6170 = vrcp.f32 %v4537_v52  ;;  %vm4771_vm7 = vmor %vm4769_vm5, %vm4770_vm4  ;;  %v4790_v59 = vand.u32 2147483648, %v4537_v52  ;;  %v4788_v53 = vand.u32 2147483647, %v4537_v52 }
 0x886   : > { %5048 = vst.msk [vmem:[%s8911_s28 + $0x68] sm:$0xff] %vm5034_vm6, %v4762_v0  ;;  %v4766_v58 = vsub.f32 1.0, %v4765_v48  ;;  %vm4784_vm9 = vweird.f32 %v4537_v52 }
 0x887   : > { %v4351_v2 = vpop.xlane.xlu2 %4350  ;;  %v4791_v63 = vor.u32 1.1754944e-38, %v4790_v59  ;;  %vm4789_vm11 = vcmp.eq.f32.partialorder %v4788_v53, 8.507059e+37 }
 0x888   : > { %v4767_v38 = vmul.f32 %v6167_v12, %v4766_v58  ;;  %v4411_v11 = vadd.f32 %v4351_v2, %v8890_v41 }
 0x88a   : > { %v6169_v20 = vpop.eup %6168  ;;  %v4768_v30 = vadd.f32 %v6167_v12, %v4767_v38  ;;  %v5882_v22 = vmul.f32 -1.442695, %v4411_v11 }
 0x88b   : > { %v6171_v5 = vpop.eup %6170  ;;  %v4538_v27 = vadd.f32 1.0, %v6169_v20 }
 0x88c   : > { %v4772_v43 = vsel %vm4771_vm7, %v6167_v12, %v4768_v30  ;;  %v4780_v14 = vmul.f32 %v6171_v5, %v4537_v52  ;;  %vm4785_vm3 = vweird.f32 %v6171_v5 }
 0x88d   : > { %v4777_v26 = vsel %vm4774_vm8, %v4776_v35, %v4772_v43  ;;  %6172 = vrcp.f32 %v4538_v27  ;;  %vm4786_vm10 = vmor %vm4784_vm9, %vm4785_vm3  ;;  %v4805_v44 = vand.u32 2147483648, %v4538_v27  ;;  %v4803_v31 = vand.u32 2147483647, %v4538_v27 }
 0x88e   : > { %5049 = vst.msk [vmem:[%s8911_s28 + $0x70] sm:$0xff] %vm5034_vm6, %v4777_v26  ;;  %v4781_v55 = vsub.f32 1.0, %v4780_v14  ;;  %6174 = vpow2.f32 %v5882_v22  ;;  %vm4799_vm13 = vweird.f32 %v4538_v27 }
 0x88f   : > { %v4354_v9 = vpop.xlane.xlu0 %4353  ;;  %v4806_v60 = vor.u32 1.1754944e-38, %v4805_v44  ;;  %vm4804_vm15 = vcmp.eq.f32.partialorder %v4803_v31, 8.507059e+37 }
 0x890   : > { %v4782_v54 = vmul.f32 %v6171_v5, %v4781_v55  ;;  %v4412_v24 = vadd.f32 %v4354_v9, %v8890_v41 }
 0x892   : > { %v4783_v42 = vadd.f32 %v6171_v5, %v4782_v54  ;;  %v5883_v28 = vmul.f32 -1.442695, %v4412_v24 }
 0x893   : > { %v6173_v47 = vpop.eup %6172 }
 0x894   : > { %v6175_v10 = vpop.eup %6174  ;;  %v4787_v1 = vsel %vm4786_vm10, %v6171_v5, %v4783_v42  ;;  %v4795_v25 = vmul.f32 %v6173_v47, %v4538_v27  ;;  %vm4800_vm12 = vweird.f32 %v6173_v47 }
 0x895   : > { %v4792_v16 = vsel %vm4789_vm11, %v4791_v63, %v4787_v1  ;;  %v4539_v8 = vadd.f32 1.0, %v6175_v10  ;;  %vm4801_vm14 = vmor %vm4799_vm13, %vm4800_vm12 }
 0x896   : > { %5050 = vst.msk [vmem:[%s8911_s28 + $0x78] sm:$0xff] %vm5034_vm6, %v4792_v16  ;;  %v4796_v15 = vsub.f32 1.0, %v4795_v25 }
 0x897   : > { %6176 = vrcp.f32 %v4539_v8  ;;  %v4357_v17 = vpop.xlane.xlu1 %4356  ;;  %v4820_v57 = vand.u32 2147483648, %v4539_v8  ;;  %v4818_v46 = vand.u32 2147483647, %v4539_v8  ;;  %vm4814_vm1 = vweird.f32 %v4539_v8 }
 0x898   : > { %v4797_v3 = vmul.f32 %v6173_v47, %v4796_v15  ;;  %6178 = vpow2.f32 %v5883_v28  ;;  %v4413_v29 = vadd.f32 %v4357_v17, %v8890_v41 }
 0x899   : > { %v4821_v36 = vor.u32 1.1754944e-38, %v4820_v57  ;;  %vm4819_vm4 = vcmp.eq.f32.partialorder %v4818_v46, 8.507059e+37 }
 0x89a   : > { %v4798_v18 = vadd.f32 %v6173_v47, %v4797_v3  ;;  %v5884_v49 = vmul.f32 -1.442695, %v4413_v29 }
 0x89c   : > { %v4802_v21 = vsel %vm4801_vm14, %v6173_v47, %v4798_v18  ;;  %6180 = vpow2.f32 %v5884_v49 }
 0x89d   : > { %v6177_v39 = vpop.eup %6176  ;;  %v4807_v56 = vsel %vm4804_vm15, %v4806_v60, %v4802_v21 }
 0x89e   : > { %v6179_v23 = vpop.eup %6178  ;;  %5051 = vst.msk [vmem:[%s8911_s28 + $0x80] sm:$0xff] %vm5034_vm6, %v4807_v56  ;;  %v4810_v4 = vmul.f32 %v6177_v39, %v4539_v8  ;;  %vm4815_vm0 = vweird.f32 %v6177_v39 }
 0x89f   : > { %v4540_v19 = vadd.f32 1.0, %v6179_v23  ;;  %v4360_v62 = vpop.xlane.xlu2 %4359  ;;  %vm4816_vm2 = vmor %vm4814_vm1, %vm4815_vm0 }
 0x8a0   : > { %v4811_v6 = vsub.f32 1.0, %v4810_v4  ;;  %v4414_v13 = vadd.f32 %v4360_v62, %v8890_v41  ;;  %v9011_v41 = vld [vmem:[%s9064_s9 + $0x7] ss:$0 sm:$0xff] }
 0x8a1   : > { %6182 = vrcp.f32 %v4540_v19  ;;  %v4835_v58 = vand.u32 2147483648, %v4540_v19  ;;  %v4833_v38 = vand.u32 2147483647, %v4540_v19  ;;  %vm4829_vm7 = vweird.f32 %v4540_v19 }
 0x8a2   : > { %v4812_v40 = vmul.f32 %v6177_v39, %v4811_v6  ;;  %v6181_v45 = vpop.eup %6180  ;;  %v5885_v33 = vmul.f32 -1.442695, %v4414_v13 }
 0x8a3   : > { %v4541_v12 = vadd.f32 1.0, %v6181_v45  ;;  %v4836_v5 = vor.u32 1.1754944e-38, %v4835_v58  ;;  %vm4834_vm3 = vcmp.eq.f32.partialorder %v4833_v38, 8.507059e+37 }
 0x8a4   : > { %v4813_v50 = vadd.f32 %v6177_v39, %v4812_v40  ;;  %6184 = vpow2.f32 %v5885_v33 }
 0x8a5   : > { %6186 = vrcp.f32 %v4541_v12  ;;  %v4850_v14 = vand.u32 2147483648, %v4541_v12  ;;  %v4848_v59 = vand.u32 2147483647, %v4541_v12  ;;  %vm4844_vm10 = vweird.f32 %v4541_v12 }
 0x8a6   : > { %v4817_v7 = vsel %vm4816_vm2, %v6177_v39, %v4813_v50 }
 0x8a7   : > { %v6183_v37 = vpop.eup %6182  ;;  %v4822_v52 = vsel %vm4819_vm4, %v4821_v36, %v4817_v7  ;;  %v4363_v0 = vpop.xlane.xlu0 %4362  ;;  %v4851_v63 = vor.u32 1.1754944e-38, %v4850_v14  ;;  %vm4849_vm12 = vcmp.eq.f32.partialorder %v4848_v59, 8.507059e+37 }
 0x8a8   : > { %5052 = vst.msk [vmem:[%s8911_s28 + $0x88] sm:$0xff] %vm5034_vm6, %v4822_v52  ;;  %v4825_v61 = vmul.f32 %v6183_v37, %v4540_v19  ;;  %v4415_v51 = vadd.f32 %v9011_v41, %v4363_v0  ;;  %vm4830_vm5 = vweird.f32 %v6183_v37 }
 0x8a9   : > { %vm4831_vm8 = vmor %vm4829_vm7, %vm4830_vm5 }
 0x8aa   : > { %v4826_v48 = vsub.f32 1.0, %v4825_v61  ;;  %v6185_v32 = vpop.eup %6184  ;;  %v5886_v2 = vmul.f32 -1.442695, %v4415_v51 }
 0x8ab   : > { %v6187_v11 = vpop.eup %6186  ;;  %v4542_v30 = vadd.f32 1.0, %v6185_v32 }
 0x8ac   : > { %v4827_v34 = vmul.f32 %v6183_v37, %v4826_v48  ;;  %v4840_v35 = vmul.f32 %v6187_v11, %v4541_v12  ;;  %6188 = vpow2.f32 %v5886_v2  ;;  %vm4845_vm9 = vweird.f32 %v6187_v11 }
 0x8ad   : > { %6190 = vrcp.f32 %v4542_v30  ;;  %vm4846_vm11 = vmor %vm4844_vm10, %vm4845_vm9  ;;  %v4865_v8 = vand.u32 2147483648, %v4542_v30  ;;  %v4863_v44 = vand.u32 2147483647, %v4542_v30  ;;  %vm4859_vm14 = vweird.f32 %v4542_v30 }
 0x8ae   : > { %v4828_v20 = vadd.f32 %v6183_v37, %v4827_v34  ;;  %v4841_v43 = vsub.f32 1.0, %v4840_v35 }
 0x8af   : > { %v4366_v26 = vpop.xlane.xlu1 %4365  ;;  %v4866_v29 = vor.u32 1.1754944e-38, %v4865_v8  ;;  %vm4864_vm0 = vcmp.eq.f32.partialorder %v4863_v44, 8.507059e+37 }
 0x8b0   : > { %v4832_v27 = vsel %vm4831_vm8, %v6183_v37, %v4828_v20  ;;  %v4842_v55 = vmul.f32 %v6187_v11, %v4841_v43  ;;  %v4416_v54 = vadd.f32 %v9011_v41, %v4366_v26 }
 0x8b1   : > { %v4837_v22 = vsel %vm4834_vm3, %v4836_v5, %v4832_v27 }
 0x8b2   : > { %5053 = vst.msk [vmem:[%s8911_s28 + $0x90] sm:$0xff] %vm5034_vm6, %v4837_v22  ;;  %v6189_v53 = vpop.eup %6188  ;;  %v4843_v42 = vadd.f32 %v6187_v11, %v4842_v55  ;;  %v5887_v9 = vmul.f32 -1.442695, %v4416_v54 }
 0x8b3   : > { %v6191_v47 = vpop.eup %6190  ;;  %v4543_v24 = vadd.f32 1.0, %v6189_v53 }
 0x8b4   : > { %v4847_v10 = vsel %vm4846_vm11, %v6187_v11, %v4843_v42  ;;  %v4855_v1 = vmul.f32 %v6191_v47, %v4542_v30  ;;  %6192 = vpow2.f32 %v5887_v9  ;;  %vm4860_vm13 = vweird.f32 %v6191_v47 }
 0x8b5   : > { %v4852_v25 = vsel %vm4849_vm12, %v4851_v63, %v4847_v10  ;;  %6194 = vrcp.f32 %v4543_v24  ;;  %vm4861_vm15 = vmor %vm4859_vm14, %vm4860_vm13  ;;  %v4880_v4 = vand.u32 2147483648, %v4543_v24  ;;  %v4878_v57 = vand.u32 2147483647, %v4543_v24 }
 0x8b6   : > { %5054 = vst.msk [vmem:[%s8911_s28 + $0x98] sm:$0xff] %vm5034_vm6, %v4852_v25  ;;  %v4856_v16 = vsub.f32 1.0, %v4855_v1  ;;  %vm4874_vm2 = vweird.f32 %v4543_v24 }
 0x8b7   : > { %v4369_v28 = vpop.xlane.xlu2 %4368  ;;  %v4881_v45 = vor.u32 1.1754944e-38, %v4880_v4  ;;  %vm4879_vm5 = vcmp.eq.f32.partialorder %v4878_v57, 8.507059e+37 }
 0x8b8   : > { %v4857_v15 = vmul.f32 %v6191_v47, %v4856_v16  ;;  %v4417_v3 = vadd.f32 %v9011_v41, %v4369_v28 }
 0x8ba   : > { %v6193_v31 = vpop.eup %6192  ;;  %v4858_v18 = vadd.f32 %v6191_v47, %v4857_v15  ;;  %v5888_v17 = vmul.f32 -1.442695, %v4417_v3 }
 0x8bb   : > { %v6195_v60 = vpop.eup %6194  ;;  %v4544_v21 = vadd.f32 1.0, %v6193_v31 }
 0x8bc   : > { %v4862_v39 = vsel %vm4861_vm15, %v6191_v47, %v4858_v18  ;;  %v4870_v56 = vmul.f32 %v6195_v60, %v4543_v24  ;;  %6196 = vpow2.f32 %v5888_v17  ;;  %vm4875_vm1 = vweird.f32 %v6195_v60 }
 0x8bd   : > { %v4867_v49 = vsel %vm4864_vm0, %v4866_v29, %v4862_v39  ;;  %6198 = vrcp.f32 %v4544_v21  ;;  %vm4876_vm4 = vmor %vm4874_vm2, %vm4875_vm1  ;;  %v4895_v52 = vand.u32 2147483648, %v4544_v21  ;;  %v4893_v0 = vand.u32 2147483647, %v4544_v21 }
 0x8be   : > { %5055 = vst.msk [vmem:[%s8911_s28 + $0xa0] sm:$0xff] %vm5034_vm6, %v4867_v49  ;;  %v4871_v23 = vsub.f32 1.0, %v4870_v56  ;;  %vm4889_vm8 = vweird.f32 %v4544_v21 }
 0x8bf   : > { %v4372_v19 = vpop.xlane.xlu0 %4371  ;;  %v4896_v2 = vor.u32 1.1754944e-38, %v4895_v52  ;;  %vm4894_vm9 = vcmp.eq.f32.partialorder %v4893_v0, 8.507059e+37 }
 0x8c0   : > { %v4872_v6 = vmul.f32 %v6195_v60, %v4871_v23  ;;  %v4418_v40 = vadd.f32 %v9011_v41, %v4372_v19 }
 0x8c2   : > { %v6197_v46 = vpop.eup %6196  ;;  %v4873_v62 = vadd.f32 %v6195_v60, %v4872_v6  ;;  %v5889_v13 = vmul.f32 -1.442695, %v4418_v40 }
 0x8c3   : > { %v6199_v50 = vpop.eup %6198  ;;  %v4545_v36 = vadd.f32 1.0, %v6197_v46 }
 0x8c4   : > { %v4877_v33 = vsel %vm4876_vm4, %v6195_v60, %v4873_v62  ;;  %v4885_v7 = vmul.f32 %v6199_v50, %v4544_v21  ;;  %6200 = vpow2.f32 %v5889_v13  ;;  %vm4890_vm7 = vweird.f32 %v6199_v50 }
 0x8c5   : > { %v4882_v12 = vsel %vm4879_vm5, %v4881_v45, %v4877_v33  ;;  %6202 = vrcp.f32 %v4545_v36  ;;  %vm4891_vm3 = vmor %vm4889_vm8, %vm4890_vm7  ;;  %v4910_v27 = vand.u32 2147483648, %v4545_v36  ;;  %v4908_v14 = vand.u32 2147483647, %v4545_v36 }
 0x8c6   : > { %5056 = vst.msk [vmem:[%s8911_s28 + $0xa8] sm:$0xff] %vm5034_vm6, %v4882_v12  ;;  %v4886_v37 = vsub.f32 1.0, %v4885_v7  ;;  %vm4904_vm11 = vweird.f32 %v4545_v36 }
 0x8c7   : > { %v4375_v61 = vpop.xlane.xlu1 %4374  ;;  %v4911_v42 = vor.u32 1.1754944e-38, %v4910_v27  ;;  %vm4909_vm13 = vcmp.eq.f32.partialorder %v4908_v14, 8.507059e+37 }
 0x8c8   : > { %v4887_v48 = vmul.f32 %v6199_v50, %v4886_v37  ;;  %v4419_v58 = vadd.f32 %v9011_v41, %v4375_v61 }
 0x8ca   : > { %v6201_v51 = vpop.eup %6200  ;;  %v4888_v34 = vadd.f32 %v6199_v50, %v4887_v48  ;;  %v5890_v38 = vmul.f32 -1.442695, %v4419_v58 }
 0x8cb   : > { %v6203_v32 = vpop.eup %6202  ;;  %v4546_v11 = vadd.f32 1.0, %v6201_v51 }
 0x8cc   : > { %v4892_v20 = vsel %vm4891_vm3, %v6199_v50, %v4888_v34  ;;  %v4900_v30 = vmul.f32 %v6203_v32, %v4545_v36  ;;  %6204 = vpow2.f32 %v5890_v38  ;;  %vm4905_vm10 = vweird.f32 %v6203_v32 }
 0x8cd   : > { %v4897_v5 = vsel %vm4894_vm9, %v4896_v2, %v4892_v20  ;;  %6206 = vrcp.f32 %v4546_v11  ;;  %vm4906_vm12 = vmor %vm4904_vm11, %vm4905_vm10  ;;  %v4925_v1 = vand.u32 2147483648, %v4546_v11  ;;  %v4923_v8 = vand.u32 2147483647, %v4546_v11 }
 0x8ce   : > { %5057 = vst.msk [vmem:[%s8911_s28 + $0xb0] sm:$0xff] %vm5034_vm6, %v4897_v5  ;;  %v4901_v35 = vsub.f32 1.0, %v4900_v30  ;;  %vm4919_vm15 = vweird.f32 %v4546_v11 }
 0x8cf   : > { %v4378_v22 = vpop.xlane.xlu2 %4377  ;;  %v4926_v18 = vor.u32 1.1754944e-38, %v4925_v1  ;;  %vm4924_vm1 = vcmp.eq.f32.partialorder %v4923_v8, 8.507059e+37 }
 0x8d0   : > { %v4902_v43 = vmul.f32 %v6203_v32, %v4901_v35  ;;  %v4420_v26 = vadd.f32 %v9011_v41, %v4378_v22 }
 0x8d2   : > { %v6205_v55 = vpop.eup %6204  ;;  %v4903_v59 = vadd.f32 %v6203_v32, %v4902_v43  ;;  %v5891_v54 = vmul.f32 -1.442695, %v4420_v26 }
 0x8d3   : > { %v6207_v53 = vpop.eup %6206  ;;  %v4547_v9 = vadd.f32 1.0, %v6205_v55 }
 0x8d4   : > { %v4907_v47 = vsel %vm4906_vm12, %v6203_v32, %v4903_v59  ;;  %v4915_v63 = vmul.f32 %v6207_v53, %v4546_v11  ;;  %6208 = vpow2.f32 %v5891_v54  ;;  %vm4920_vm14 = vweird.f32 %v6207_v53 }
 0x8d5   : > { %v4912_v24 = vsel %vm4909_vm13, %v4911_v42, %v4907_v47  ;;  %6210 = vrcp.f32 %v4547_v9  ;;  %vm4921_vm0 = vmor %vm4919_vm15, %vm4920_vm14  ;;  %v4940_v56 = vand.u32 2147483648, %v4547_v9  ;;  %v4938_v4 = vand.u32 2147483647, %v4547_v9 }
 0x8d6   : > { %5058 = vst.msk [vmem:[%s8911_s28 + $0xb8] sm:$0xff] %vm5034_vm6, %v4912_v24  ;;  %v4916_v10 = vsub.f32 1.0, %v4915_v63  ;;  %vm4934_vm4 = vweird.f32 %v4547_v9 }
 0x8d7   : > { %v4381_v25 = vpop.xlane.xlu0 %4380  ;;  %v4941_v62 = vor.u32 1.1754944e-38, %v4940_v56  ;;  %vm4939_vm7 = vcmp.eq.f32.partialorder %v4938_v4, 8.507059e+37 }
 0x8d8   : > { %v4917_v16 = vmul.f32 %v6207_v53, %v4916_v10  ;;  %v4421_v28 = vadd.f32 %v9011_v41, %v4381_v25 }
 0x8da   : > { %v6209_v15 = vpop.eup %6208  ;;  %v4918_v44 = vadd.f32 %v6207_v53, %v4917_v16  ;;  %v5892_v3 = vmul.f32 -1.442695, %v4421_v28 }
 0x8db   : > { %v6211_v31 = vpop.eup %6210  ;;  %v4548_v17 = vadd.f32 1.0, %v6209_v15 }
 0x8dc   : > { %v4922_v60 = vsel %vm4921_vm0, %v6207_v53, %v4918_v44  ;;  %v4930_v29 = vmul.f32 %v6211_v31, %v4547_v9  ;;  %6212 = vpow2.f32 %v5892_v3  ;;  %vm4935_vm2 = vweird.f32 %v6211_v31 }
 0x8dd   : > { %v4927_v21 = vsel %vm4924_vm1, %v4926_v18, %v4922_v60  ;;  %6214 = vrcp.f32 %v4548_v17  ;;  %vm4936_vm5 = vmor %vm4934_vm4, %vm4935_vm2  ;;  %v4955_v7 = vand.u32 2147483648, %v4548_v17  ;;  %v4953_v52 = vand.u32 2147483647, %v4548_v17 }
 0x8de   : > { %5059 = vst.msk [vmem:[%s8911_s28 + $0xc0] sm:$0xff] %vm5034_vm6, %v4927_v21  ;;  %v4931_v39 = vsub.f32 1.0, %v4930_v29  ;;  %vm4949_vm3 = vweird.f32 %v4548_v17 }
 0x8df   : > { %v4384_v49 = vpop.xlane.xlu1 %4383  ;;  %v4956_v34 = vor.u32 1.1754944e-38, %v4955_v7  ;;  %vm4954_vm10 = vcmp.eq.f32.partialorder %v4953_v52, 8.507059e+37 }
 0x8e0   : > { %v4932_v23 = vmul.f32 %v6211_v31, %v4931_v39  ;;  %v4422_v19 = vadd.f32 %v9011_v41, %v4384_v49 }
 0x8e2   : > { %v6213_v6 = vpop.eup %6212  ;;  %v4933_v57 = vadd.f32 %v6211_v31, %v4932_v23  ;;  %v5893_v40 = vmul.f32 -1.442695, %v4422_v19 }
 0x8e3   : > { %v6215_v46 = vpop.eup %6214  ;;  %v4549_v13 = vadd.f32 1.0, %v6213_v6 }
 0x8e4   : > { %v4937_v50 = vsel %vm4936_vm5, %v6211_v31, %v4933_v57  ;;  %v4945_v45 = vmul.f32 %v6215_v46, %v4548_v17  ;;  %6216 = vpow2.f32 %v5893_v40  ;;  %vm4950_vm8 = vweird.f32 %v6215_v46 }
 0x8e5   : > { %v4942_v36 = vsel %vm4939_vm7, %v4941_v62, %v4937_v50  ;;  %6218 = vrcp.f32 %v4549_v13  ;;  %vm4951_vm9 = vmor %vm4949_vm3, %vm4950_vm8  ;;  %v4970_v30 = vand.u32 2147483648, %v4549_v13  ;;  %v4968_v27 = vand.u32 2147483647, %v4549_v13 }
 0x8e6   : > { %5060 = vst.msk [vmem:[%s8911_s28 + $0xc8] sm:$0xff] %vm5034_vm6, %v4942_v36  ;;  %v4946_v33 = vsub.f32 1.0, %v4945_v45  ;;  %vm4964_vm12 = vweird.f32 %v4549_v13 }
 0x8e7   : > { %v4387_v12 = vpop.xlane.xlu2 %4386  ;;  %v4971_v59 = vor.u32 1.1754944e-38, %v4970_v30  ;;  %vm4969_vm14 = vcmp.eq.f32.partialorder %v4968_v27, 8.507059e+37 }
 0x8e8   : > { %v4947_v37 = vmul.f32 %v6215_v46, %v4946_v33  ;;  %v4423_v61 = vadd.f32 %v9011_v41, %v4387_v12 }
 0x8ea   : > { %v6217_v48 = vpop.eup %6216  ;;  %v4948_v0 = vadd.f32 %v6215_v46, %v4947_v37  ;;  %v5894_v58 = vmul.f32 -1.442695, %v4423_v61 }
 0x8eb   : > { %v6219_v51 = vpop.eup %6218  ;;  %v4550_v38 = vadd.f32 1.0, %v6217_v48 }
 0x8ec   : > { %v4952_v32 = vsel %vm4951_vm9, %v6215_v46, %v4948_v0  ;;  %v4960_v2 = vmul.f32 %v6219_v51, %v4549_v13  ;;  %6220 = vpow2.f32 %v5894_v58  ;;  %vm4965_vm11 = vweird.f32 %v6219_v51 }
 0x8ed   : > { %v4957_v11 = vsel %vm4954_vm10, %v4956_v34, %v4952_v32  ;;  %6222 = vrcp.f32 %v4550_v38  ;;  %vm4966_vm13 = vmor %vm4964_vm12, %vm4965_vm11  ;;  %v4985_v63 = vand.u32 2147483648, %v4550_v38  ;;  %v4983_v1 = vand.u32 2147483647, %v4550_v38 }
 0x8ee   : > { %5061 = vst.msk [vmem:[%s8911_s28 + $0xd0] sm:$0xff] %vm5034_vm6, %v4957_v11  ;;  %v4961_v20 = vsub.f32 1.0, %v4960_v2  ;;  %vm4979_vm0 = vweird.f32 %v4550_v38 }
 0x8ef   : > { %v4390_v5 = vpop.xlane.xlu0 %4389  ;;  %v4986_v44 = vor.u32 1.1754944e-38, %v4985_v63  ;;  %vm4984_vm2 = vcmp.eq.f32.partialorder %v4983_v1, 8.507059e+37 }
 0x8f0   : > { %v4962_v35 = vmul.f32 %v6219_v51, %v4961_v20  ;;  %v4424_v22 = vadd.f32 %v9011_v41, %v4390_v5 }
 0x8f2   : > { %v6221_v43 = vpop.eup %6220  ;;  %v4963_v14 = vadd.f32 %v6219_v51, %v4962_v35  ;;  %v5895_v26 = vmul.f32 -1.442695, %v4424_v22 }
 0x8f3   : > { %v6223_v55 = vpop.eup %6222  ;;  %v4551_v54 = vadd.f32 1.0, %v6221_v43 }
 0x8f4   : > { %v4967_v53 = vsel %vm4966_vm13, %v6219_v51, %v4963_v14  ;;  %v4975_v42 = vmul.f32 %v6223_v55, %v4550_v38  ;;  %6224 = vpow2.f32 %v5895_v26  ;;  %vm4980_vm15 = vweird.f32 %v6223_v55 }
 0x8f5   : > { %v4972_v9 = vsel %vm4969_vm14, %v4971_v59, %v4967_v53  ;;  %6226 = vrcp.f32 %v4551_v54  ;;  %vm4981_vm1 = vmor %vm4979_vm0, %vm4980_vm15  ;;  %v5000_v29 = vand.u32 2147483648, %v4551_v54  ;;  %v4998_v21 = vand.u32 2147483647, %v4551_v54 }
 0x8f6   : > { %5062 = vst.msk [vmem:[%s8911_s28 + $0xd8] sm:$0xff] %vm5034_vm6, %v4972_v9  ;;  %v4976_v47 = vsub.f32 1.0, %v4975_v42  ;;  %vm4994_vm5 = vweird.f32 %v4551_v54 }
 0x8f7   : > { %v4393_v24 = vpop.xlane.xlu1 %4392  ;;  %v5001_v23 = vor.u32 1.1754944e-38, %v5000_v29  ;;  %vm4999_vm8 = vcmp.eq.f32.partialorder %v4998_v21, 8.507059e+37 }
 0x8f8   : > { %v4977_v10 = vmul.f32 %v6223_v55, %v4976_v47  ;;  %v4425_v25 = vadd.f32 %v9011_v41, %v4393_v24 }
 0x8fa   : > { %v6225_v16 = vpop.eup %6224  ;;  %v4978_v8 = vadd.f32 %v6223_v55, %v4977_v10  ;;  %v5896_v28 = vmul.f32 -1.442695, %v4425_v25 }
 0x8fb   : > { %v6227_v15 = vpop.eup %6226  ;;  %v4552_v3 = vadd.f32 1.0, %v6225_v16 }
 0x8fc   : > { %v4982_v31 = vsel %vm4981_vm1, %v6223_v55, %v4978_v8  ;;  %v4990_v18 = vmul.f32 %v6227_v15, %v4551_v54  ;;  %6228 = vpow2.f32 %v5896_v28  ;;  %vm4995_vm4 = vweird.f32 %v6227_v15 }
 0x8fd   : > { %v4987_v17 = vsel %vm4984_vm2, %v4986_v44, %v4982_v31  ;;  %6230 = vrcp.f32 %v4552_v3  ;;  %vm4996_vm7 = vmor %vm4994_vm5, %vm4995_vm4  ;;  %v5015_v46 = vand.u32 2147483648, %v4552_v3  ;;  %v5013_v13 = vand.u32 2147483647, %v4552_v3 }
 0x8fe   : > { %5063 = vst.msk [vmem:[%s8911_s28 + $0xe0] sm:$0xff] %vm5034_vm6, %v4987_v17  ;;  %v4991_v60 = vsub.f32 1.0, %v4990_v18  ;;  %vm5009_vm9 = vweird.f32 %v4552_v3 }
 0x8ff   : > { %v5016_v36 = vor.u32 1.1754944e-38, %v5015_v46  ;;  %vm5014_vm11 = vcmp.eq.f32.partialorder %v5013_v13, 8.507059e+37 }
 0x900   : > { %v4992_v41 = vmul.f32 %v6227_v15, %v4991_v60 }
 0x902   : > { %v6229_v39 = vpop.eup %6228  ;;  %v4993_v56 = vadd.f32 %v6227_v15, %v4992_v41 }
 0x903   : > { %v6231_v49 = vpop.eup %6230  ;;  %v4553_v4 = vadd.f32 1.0, %v6229_v39 }
 0x904   : > { %v4997_v19 = vsel %vm4996_vm7, %v6227_v15, %v4993_v56  ;;  %v5005_v6 = vmul.f32 %v6231_v49, %v4552_v3  ;;  %vm5010_vm3 = vweird.f32 %v6231_v49 }
 0x905   : > { %v5002_v57 = vsel %vm4999_vm8, %v5001_v23, %v4997_v19  ;;  %6232 = vrcp.f32 %v4553_v4  ;;  %vm5011_vm10 = vmor %vm5009_vm9, %vm5010_vm3  ;;  %v5030_v52 = vand.u32 2147483648, %v4553_v4  ;;  %v5028_v48 = vand.u32 2147483647, %v4553_v4 }
 0x906   : > { %5064 = vst.msk [vmem:[%s8911_s28 + $0xe8] sm:$0xff] %vm5034_vm6, %v5002_v57  ;;  %v5006_v40 = vsub.f32 1.0, %v5005_v6  ;;  %vm5024_vm13 = vweird.f32 %v4553_v4 }
 0x907   : > { %v5031_v58 = vor.u32 1.1754944e-38, %v5030_v52  ;;  %vm5029_vm15 = vcmp.eq.f32.partialorder %v5028_v48, 8.507059e+37 }
 0x908   : > { %v5007_v62 = vmul.f32 %v6231_v49, %v5006_v40 }
 0x90a   : > { %v5008_v50 = vadd.f32 %v6231_v49, %v5007_v62 }
 0x90b   : > { %v6233_v45 = vpop.eup %6232 }
 0x90c   : > { %v5012_v33 = vsel %vm5011_vm10, %v6231_v49, %v5008_v50  ;;  %v5020_v7 = vmul.f32 %v6233_v45, %v4553_v4  ;;  %vm5025_vm12 = vweird.f32 %v6233_v45 }
 0x90d   : > { %v5017_v12 = vsel %vm5014_vm11, %v5016_v36, %v5012_v33  ;;  %vm5026_vm14 = vmor %vm5024_vm13, %vm5025_vm12 }
 0x90e   : > { %5065 = vst.msk [vmem:[%s8911_s28 + $0xf0] sm:$0xff] %vm5034_vm6, %v5017_v12  ;;  %v5021_v37 = vsub.f32 1.0, %v5020_v7 }
 0x910   : > { %v5022_v61 = vmul.f32 %v6233_v45, %v5021_v37 }
 0x912   : > { %v5023_v0 = vadd.f32 %v6233_v45, %v5022_v61 }
 0x914   : > { %v5027_v51 = vsel %vm5026_vm14, %v6233_v45, %v5023_v0 }
 0x915   : > { %v5032_v34 = vsel %vm5029_vm15, %v5031_v58, %v5027_v51 }
 0x916   : > { %5066 = vst.msk [vmem:[%s8911_s28 + $0xf8] sm:$0xff] %vm5034_vm6, %v5032_v34 }
 0x917 PF: > { %s21_s13 = sadd.s32 1, %s6278_s13  }
 0x918   : > { %p18_p7 = scmp.ge.s32.totalorder %s21_s13, 5  }
 0x91a   :  { %20 = sbr.rel (!%p18_p7) target bundleno = 1 (0x1), region = 98 }
 0x91f   :  { %5089 = vsyncpa [#allocation3], 1 }
 0x920   :  { %5091 = vsyncpa [#allocation3 + $0x1], 1 }

</bundles_post_ra>
